<compile_context>
chip_gen: v5e
topology: v5e:2x2
jax: 0.10.0
libtpu: 0.0.40
codegen_flags: <defaults>
</compile_context>

<pallas_src>
import functools

import jax
import jax.numpy as jnp
from jax.experimental import pallas as pl
from jax.experimental.pallas import tpu as pltpu

NEG_SLOPE = 0.01  # torch.nn.LeakyReLU default negative_slope


# ----------------------------------------------------------------------------
# Architecture description (shared by kernel wrapper and JAX reference)
# ----------------------------------------------------------------------------
def _rfb_specs(in_channels, out_channels, visual):
    i = in_channels // 8
    return {
        "b0_0": dict(k=1, cin=in_channels, cout=2 * i, pad=0, dil=1, act=True),
        "b0_1": dict(k=3, cin=2 * i, cout=2 * i, pad=1, dil=1, act=False),
        "b1_0": dict(k=1, cin=in_channels, cout=i, pad=0, dil=1, act=True),
        "b1_1": dict(k=3, cin=i, cout=2 * i, pad=1, dil=1, act=True),
        "b1_2": dict(k=3, cin=2 * i, cout=2 * i, pad=1 + visual,
                     dil=1 + visual, act=False),
        "b2_0": dict(k=1, cin=in_channels, cout=i, pad=0, dil=1, act=True),
        "b2_1": dict(k=3, cin=i, cout=i // 2 * 3, pad=1, dil=1, act=True),
        "b2_2": dict(k=3, cin=i // 2 * 3, cout=2 * i, pad=1, dil=1, act=True),
        "b2_3": dict(k=3, cin=2 * i, cout=2 * i, pad=1 + 2 * visual,
                     dil=1 + 2 * visual, act=False),
        "concat": dict(k=1, cin=6 * i, cout=out_channels, pad=0, dil=1, act=False),
        "shortcut": dict(k=1, cin=in_channels, cout=out_channels, pad=0, dil=1,
                         act=False),
    }


# 3x3 convs in kernel-call order (branch-interleaved for ping-pong overlap).
_CONV3_ORDER = ("b0_1", "b1_1", "b2_1", "b1_2", "b2_2", "b2_3")


# ----------------------------------------------------------------------------
# Fused Pallas kernel
# ----------------------------------------------------------------------------
def _make_rfb_kernel(*, S, B, LP, HS, slot, i2, XIN, ONE, CATR, dils, acts):
    """S: padded row stride (lanes).  B: lane-aligned interior offset in the
    flat padded-image scratch.  slot: rows per activation slab / im2col tap.
    i2 = 2*inter_channels.  cat scratch rows: [0,6i)=x0|x1|x2, [XIN,ONE)=xin,
    [ONE]=1.0, rest 0."""
    ONES_OFF = 9 * slot  # first row of the constant bias block in im2col

    def lrelu(v):
        return jnp.where(v >= 0, v, NEG_SLOPE * v)

    def kernel(x_ref, mask_ref, w3_ref, we_ref, wh_ref, o_ref,
               pad0, pad1, col0, col1, cat_ref):
        # --- tiny per-step constant init (halo zeros + constant-1 bias rows).
        # Done every step (not pl.when(pid==0)): the batch axis is "parallel",
        # so a core may never execute pid 0.  Everything else in the scratch
        # buffers is fully overwritten before it is read.
        zlo = jnp.zeros((slot, B), jnp.float32)
        zhi = jnp.zeros((slot, LP - B - HS), jnp.float32)
        ones8 = (jax.lax.broadcasted_iota(jnp.int32, (8, HS), 0) == 0
                 ).astype(jnp.float32)
        for padq, colq in ((pad0, col0), (pad1, col1)):
            padq[:, 0:B] = zlo
            padq[:, B + HS:LP] = zhi
            colq[ONES_OFF:ONES_OFF + 8, :] = ones8
        cat_ref[ONE:CATR, :] = (
            jax.lax.broadcasted_iota(jnp.int32, (CATR - ONE, HS), 0) == 0
        ).astype(jnp.float32)

        maskb = mask_ref[...]                        # (slot, HS), hoisted

        # Stage xin into the fused "cat" scratch (feeds entry + shortcut/head).
        cat_ref[XIN:ONE, :] = x_ref[0]

        # --- fused entry: three branch 1x1 convs (+ biases via the ones row)
        # in ONE matmul, single LeakyReLU over the stacked result.
        e = lrelu(jnp.dot(we_ref[...], cat_ref[XIN:CATR, :],
                          preferred_element_type=jnp.float32))

        def conv3x3(xv, j, padq, colq):
            d = dils[j]
            # Zero per-row halo columns, drop the slab into the flat padded
            # scratch; everything outside [B, B+HS) stays exactly zero.
            padq[:, B:B + HS] = xv * maskb
            # im2col: every tap is a single flat lane-offset slice.
            for ky in range(3):
                for kx in range(3):
                    t = ky * 3 + kx
                    st = B + (ky - 1) * d * S + (kx - 1) * d
                    colq[t * slot:(t + 1) * slot, :] = padq[:, st:st + HS]
            # ONE MXU matmul per conv; bias folded into the ones-row columns.
            y = jnp.dot(w3_ref[j * slot:(j + 1) * slot, :], colq[...],
                        preferred_element_type=jnp.float32)
            return lrelu(y) if acts[j] else y

        x0e = e[0 * slot:1 * slot]
        x1e = e[1 * slot:2 * slot]
        x2e = e[2 * slot:3 * slot]

        # Branch-interleaved order + ping-pong pad/im2col buffers: conv k's
        # matmul can overlap conv k+1's im2col stores (no true dep between
        # most consecutive calls).
        y0 = conv3x3(x0e, 0, pad0, col0)          # b0_1
        cat_ref[0:i2, :] = y0[:i2]
        y1a = conv3x3(x1e, 1, pad1, col1)         # b1_1
        y2a = conv3x3(x2e, 2, pad0, col0)         # b2_1
        y1 = conv3x3(y1a, 3, pad1, col1)          # b1_2
        cat_ref[i2:2 * i2, :] = y1[:i2]
        y2b = conv3x3(y2a, 4, pad0, col0)         # b2_2
        y2 = conv3x3(y2b, 5, pad1, col1)          # b2_3
        cat_ref[2 * i2:3 * i2, :] = y2[:i2]

        # --- fused head: scale*(concat 1x1) + shortcut 1x1 + both biases,
        # all folded into ONE matmul, then LeakyReLU.
        head = jnp.dot(wh_ref[...], cat_ref[...],
                       preferred_element_type=jnp.float32)
        o_ref[0] = lrelu(head).astype(o_ref.dtype)

    return kernel


# ----------------------------------------------------------------------------
# Weight packing + wrapper
# ----------------------------------------------------------------------------
def _round_up(v, m):
    return ((v + m - 1) // m) * m


def _prep_w3x3(w, b, slot):
    """OIHW (cout,cin,3,3) -> (slot, 9*slot+8); bias folded into column 9*slot."""
    cout, cin, k, _ = w.shape
    wt = jnp.transpose(w, (0, 2, 3, 1)).reshape(cout, k * k, cin)
    wt = jnp.pad(wt, ((0, slot - cout), (0, 0), (0, slot - cin)))
    wt = wt.reshape(slot, k * k * slot)
    tail = jnp.zeros((slot, 8), w.dtype).at[:cout, 0].set(b)
    return jnp.concatenate([wt, tail], axis=1)


def _prep_entry_w(params, slot, cin, ew):
    """Stack the three branch-entry 1x1 convs into (3*slot, ew); bias in col cin."""
    blocks = []
    for name in ("b0_0", "b1_0", "b2_0"):
        w = params[name]["w"]
        b = params[name]["b"]
        co = w.shape[0]
        blk = jnp.zeros((slot, ew), jnp.float32)
        blk = blk.at[:co, :cin].set(w.reshape(co, cin))
        blk = blk.at[:co, cin].set(b)
        blocks.append(blk)
    return jnp.concatenate(blocks, axis=0)


def _prep_head_w(params, inter, cin, cout, catr, scale):
    """[scale*wc | ws | scale*bc+bs | 0] -> (cout, catr)."""
    wc = params["concat"]["w"].reshape(cout, 6 * inter)
    bc = params["concat"]["b"]
    ws = params["shortcut"]["w"].reshape(cout, cin)
    bs = params["shortcut"]["b"]
    wh = jnp.zeros((cout, catr), jnp.float32)
    wh = wh.at[:, :6 * inter].set(scale * wc)
    wh = wh.at[:, 6 * inter:6 * inter + cin].set(ws)
    wh = wh.at[:, 6 * inter + cin].set(scale * bc + bs)
    return wh


def rfb_forward_pallas(x, params, *, in_channels, out_channels,
                       scale=1.0, visual=2):
    """x: (N, Cin, H, W) NCHW (PyTorch layout).  Returns (N, Cout, H, W)."""
    specs = _rfb_specs(in_channels, out_channels, visual)
    N, C, H, W = x.shape
    assert C == in_channels
    inter = in_channels // 8
    i2 = 2 * inter

    convs3 = [specs[n] for n in _CONV3_ORDER]
    for s in convs3:
        assert s["pad"] == s["dil"], "3x3 convs must preserve spatial size"
    pmax = max(s["pad"] for s in convs3)
    slot = _round_up(max(max(s["cin"], s["cout"]) for s in convs3), 8)
    S = _round_up(W + 2 * pmax, 8)        # padded row stride (lanes)
    HS = H * S
    B = _round_up(pmax * S + pmax, 128)   # lane-aligned interior offset
    LP = _round_up(B + HS + pmax * S + pmax, 128)   # flat pad-buffer length
    # Flat-pad aliasing invariants (review concern): every tap window must stay
    # inside [0, LP) and the per-row halo must cover the largest dilation.
    assert S - W >= 2 * pmax
    assert B >= pmax * S + pmax
    assert LP >= B + HS + pmax * S + pmax
    assert i2 <= slot

    XIN = 6 * inter                       # cat row where the xin copy starts
    ONE = XIN + in_channels               # cat row holding the constant 1.0
    CATR = _round_up(ONE + 1, 8)          # total cat-scratch rows
    K3 = 9 * slot + 8                     # im2col contraction (incl. bias block)

    # Canonical in-kernel layout: (C, H*S); image row y lives at lanes
    # [y*S, y*S + W); trailing halo columns are zero.
    x_slab = jnp.pad(x, ((0, 0), (0, 0), (0, 0), (0, S - W))).reshape(N, C, HS)
    col = (jnp.arange(S) < W).astype(x.dtype)
    maskb = jnp.broadcast_to(jnp.tile(col, H)[None, :], (slot, HS))

    w3_all = jnp.concatenate(
        [_prep_w3x3(params[n]["w"], params[n]["b"], slot) for n in _CONV3_ORDER],
        axis=0)                                               # (6*slot, K3)
    w_entry = _prep_entry_w(params, slot, in_channels, CATR - XIN)
    w_head = _prep_head_w(params, inter, in_channels, out_channels, CATR,
                          float(scale))

    dils = tuple(specs[n]["dil"] for n in _CONV3_ORDER)
    acts = tuple(specs[n]["act"] for n in _CONV3_ORDER)

    kern = _make_rfb_kernel(S=S, B=B, LP=LP, HS=HS, slot=slot, i2=i2,
                            XIN=XIN, ONE=ONE, CATR=CATR, dils=dils, acts=acts)

    def fixed_spec(a):
        nd = a.ndim
        return pl.BlockSpec(a.shape, lambda b, _nd=nd: (0,) * _nd)

    args = [x_slab, maskb, w3_all, w_entry, w_head]
    in_specs = ([pl.BlockSpec((1, C, HS), lambda b: (b, 0, 0))]
                + [fixed_spec(a) for a in args[1:]])
    out_specs = pl.BlockSpec((1, out_channels, HS), lambda b: (b, 0, 0))

    out = pl.pallas_call(
        kern,
        out_shape=jax.ShapeDtypeStruct((N, out_channels, HS), x.dtype),
        grid=(N,),
        in_specs=in_specs,
        out_specs=out_specs,
        scratch_shapes=[
            pltpu.VMEM((slot, LP), jnp.float32),   # flat padded image, buffer 0
            pltpu.VMEM((slot, LP), jnp.float32),   # flat padded image, buffer 1
            pltpu.VMEM((K3, HS), jnp.float32),     # im2col stack, buffer 0
            pltpu.VMEM((K3, HS), jnp.float32),     # im2col stack, buffer 1
            pltpu.VMEM((CATR, HS), jnp.float32),   # fused concat/xin/ones scratch
        ],
        compiler_params=pltpu.CompilerParams(
            dimension_semantics=("parallel",)),
    )(*args)

    # (N, Cout, H*S) -> NCHW, dropping the per-row halo columns.
    return out.reshape(N, out_channels, H, S)[:, :, :, :W]


# ----------------------------------------------------------------------------
# Parameter construction (deterministic, synthetic)
# ----------------------------------------------------------------------------
def init_rfb_params(key, in_channels, out_channels, visual=2):
    specs = _rfb_specs(in_channels, out_channels, visual)
    keys = jax.random.split(key, len(specs))
    params = {}
    for k, (name, s) in zip(keys, specs.items()):
        kw, kb = jax.random.split(k)
        fan_in = s["k"] * s["k"] * s["cin"]
        w = jax.random.normal(kw, (s["cout"], s["cin"], s["k"], s["k"]),
                              jnp.float32) / jnp.sqrt(fan_in)
        b = jax.random.normal(kb, (s["cout"],), jnp.float32) * 0.01
        params[name] = {"w": w, "b": b}
    return params


# ----------------------------------------------------------------------------
# Pure-JAX reference (for correctness check)
# ----------------------------------------------------------------------------
def _conv_ref(x, w, b, pad, dil, act):
    y = jax.lax.conv_general_dilated(
        x, w, window_strides=(1, 1),
        padding=((pad, pad), (pad, pad)),
        rhs_dilation=(dil, dil),
        dimension_numbers=("NCHW", "OIHW", "NCHW"))
    y = y + b[None, :, None, None]
    if act:
        y = jnp.where(y >= 0, y, NEG_SLOPE * y)
    return y


def rfb_forward_ref(x, params, *, in_channels, out_channels, scale=1.0, visual=2):
    specs = _rfb_specs(in_channels, out_channels, visual)

    def conv(name, inp):
        s, p = specs[name], params[name]
        return _conv_ref(inp, p["w"], p["b"], s["pad"], s["dil"], s["act"])

    x0 = conv("b0_1", conv("b0_0", x))
    x1 = conv("b1_2", conv("b1_1", conv("b1_0", x)))
    x2 = conv("b2_3", conv("b2_2", conv("b2_1", conv("b2_0", x))))
    cat = jnp.concatenate([x0, x1, x2], axis=1)
    out = conv("concat", cat)
    sc = conv("shortcut", x)
    y = scale * out + sc
    return jnp.where(y >= 0, y, NEG_SLOPE * y)


# ----------------------------------------------------------------------------
if __name__ == "__main__":
    key = jax.random.PRNGKey(0)
    k_x, k_p = jax.random.split(key)

    N, H, W = 2, 16, 16
    in_channels, out_channels = 32, 32   # inter_channels = 4
    scale, visual = 1.0, 2

    # PyTorch layout NCHW
    x = jax.random.normal(k_x, (N, in_channels, H, W), jnp.float32)
    params = init_rfb_params(k_p, in_channels, out_channels, visual=visual)

    fwd = jax.jit(functools.partial(rfb_forward_pallas,
                                    in_channels=in_channels,
                                    out_channels=out_channels,
                                    scale=scale, visual=visual))
    out = jax.block_until_ready(fwd(x, params))

    ref = rfb_forward_ref(x, params, in_channels=in_channels,
                          out_channels=out_channels, scale=scale, visual=visual)

    assert out.shape == (N, out_channels, H, W)
    assert jnp.allclose(out, ref, rtol=2e-3, atol=2e-3), "mismatch vs JAX reference"

    print("KERNEL_OK")
</pallas_src>

<mosaic_0001>
module attributes {stable_mosaic.version = 11 : i64} {
  func.func @kernel(%arg0: i32, %arg1: memref<1x32x512xf32, #tpu.memory_space<vmem>>, %arg2: memref<8x512xf32, #tpu.memory_space<vmem>>, %arg3: memref<48x80xf32, #tpu.memory_space<vmem>>, %arg4: memref<24x40xf32, #tpu.memory_space<vmem>>, %arg5: memref<32x64xf32, #tpu.memory_space<vmem>>, %arg6: memref<1x32x512xf32, #tpu.memory_space<vmem>>, %arg7: memref<8x1024xf32, #tpu.memory_space<vmem>>, %arg8: memref<8x1024xf32, #tpu.memory_space<vmem>>, %arg9: memref<80x512xf32, #tpu.memory_space<vmem>>, %arg10: memref<80x512xf32, #tpu.memory_space<vmem>>, %arg11: memref<64x512xf32, #tpu.memory_space<vmem>>) attributes {dimension_semantics = [#tpu.dimension_semantics<parallel>], iteration_bounds = array<i64: 2>, scalar_prefetch = 0 : i64, scratch_operands = 5 : i64, tpu.core_type = #tpu.core_type<tc>, window_params = [{transform_indices = @transform_0, window_bounds = array<i64: 1, 32, 512>}, {pipeline_mode = #tpu.pipeline_mode<synchronous>, transform_indices = @transform_1, window_bounds = array<i64: 8, 512>}, {pipeline_mode = #tpu.pipeline_mode<synchronous>, transform_indices = @transform_2, window_bounds = array<i64: 48, 80>}, {pipeline_mode = #tpu.pipeline_mode<synchronous>, transform_indices = @transform_3, window_bounds = array<i64: 24, 40>}, {pipeline_mode = #tpu.pipeline_mode<synchronous>, transform_indices = @transform_4, window_bounds = array<i64: 32, 64>}, {transform_indices = @transform_5, window_bounds = array<i64: 1, 32, 512>}]} {
    %cst = arith.constant 0.000000e+00 : f32
    %0 = vector.broadcast %cst : f32 to vector<8x256xf32>
    %cst_0 = arith.constant 0.000000e+00 : f32
    %1 = vector.broadcast %cst_0 : f32 to vector<8x256xf32>
    %2 = tpu.iota {dimensions = array<i32: 0>} : vector<8x512xi32>
    %c0_i32 = arith.constant 0 : i32
    %3 = vector.broadcast %c0_i32 : i32 to vector<8x512xi32>
    %4 = arith.cmpi eq, %2, %3 : vector<8x512xi32>
    %5 = arith.extui %4 : vector<8x512xi1> to vector<8x512xi32>
    %6 = arith.sitofp %5 : vector<8x512xi32> to vector<8x512xf32>
    %c0 = arith.constant 0 : index
    %c0_1 = arith.constant 0 : index
    %7 = vector.load %arg7[%c0, %c0_1] : memref<8x1024xf32, #tpu.memory_space<vmem>>, vector<8x256xf32>
    tpu.vector_store %arg7[%c0, %c0_1], %0 {strides = array<i32>} : memref<8x1024xf32, #tpu.memory_space<vmem>>, vector<8x256xf32>,
    %c0_2 = arith.constant 0 : index
    %c768 = arith.constant 768 : index
    %8 = vector.load %arg7[%c0_2, %c768] : memref<8x1024xf32, #tpu.memory_space<vmem>>, vector<8x256xf32>
    tpu.vector_store %arg7[%c0_2, %c768], %1 {strides = array<i32>} : memref<8x1024xf32, #tpu.memory_space<vmem>>, vector<8x256xf32>,
    %c72 = arith.constant 72 : index
    %c0_3 = arith.constant 0 : index
    %9 = vector.load %arg9[%c72, %c0_3] : memref<80x512xf32, #tpu.memory_space<vmem>>, vector<8x512xf32>
    tpu.vector_store %arg9[%c72, %c0_3], %6 {strides = array<i32>} : memref<80x512xf32, #tpu.memory_space<vmem>>, vector<8x512xf32>,
    %c0_4 = arith.constant 0 : index
    %c0_5 = arith.constant 0 : index
    %10 = vector.load %arg8[%c0_4, %c0_5] : memref<8x1024xf32, #tpu.memory_space<vmem>>, vector<8x256xf32>
    tpu.vector_store %arg8[%c0_4, %c0_5], %0 {strides = array<i32>} : memref<8x1024xf32, #tpu.memory_space<vmem>>, vector<8x256xf32>,
    %c0_6 = arith.constant 0 : index
    %c768_7 = arith.constant 768 : index
    %11 = vector.load %arg8[%c0_6, %c768_7] : memref<8x1024xf32, #tpu.memory_space<vmem>>, vector<8x256xf32>
    tpu.vector_store %arg8[%c0_6, %c768_7], %1 {strides = array<i32>} : memref<8x1024xf32, #tpu.memory_space<vmem>>, vector<8x256xf32>,
    %c72_8 = arith.constant 72 : index
    %c0_9 = arith.constant 0 : index
    %12 = vector.load %arg10[%c72_8, %c0_9] : memref<80x512xf32, #tpu.memory_space<vmem>>, vector<8x512xf32>
    tpu.vector_store %arg10[%c72_8, %c0_9], %6 {strides = array<i32>} : memref<80x512xf32, #tpu.memory_space<vmem>>, vector<8x512xf32>,
    %13 = tpu.iota {dimensions = array<i32: 0>} : vector<8x512xi32>
    %c0_i32_10 = arith.constant 0 : i32
    %14 = vector.broadcast %c0_i32_10 : i32 to vector<8x512xi32>
    %15 = arith.cmpi eq, %13, %14 : vector<8x512xi32>
    %16 = arith.extui %15 : vector<8x512xi1> to vector<8x512xi32>
    %17 = arith.sitofp %16 : vector<8x512xi32> to vector<8x512xf32>
    %c56 = arith.constant 56 : index
    %c0_11 = arith.constant 0 : index
    %18 = vector.load %arg11[%c56, %c0_11] : memref<64x512xf32, #tpu.memory_space<vmem>>, vector<8x512xf32>
    tpu.vector_store %arg11[%c56, %c0_11], %17 {strides = array<i32>} : memref<64x512xf32, #tpu.memory_space<vmem>>, vector<8x512xf32>,
    %c0_12 = arith.constant 0 : index
    %c0_13 = arith.constant 0 : index
    %19 = vector.load %arg2[%c0_12, %c0_13] : memref<8x512xf32, #tpu.memory_space<vmem>>, vector<8x512xf32>
    %c0_14 = arith.constant 0 : index
    %c0_15 = arith.constant 0 : index
    %c0_16 = arith.constant 0 : index
    %20 = vector.load %arg1[%c0_14, %c0_15, %c0_16] : memref<1x32x512xf32, #tpu.memory_space<vmem>>, vector<1x32x512xf32>
    %21 = vector.shape_cast %20 : vector<1x32x512xf32> to vector<32x512xf32>
    %c24 = arith.constant 24 : index
    %c0_17 = arith.constant 0 : index
    %22 = vector.load %arg11[%c24, %c0_17] : memref<64x512xf32, #tpu.memory_space<vmem>>, vector<32x512xf32>
    tpu.vector_store %arg11[%c24, %c0_17], %21 {strides = array<i32>} : memref<64x512xf32, #tpu.memory_space<vmem>>, vector<32x512xf32>,
    %c0_18 = arith.constant 0 : index
    %c0_19 = arith.constant 0 : index
    %23 = vector.load %arg4[%c0_18, %c0_19] : memref<24x40xf32, #tpu.memory_space<vmem>>, vector<24x40xf32>
    %c24_20 = arith.constant 24 : index
    %c0_21 = arith.constant 0 : index
    %24 = vector.load %arg11[%c24_20, %c0_21] : memref<64x512xf32, #tpu.memory_space<vmem>>, vector<40x512xf32>
    %cst_22 = arith.constant dense<0.000000e+00> : vector<24x512xf32>
    %25 = tpu.matmul %23, %24, %cst_22 {dimension_numbers = #tpu.dot_dimension_numbers<[1], [0], [0], [1], [0, 0, 1, 1], [], []>} : vector<24x40xf32>, vector<40x512xf32>, vector<24x512xf32> -> vector<24x512xf32>
    %cst_23 = arith.constant 0.000000e+00 : f32
    %26 = vector.broadcast %cst_23 : f32 to vector<24x512xf32>
    %27 = arith.cmpf oge, %25, %26 : vector<24x512xf32>
    %cst_24 = arith.constant 0.00999999977 : f32
    %28 = vector.broadcast %cst_24 : f32 to vector<24x512xf32>
    %29 = arith.mulf %28, %25 : vector<24x512xf32>
    %30 = arith.select %27, %25, %29 : vector<24x512xi1>, vector<24x512xf32>
    %31 = vector.extract_strided_slice %30 {offsets = [0, 0], sizes = [8, 512], strides = [1, 1]} : vector<24x512xf32> to vector<8x512xf32>
    %32 = vector.extract_strided_slice %30 {offsets = [8, 0], sizes = [8, 512], strides = [1, 1]} : vector<24x512xf32> to vector<8x512xf32>
    %33 = vector.extract_strided_slice %30 {offsets = [16, 0], sizes = [8, 512], strides = [1, 1]} : vector<24x512xf32> to vector<8x512xf32>
    %34 = arith.mulf %31, %19 : vector<8x512xf32>
    %c0_25 = arith.constant 0 : index
    %c256 = arith.constant 256 : index
    %35 = vector.load %arg7[%c0_25, %c256] : memref<8x1024xf32, #tpu.memory_space<vmem>>, vector<8x512xf32>
    tpu.vector_store %arg7[%c0_25, %c256], %34 {strides = array<i32>} : memref<8x1024xf32, #tpu.memory_space<vmem>>, vector<8x512xf32>,
    %c0_26 = arith.constant 0 : index
    %c223 = arith.constant 223 : index
    %36 = vector.load %arg7[%c0_26, %c223] : memref<8x1024xf32, #tpu.memory_space<vmem>>, vector<8x512xf32>
    %c0_27 = arith.constant 0 : index
    %c0_28 = arith.constant 0 : index
    %37 = vector.load %arg9[%c0_27, %c0_28] : memref<80x512xf32, #tpu.memory_space<vmem>>, vector<8x512xf32>
    tpu.vector_store %arg9[%c0_27, %c0_28], %36 {strides = array<i32>} : memref<80x512xf32, #tpu.memory_space<vmem>>, vector<8x512xf32>,
    %c0_29 = arith.constant 0 : index
    %c224 = arith.constant 224 : index
    %38 = vector.load %arg7[%c0_29, %c224] : memref<8x1024xf32, #tpu.memory_space<vmem>>, vector<8x512xf32>
    %c8 = arith.constant 8 : index
    %c0_30 = arith.constant 0 : index
    %39 = vector.load %arg9[%c8, %c0_30] : memref<80x512xf32, #tpu.memory_space<vmem>>, vector<8x512xf32>
    tpu.vector_store %arg9[%c8, %c0_30], %38 {strides = array<i32>} : memref<80x512xf32, #tpu.memory_space<vmem>>, vector<8x512xf32>,
    %c0_31 = arith.constant 0 : index
    %c225 = arith.constant 225 : index
    %40 = vector.load %arg7[%c0_31, %c225] : memref<8x1024xf32, #tpu.memory_space<vmem>>, vector<8x512xf32>
    %c16 = arith.constant 16 : index
    %c0_32 = arith.constant 0 : index
    %41 = vector.load %arg9[%c16, %c0_32] : memref<80x512xf32, #tpu.memory_space<vmem>>, vector<8x512xf32>
    tpu.vector_store %arg9[%c16, %c0_32], %40 {strides = array<i32>} : memref<80x512xf32, #tpu.memory_space<vmem>>, vector<8x512xf32>,
    %c0_33 = arith.constant 0 : index
    %c255 = arith.constant 255 : index
    %42 = vector.load %arg7[%c0_33, %c255] : memref<8x1024xf32, #tpu.memory_space<vmem>>, vector<8x512xf32>
    %c24_34 = arith.constant 24 : index
    %c0_35 = arith.constant 0 : index
    %43 = vector.load %arg9[%c24_34, %c0_35] : memref<80x512xf32, #tpu.memory_space<vmem>>, vector<8x512xf32>
    tpu.vector_store %arg9[%c24_34, %c0_35], %42 {strides = array<i32>} : memref<80x512xf32, #tpu.memory_space<vmem>>, vector<8x512xf32>,
    %c0_36 = arith.constant 0 : index
    %c256_37 = arith.constant 256 : index
    %44 = vector.load %arg7[%c0_36, %c256_37] : memref<8x1024xf32, #tpu.memory_space<vmem>>, vector<8x512xf32>
    %c32 = arith.constant 32 : index
    %c0_38 = arith.constant 0 : index
    %45 = vector.load %arg9[%c32, %c0_38] : memref<80x512xf32, #tpu.memory_space<vmem>>, vector<8x512xf32>
    tpu.vector_store %arg9[%c32, %c0_38], %44 {strides = array<i32>} : memref<80x512xf32, #tpu.memory_space<vmem>>, vector<8x512xf32>,
    %c0_39 = arith.constant 0 : index
    %c257 = arith.constant 257 : index
    %46 = vector.load %arg7[%c0_39, %c257] : memref<8x1024xf32, #tpu.memory_space<vmem>>, vector<8x512xf32>
    %c40 = arith.constant 40 : index
    %c0_40 = arith.constant 0 : index
    %47 = vector.load %arg9[%c40, %c0_40] : memref<80x512xf32, #tpu.memory_space<vmem>>, vector<8x512xf32>
    tpu.vector_store %arg9[%c40, %c0_40], %46 {strides = array<i32>} : memref<80x512xf32, #tpu.memory_space<vmem>>, vector<8x512xf32>,
    %c0_41 = arith.constant 0 : index
    %c287 = arith.constant 287 : index
    %48 = vector.load %arg7[%c0_41, %c287] : memref<8x1024xf32, #tpu.memory_space<vmem>>, vector<8x512xf32>
    %c48 = arith.constant 48 : index
    %c0_42 = arith.constant 0 : index
    %49 = vector.load %arg9[%c48, %c0_42] : memref<80x512xf32, #tpu.memory_space<vmem>>, vector<8x512xf32>
    tpu.vector_store %arg9[%c48, %c0_42], %48 {strides = array<i32>} : memref<80x512xf32, #tpu.memory_space<vmem>>, vector<8x512xf32>,
    %c0_43 = arith.constant 0 : index
    %c288 = arith.constant 288 : index
    %50 = vector.load %arg7[%c0_43, %c288] : memref<8x1024xf32, #tpu.memory_space<vmem>>, vector<8x512xf32>
    %c56_44 = arith.constant 56 : index
    %c0_45 = arith.constant 0 : index
    %51 = vector.load %arg9[%c56_44, %c0_45] : memref<80x512xf32, #tpu.memory_space<vmem>>, vector<8x512xf32>
    tpu.vector_store %arg9[%c56_44, %c0_45], %50 {strides = array<i32>} : memref<80x512xf32, #tpu.memory_space<vmem>>, vector<8x512xf32>,
    %c0_46 = arith.constant 0 : index
    %c289 = arith.constant 289 : index
    %52 = vector.load %arg7[%c0_46, %c289] : memref<8x1024xf32, #tpu.memory_space<vmem>>, vector<8x512xf32>
    %c64 = arith.constant 64 : index
    %c0_47 = arith.constant 0 : index
    %53 = vector.load %arg9[%c64, %c0_47] : memref<80x512xf32, #tpu.memory_space<vmem>>, vector<8x512xf32>
    tpu.vector_store %arg9[%c64, %c0_47], %52 {strides = array<i32>} : memref<80x512xf32, #tpu.memory_space<vmem>>, vector<8x512xf32>,
    %c0_48 = arith.constant 0 : index
    %c0_49 = arith.constant 0 : index
    %54 = vector.load %arg3[%c0_48, %c0_49] : memref<48x80xf32, #tpu.memory_space<vmem>>, vector<8x80xf32>
    %c0_50 = arith.constant 0 : index
    %c0_51 = arith.constant 0 : index
    %55 = vector.load %arg9[%c0_50, %c0_51] : memref<80x512xf32, #tpu.memory_space<vmem>>, vector<80x512xf32>
    %cst_52 = arith.constant dense<0.000000e+00> : vector<8x512xf32>
    %56 = tpu.matmul %54, %55, %cst_52 {dimension_numbers = #tpu.dot_dimension_numbers<[1], [0], [0], [1], [0, 0, 1, 1], [], []>} : vector<8x80xf32>, vector<80x512xf32>, vector<8x512xf32> -> vector<8x512xf32>
    %c0_53 = arith.constant 0 : index
    %c0_54 = arith.constant 0 : index
    %57 = vector.load %arg11[%c0_53, %c0_54] : memref<64x512xf32, #tpu.memory_space<vmem>>, vector<8x512xf32>
    tpu.vector_store %arg11[%c0_53, %c0_54], %56 {strides = array<i32>} : memref<64x512xf32, #tpu.memory_space<vmem>>, vector<8x512xf32>,
    %58 = arith.mulf %32, %19 : vector<8x512xf32>
    %c0_55 = arith.constant 0 : index
    %c256_56 = arith.constant 256 : index
    %59 = vector.load %arg8[%c0_55, %c256_56] : memref<8x1024xf32, #tpu.memory_space<vmem>>, vector<8x512xf32>
    tpu.vector_store %arg8[%c0_55, %c256_56], %58 {strides = array<i32>} : memref<8x1024xf32, #tpu.memory_space<vmem>>, vector<8x512xf32>,
    %c0_57 = arith.constant 0 : index
    %c223_58 = arith.constant 223 : index
    %60 = vector.load %arg8[%c0_57, %c223_58] : memref<8x1024xf32, #tpu.memory_space<vmem>>, vector<8x512xf32>
    %c0_59 = arith.constant 0 : index
    %c0_60 = arith.constant 0 : index
    %61 = vector.load %arg10[%c0_59, %c0_60] : memref<80x512xf32, #tpu.memory_space<vmem>>, vector<8x512xf32>
    tpu.vector_store %arg10[%c0_59, %c0_60], %60 {strides = array<i32>} : memref<80x512xf32, #tpu.memory_space<vmem>>, vector<8x512xf32>,
    %c0_61 = arith.constant 0 : index
    %c224_62 = arith.constant 224 : index
    %62 = vector.load %arg8[%c0_61, %c224_62] : memref<8x1024xf32, #tpu.memory_space<vmem>>, vector<8x512xf32>
    %c8_63 = arith.constant 8 : index
    %c0_64 = arith.constant 0 : index
    %63 = vector.load %arg10[%c8_63, %c0_64] : memref<80x512xf32, #tpu.memory_space<vmem>>, vector<8x512xf32>
    tpu.vector_store %arg10[%c8_63, %c0_64], %62 {strides = array<i32>} : memref<80x512xf32, #tpu.memory_space<vmem>>, vector<8x512xf32>,
    %c0_65 = arith.constant 0 : index
    %c225_66 = arith.constant 225 : index
    %64 = vector.load %arg8[%c0_65, %c225_66] : memref<8x1024xf32, #tpu.memory_space<vmem>>, vector<8x512xf32>
    %c16_67 = arith.constant 16 : index
    %c0_68 = arith.constant 0 : index
    %65 = vector.load %arg10[%c16_67, %c0_68] : memref<80x512xf32, #tpu.memory_space<vmem>>, vector<8x512xf32>
    tpu.vector_store %arg10[%c16_67, %c0_68], %64 {strides = array<i32>} : memref<80x512xf32, #tpu.memory_space<vmem>>, vector<8x512xf32>,
    %c0_69 = arith.constant 0 : index
    %c255_70 = arith.constant 255 : index
    %66 = vector.load %arg8[%c0_69, %c255_70] : memref<8x1024xf32, #tpu.memory_space<vmem>>, vector<8x512xf32>
    %c24_71 = arith.constant 24 : index
    %c0_72 = arith.constant 0 : index
    %67 = vector.load %arg10[%c24_71, %c0_72] : memref<80x512xf32, #tpu.memory_space<vmem>>, vector<8x512xf32>
    tpu.vector_store %arg10[%c24_71, %c0_72], %66 {strides = array<i32>} : memref<80x512xf32, #tpu.memory_space<vmem>>, vector<8x512xf32>,
    %c0_73 = arith.constant 0 : index
    %c256_74 = arith.constant 256 : index
    %68 = vector.load %arg8[%c0_73, %c256_74] : memref<8x1024xf32, #tpu.memory_space<vmem>>, vector<8x512xf32>
    %c32_75 = arith.constant 32 : index
    %c0_76 = arith.constant 0 : index
    %69 = vector.load %arg10[%c32_75, %c0_76] : memref<80x512xf32, #tpu.memory_space<vmem>>, vector<8x512xf32>
    tpu.vector_store %arg10[%c32_75, %c0_76], %68 {strides = array<i32>} : memref<80x512xf32, #tpu.memory_space<vmem>>, vector<8x512xf32>,
    %c0_77 = arith.constant 0 : index
    %c257_78 = arith.constant 257 : index
    %70 = vector.load %arg8[%c0_77, %c257_78] : memref<8x1024xf32, #tpu.memory_space<vmem>>, vector<8x512xf32>
    %c40_79 = arith.constant 40 : index
    %c0_80 = arith.constant 0 : index
    %71 = vector.load %arg10[%c40_79, %c0_80] : memref<80x512xf32, #tpu.memory_space<vmem>>, vector<8x512xf32>
    tpu.vector_store %arg10[%c40_79, %c0_80], %70 {strides = array<i32>} : memref<80x512xf32, #tpu.memory_space<vmem>>, vector<8x512xf32>,
    %c0_81 = arith.constant 0 : index
    %c287_82 = arith.constant 287 : index
    %72 = vector.load %arg8[%c0_81, %c287_82] : memref<8x1024xf32, #tpu.memory_space<vmem>>, vector<8x512xf32>
    %c48_83 = arith.constant 48 : index
    %c0_84 = arith.constant 0 : index
    %73 = vector.load %arg10[%c48_83, %c0_84] : memref<80x512xf32, #tpu.memory_space<vmem>>, vector<8x512xf32>
    tpu.vector_store %arg10[%c48_83, %c0_84], %72 {strides = array<i32>} : memref<80x512xf32, #tpu.memory_space<vmem>>, vector<8x512xf32>,
    %c0_85 = arith.constant 0 : index
    %c288_86 = arith.constant 288 : index
    %74 = vector.load %arg8[%c0_85, %c288_86] : memref<8x1024xf32, #tpu.memory_space<vmem>>, vector<8x512xf32>
    %c56_87 = arith.constant 56 : index
    %c0_88 = arith.constant 0 : index
    %75 = vector.load %arg10[%c56_87, %c0_88] : memref<80x512xf32, #tpu.memory_space<vmem>>, vector<8x512xf32>
    tpu.vector_store %arg10[%c56_87, %c0_88], %74 {strides = array<i32>} : memref<80x512xf32, #tpu.memory_space<vmem>>, vector<8x512xf32>,
    %c0_89 = arith.constant 0 : index
    %c289_90 = arith.constant 289 : index
    %76 = vector.load %arg8[%c0_89, %c289_90] : memref<8x1024xf32, #tpu.memory_space<vmem>>, vector<8x512xf32>
    %c64_91 = arith.constant 64 : index
    %c0_92 = arith.constant 0 : index
    %77 = vector.load %arg10[%c64_91, %c0_92] : memref<80x512xf32, #tpu.memory_space<vmem>>, vector<8x512xf32>
    tpu.vector_store %arg10[%c64_91, %c0_92], %76 {strides = array<i32>} : memref<80x512xf32, #tpu.memory_space<vmem>>, vector<8x512xf32>,
    %c8_93 = arith.constant 8 : index
    %c0_94 = arith.constant 0 : index
    %78 = vector.load %arg3[%c8_93, %c0_94] : memref<48x80xf32, #tpu.memory_space<vmem>>, vector<8x80xf32>
    %c0_95 = arith.constant 0 : index
    %c0_96 = arith.constant 0 : index
    %79 = vector.load %arg10[%c0_95, %c0_96] : memref<80x512xf32, #tpu.memory_space<vmem>>, vector<80x512xf32>
    %cst_97 = arith.constant dense<0.000000e+00> : vector<8x512xf32>
    %80 = tpu.matmul %78, %79, %cst_97 {dimension_numbers = #tpu.dot_dimension_numbers<[1], [0], [0], [1], [0, 0, 1, 1], [], []>} : vector<8x80xf32>, vector<80x512xf32>, vector<8x512xf32> -> vector<8x512xf32>
    %cst_98 = arith.constant 0.000000e+00 : f32
    %81 = vector.broadcast %cst_98 : f32 to vector<8x512xf32>
    %82 = arith.cmpf oge, %80, %81 : vector<8x512xf32>
    %cst_99 = arith.constant 0.00999999977 : f32
    %83 = vector.broadcast %cst_99 : f32 to vector<8x512xf32>
    %84 = arith.mulf %83, %80 : vector<8x512xf32>
    %85 = arith.select %82, %80, %84 : vector<8x512xi1>, vector<8x512xf32>
    %86 = arith.mulf %33, %19 : vector<8x512xf32>
    %c0_100 = arith.constant 0 : index
    %c256_101 = arith.constant 256 : index
    %87 = vector.load %arg7[%c0_100, %c256_101] : memref<8x1024xf32, #tpu.memory_space<vmem>>, vector<8x512xf32>
    tpu.vector_store %arg7[%c0_100, %c256_101], %86 {strides = array<i32>} : memref<8x1024xf32, #tpu.memory_space<vmem>>, vector<8x512xf32>,
    %c0_102 = arith.constant 0 : index
    %c223_103 = arith.constant 223 : index
    %88 = vector.load %arg7[%c0_102, %c223_103] : memref<8x1024xf32, #tpu.memory_space<vmem>>, vector<8x512xf32>
    %c0_104 = arith.constant 0 : index
    %c0_105 = arith.constant 0 : index
    %89 = vector.load %arg9[%c0_104, %c0_105] : memref<80x512xf32, #tpu.memory_space<vmem>>, vector<8x512xf32>
    tpu.vector_store %arg9[%c0_104, %c0_105], %88 {strides = array<i32>} : memref<80x512xf32, #tpu.memory_space<vmem>>, vector<8x512xf32>,
    %c0_106 = arith.constant 0 : index
    %c224_107 = arith.constant 224 : index
    %90 = vector.load %arg7[%c0_106, %c224_107] : memref<8x1024xf32, #tpu.memory_space<vmem>>, vector<8x512xf32>
    %c8_108 = arith.constant 8 : index
    %c0_109 = arith.constant 0 : index
    %91 = vector.load %arg9[%c8_108, %c0_109] : memref<80x512xf32, #tpu.memory_space<vmem>>, vector<8x512xf32>
    tpu.vector_store %arg9[%c8_108, %c0_109], %90 {strides = array<i32>} : memref<80x512xf32, #tpu.memory_space<vmem>>, vector<8x512xf32>,
    %c0_110 = arith.constant 0 : index
    %c225_111 = arith.constant 225 : index
    %92 = vector.load %arg7[%c0_110, %c225_111] : memref<8x1024xf32, #tpu.memory_space<vmem>>, vector<8x512xf32>
    %c16_112 = arith.constant 16 : index
    %c0_113 = arith.constant 0 : index
    %93 = vector.load %arg9[%c16_112, %c0_113] : memref<80x512xf32, #tpu.memory_space<vmem>>, vector<8x512xf32>
    tpu.vector_store %arg9[%c16_112, %c0_113], %92 {strides = array<i32>} : memref<80x512xf32, #tpu.memory_space<vmem>>, vector<8x512xf32>,
    %c0_114 = arith.constant 0 : index
    %c255_115 = arith.constant 255 : index
    %94 = vector.load %arg7[%c0_114, %c255_115] : memref<8x1024xf32, #tpu.memory_space<vmem>>, vector<8x512xf32>
    %c24_116 = arith.constant 24 : index
    %c0_117 = arith.constant 0 : index
    %95 = vector.load %arg9[%c24_116, %c0_117] : memref<80x512xf32, #tpu.memory_space<vmem>>, vector<8x512xf32>
    tpu.vector_store %arg9[%c24_116, %c0_117], %94 {strides = array<i32>} : memref<80x512xf32, #tpu.memory_space<vmem>>, vector<8x512xf32>,
    %c0_118 = arith.constant 0 : index
    %c256_119 = arith.constant 256 : index
    %96 = vector.load %arg7[%c0_118, %c256_119] : memref<8x1024xf32, #tpu.memory_space<vmem>>, vector<8x512xf32>
    %c32_120 = arith.constant 32 : index
    %c0_121 = arith.constant 0 : index
    %97 = vector.load %arg9[%c32_120, %c0_121] : memref<80x512xf32, #tpu.memory_space<vmem>>, vector<8x512xf32>
    tpu.vector_store %arg9[%c32_120, %c0_121], %96 {strides = array<i32>} : memref<80x512xf32, #tpu.memory_space<vmem>>, vector<8x512xf32>,
    %c0_122 = arith.constant 0 : index
    %c257_123 = arith.constant 257 : index
    %98 = vector.load %arg7[%c0_122, %c257_123] : memref<8x1024xf32, #tpu.memory_space<vmem>>, vector<8x512xf32>
    %c40_124 = arith.constant 40 : index
    %c0_125 = arith.constant 0 : index
    %99 = vector.load %arg9[%c40_124, %c0_125] : memref<80x512xf32, #tpu.memory_space<vmem>>, vector<8x512xf32>
    tpu.vector_store %arg9[%c40_124, %c0_125], %98 {strides = array<i32>} : memref<80x512xf32, #tpu.memory_space<vmem>>, vector<8x512xf32>,
    %c0_126 = arith.constant 0 : index
    %c287_127 = arith.constant 287 : index
    %100 = vector.load %arg7[%c0_126, %c287_127] : memref<8x1024xf32, #tpu.memory_space<vmem>>, vector<8x512xf32>
    %c48_128 = arith.constant 48 : index
    %c0_129 = arith.constant 0 : index
    %101 = vector.load %arg9[%c48_128, %c0_129] : memref<80x512xf32, #tpu.memory_space<vmem>>, vector<8x512xf32>
    tpu.vector_store %arg9[%c48_128, %c0_129], %100 {strides = array<i32>} : memref<80x512xf32, #tpu.memory_space<vmem>>, vector<8x512xf32>,
    %c0_130 = arith.constant 0 : index
    %c288_131 = arith.constant 288 : index
    %102 = vector.load %arg7[%c0_130, %c288_131] : memref<8x1024xf32, #tpu.memory_space<vmem>>, vector<8x512xf32>
    %c56_132 = arith.constant 56 : index
    %c0_133 = arith.constant 0 : index
    %103 = vector.load %arg9[%c56_132, %c0_133] : memref<80x512xf32, #tpu.memory_space<vmem>>, vector<8x512xf32>
    tpu.vector_store %arg9[%c56_132, %c0_133], %102 {strides = array<i32>} : memref<80x512xf32, #tpu.memory_space<vmem>>, vector<8x512xf32>,
    %c0_134 = arith.constant 0 : index
    %c289_135 = arith.constant 289 : index
    %104 = vector.load %arg7[%c0_134, %c289_135] : memref<8x1024xf32, #tpu.memory_space<vmem>>, vector<8x512xf32>
    %c64_136 = arith.constant 64 : index
    %c0_137 = arith.constant 0 : index
    %105 = vector.load %arg9[%c64_136, %c0_137] : memref<80x512xf32, #tpu.memory_space<vmem>>, vector<8x512xf32>
    tpu.vector_store %arg9[%c64_136, %c0_137], %104 {strides = array<i32>} : memref<80x512xf32, #tpu.memory_space<vmem>>, vector<8x512xf32>,
    %c16_138 = arith.constant 16 : index
    %c0_139 = arith.constant 0 : index
    %106 = vector.load %arg3[%c16_138, %c0_139] : memref<48x80xf32, #tpu.memory_space<vmem>>, vector<8x80xf32>
    %c0_140 = arith.constant 0 : index
    %c0_141 = arith.constant 0 : index
    %107 = vector.load %arg9[%c0_140, %c0_141] : memref<80x512xf32, #tpu.memory_space<vmem>>, vector<80x512xf32>
    %cst_142 = arith.constant dense<0.000000e+00> : vector<8x512xf32>
    %108 = tpu.matmul %106, %107, %cst_142 {dimension_numbers = #tpu.dot_dimension_numbers<[1], [0], [0], [1], [0, 0, 1, 1], [], []>} : vector<8x80xf32>, vector<80x512xf32>, vector<8x512xf32> -> vector<8x512xf32>
    %cst_143 = arith.constant 0.000000e+00 : f32
    %109 = vector.broadcast %cst_143 : f32 to vector<8x512xf32>
    %110 = arith.cmpf oge, %108, %109 : vector<8x512xf32>
    %cst_144 = arith.constant 0.00999999977 : f32
    %111 = vector.broadcast %cst_144 : f32 to vector<8x512xf32>
    %112 = arith.mulf %111, %108 : vector<8x512xf32>
    %113 = arith.select %110, %108, %112 : vector<8x512xi1>, vector<8x512xf32>
    %114 = arith.mulf %85, %19 : vector<8x512xf32>
    %c0_145 = arith.constant 0 : index
    %c256_146 = arith.constant 256 : index
    %115 = vector.load %arg8[%c0_145, %c256_146] : memref<8x1024xf32, #tpu.memory_space<vmem>>, vector<8x512xf32>
    tpu.vector_store %arg8[%c0_145, %c256_146], %114 {strides = array<i32>} : memref<8x1024xf32, #tpu.memory_space<vmem>>, vector<8x512xf32>,
    %c0_147 = arith.constant 0 : index
    %c157 = arith.constant 157 : index
    %116 = vector.load %arg8[%c0_147, %c157] : memref<8x1024xf32, #tpu.memory_space<vmem>>, vector<8x512xf32>
    %c0_148 = arith.constant 0 : index
    %c0_149 = arith.constant 0 : index
    %117 = vector.load %arg10[%c0_148, %c0_149] : memref<80x512xf32, #tpu.memory_space<vmem>>, vector<8x512xf32>
    tpu.vector_store %arg10[%c0_148, %c0_149], %116 {strides = array<i32>} : memref<80x512xf32, #tpu.memory_space<vmem>>, vector<8x512xf32>,
    %c0_150 = arith.constant 0 : index
    %c160 = arith.constant 160 : index
    %118 = vector.load %arg8[%c0_150, %c160] : memref<8x1024xf32, #tpu.memory_space<vmem>>, vector<8x512xf32>
    %c8_151 = arith.constant 8 : index
    %c0_152 = arith.constant 0 : index
    %119 = vector.load %arg10[%c8_151, %c0_152] : memref<80x512xf32, #tpu.memory_space<vmem>>, vector<8x512xf32>
    tpu.vector_store %arg10[%c8_151, %c0_152], %118 {strides = array<i32>} : memref<80x512xf32, #tpu.memory_space<vmem>>, vector<8x512xf32>,
    %c0_153 = arith.constant 0 : index
    %c163 = arith.constant 163 : index
    %120 = vector.load %arg8[%c0_153, %c163] : memref<8x1024xf32, #tpu.memory_space<vmem>>, vector<8x512xf32>
    %c16_154 = arith.constant 16 : index
    %c0_155 = arith.constant 0 : index
    %121 = vector.load %arg10[%c16_154, %c0_155] : memref<80x512xf32, #tpu.memory_space<vmem>>, vector<8x512xf32>
    tpu.vector_store %arg10[%c16_154, %c0_155], %120 {strides = array<i32>} : memref<80x512xf32, #tpu.memory_space<vmem>>, vector<8x512xf32>,
    %c0_156 = arith.constant 0 : index
    %c253 = arith.constant 253 : index
    %122 = vector.load %arg8[%c0_156, %c253] : memref<8x1024xf32, #tpu.memory_space<vmem>>, vector<8x512xf32>
    %c24_157 = arith.constant 24 : index
    %c0_158 = arith.constant 0 : index
    %123 = vector.load %arg10[%c24_157, %c0_158] : memref<80x512xf32, #tpu.memory_space<vmem>>, vector<8x512xf32>
    tpu.vector_store %arg10[%c24_157, %c0_158], %122 {strides = array<i32>} : memref<80x512xf32, #tpu.memory_space<vmem>>, vector<8x512xf32>,
    %c0_159 = arith.constant 0 : index
    %c256_160 = arith.constant 256 : index
    %124 = vector.load %arg8[%c0_159, %c256_160] : memref<8x1024xf32, #tpu.memory_space<vmem>>, vector<8x512xf32>
    %c32_161 = arith.constant 32 : index
    %c0_162 = arith.constant 0 : index
    %125 = vector.load %arg10[%c32_161, %c0_162] : memref<80x512xf32, #tpu.memory_space<vmem>>, vector<8x512xf32>
    tpu.vector_store %arg10[%c32_161, %c0_162], %124 {strides = array<i32>} : memref<80x512xf32, #tpu.memory_space<vmem>>, vector<8x512xf32>,
    %c0_163 = arith.constant 0 : index
    %c259 = arith.constant 259 : index
    %126 = vector.load %arg8[%c0_163, %c259] : memref<8x1024xf32, #tpu.memory_space<vmem>>, vector<8x512xf32>
    %c40_164 = arith.constant 40 : index
    %c0_165 = arith.constant 0 : index
    %127 = vector.load %arg10[%c40_164, %c0_165] : memref<80x512xf32, #tpu.memory_space<vmem>>, vector<8x512xf32>
    tpu.vector_store %arg10[%c40_164, %c0_165], %126 {strides = array<i32>} : memref<80x512xf32, #tpu.memory_space<vmem>>, vector<8x512xf32>,
    %c0_166 = arith.constant 0 : index
    %c349 = arith.constant 349 : index
    %128 = vector.load %arg8[%c0_166, %c349] : memref<8x1024xf32, #tpu.memory_space<vmem>>, vector<8x512xf32>
    %c48_167 = arith.constant 48 : index
    %c0_168 = arith.constant 0 : index
    %129 = vector.load %arg10[%c48_167, %c0_168] : memref<80x512xf32, #tpu.memory_space<vmem>>, vector<8x512xf32>
    tpu.vector_store %arg10[%c48_167, %c0_168], %128 {strides = array<i32>} : memref<80x512xf32, #tpu.memory_space<vmem>>, vector<8x512xf32>,
    %c0_169 = arith.constant 0 : index
    %c352 = arith.constant 352 : index
    %130 = vector.load %arg8[%c0_169, %c352] : memref<8x1024xf32, #tpu.memory_space<vmem>>, vector<8x512xf32>
    %c56_170 = arith.constant 56 : index
    %c0_171 = arith.constant 0 : index
    %131 = vector.load %arg10[%c56_170, %c0_171] : memref<80x512xf32, #tpu.memory_space<vmem>>, vector<8x512xf32>
    tpu.vector_store %arg10[%c56_170, %c0_171], %130 {strides = array<i32>} : memref<80x512xf32, #tpu.memory_space<vmem>>, vector<8x512xf32>,
    %c0_172 = arith.constant 0 : index
    %c355 = arith.constant 355 : index
    %132 = vector.load %arg8[%c0_172, %c355] : memref<8x1024xf32, #tpu.memory_space<vmem>>, vector<8x512xf32>
    %c64_173 = arith.constant 64 : index
    %c0_174 = arith.constant 0 : index
    %133 = vector.load %arg10[%c64_173, %c0_174] : memref<80x512xf32, #tpu.memory_space<vmem>>, vector<8x512xf32>
    tpu.vector_store %arg10[%c64_173, %c0_174], %132 {strides = array<i32>} : memref<80x512xf32, #tpu.memory_space<vmem>>, vector<8x512xf32>,
    %c24_175 = arith.constant 24 : index
    %c0_176 = arith.constant 0 : index
    %134 = vector.load %arg3[%c24_175, %c0_176] : memref<48x80xf32, #tpu.memory_space<vmem>>, vector<8x80xf32>
    %c0_177 = arith.constant 0 : index
    %c0_178 = arith.constant 0 : index
    %135 = vector.load %arg10[%c0_177, %c0_178] : memref<80x512xf32, #tpu.memory_space<vmem>>, vector<80x512xf32>
    %cst_179 = arith.constant dense<0.000000e+00> : vector<8x512xf32>
    %136 = tpu.matmul %134, %135, %cst_179 {dimension_numbers = #tpu.dot_dimension_numbers<[1], [0], [0], [1], [0, 0, 1, 1], [], []>} : vector<8x80xf32>, vector<80x512xf32>, vector<8x512xf32> -> vector<8x512xf32>
    %c8_180 = arith.constant 8 : index
    %c0_181 = arith.constant 0 : index
    %137 = vector.load %arg11[%c8_180, %c0_181] : memref<64x512xf32, #tpu.memory_space<vmem>>, vector<8x512xf32>
    tpu.vector_store %arg11[%c8_180, %c0_181], %136 {strides = array<i32>} : memref<64x512xf32, #tpu.memory_space<vmem>>, vector<8x512xf32>,
    %138 = arith.mulf %113, %19 : vector<8x512xf32>
    %c0_182 = arith.constant 0 : index
    %c256_183 = arith.constant 256 : index
    %139 = vector.load %arg7[%c0_182, %c256_183] : memref<8x1024xf32, #tpu.memory_space<vmem>>, vector<8x512xf32>
    tpu.vector_store %arg7[%c0_182, %c256_183], %138 {strides = array<i32>} : memref<8x1024xf32, #tpu.memory_space<vmem>>, vector<8x512xf32>,
    %c0_184 = arith.constant 0 : index
    %c223_185 = arith.constant 223 : index
    %140 = vector.load %arg7[%c0_184, %c223_185] : memref<8x1024xf32, #tpu.memory_space<vmem>>, vector<8x512xf32>
    %c0_186 = arith.constant 0 : index
    %c0_187 = arith.constant 0 : index
    %141 = vector.load %arg9[%c0_186, %c0_187] : memref<80x512xf32, #tpu.memory_space<vmem>>, vector<8x512xf32>
    tpu.vector_store %arg9[%c0_186, %c0_187], %140 {strides = array<i32>} : memref<80x512xf32, #tpu.memory_space<vmem>>, vector<8x512xf32>,
    %c0_188 = arith.constant 0 : index
    %c224_189 = arith.constant 224 : index
    %142 = vector.load %arg7[%c0_188, %c224_189] : memref<8x1024xf32, #tpu.memory_space<vmem>>, vector<8x512xf32>
    %c8_190 = arith.constant 8 : index
    %c0_191 = arith.constant 0 : index
    %143 = vector.load %arg9[%c8_190, %c0_191] : memref<80x512xf32, #tpu.memory_space<vmem>>, vector<8x512xf32>
    tpu.vector_store %arg9[%c8_190, %c0_191], %142 {strides = array<i32>} : memref<80x512xf32, #tpu.memory_space<vmem>>, vector<8x512xf32>,
    %c0_192 = arith.constant 0 : index
    %c225_193 = arith.constant 225 : index
    %144 = vector.load %arg7[%c0_192, %c225_193] : memref<8x1024xf32, #tpu.memory_space<vmem>>, vector<8x512xf32>
    %c16_194 = arith.constant 16 : index
    %c0_195 = arith.constant 0 : index
    %145 = vector.load %arg9[%c16_194, %c0_195] : memref<80x512xf32, #tpu.memory_space<vmem>>, vector<8x512xf32>
    tpu.vector_store %arg9[%c16_194, %c0_195], %144 {strides = array<i32>} : memref<80x512xf32, #tpu.memory_space<vmem>>, vector<8x512xf32>,
    %c0_196 = arith.constant 0 : index
    %c255_197 = arith.constant 255 : index
    %146 = vector.load %arg7[%c0_196, %c255_197] : memref<8x1024xf32, #tpu.memory_space<vmem>>, vector<8x512xf32>
    %c24_198 = arith.constant 24 : index
    %c0_199 = arith.constant 0 : index
    %147 = vector.load %arg9[%c24_198, %c0_199] : memref<80x512xf32, #tpu.memory_space<vmem>>, vector<8x512xf32>
    tpu.vector_store %arg9[%c24_198, %c0_199], %146 {strides = array<i32>} : memref<80x512xf32, #tpu.memory_space<vmem>>, vector<8x512xf32>,
    %c0_200 = arith.constant 0 : index
    %c256_201 = arith.constant 256 : index
    %148 = vector.load %arg7[%c0_200, %c256_201] : memref<8x1024xf32, #tpu.memory_space<vmem>>, vector<8x512xf32>
    %c32_202 = arith.constant 32 : index
    %c0_203 = arith.constant 0 : index
    %149 = vector.load %arg9[%c32_202, %c0_203] : memref<80x512xf32, #tpu.memory_space<vmem>>, vector<8x512xf32>
    tpu.vector_store %arg9[%c32_202, %c0_203], %148 {strides = array<i32>} : memref<80x512xf32, #tpu.memory_space<vmem>>, vector<8x512xf32>,
    %c0_204 = arith.constant 0 : index
    %c257_205 = arith.constant 257 : index
    %150 = vector.load %arg7[%c0_204, %c257_205] : memref<8x1024xf32, #tpu.memory_space<vmem>>, vector<8x512xf32>
    %c40_206 = arith.constant 40 : index
    %c0_207 = arith.constant 0 : index
    %151 = vector.load %arg9[%c40_206, %c0_207] : memref<80x512xf32, #tpu.memory_space<vmem>>, vector<8x512xf32>
    tpu.vector_store %arg9[%c40_206, %c0_207], %150 {strides = array<i32>} : memref<80x512xf32, #tpu.memory_space<vmem>>, vector<8x512xf32>,
    %c0_208 = arith.constant 0 : index
    %c287_209 = arith.constant 287 : index
    %152 = vector.load %arg7[%c0_208, %c287_209] : memref<8x1024xf32, #tpu.memory_space<vmem>>, vector<8x512xf32>
    %c48_210 = arith.constant 48 : index
    %c0_211 = arith.constant 0 : index
    %153 = vector.load %arg9[%c48_210, %c0_211] : memref<80x512xf32, #tpu.memory_space<vmem>>, vector<8x512xf32>
    tpu.vector_store %arg9[%c48_210, %c0_211], %152 {strides = array<i32>} : memref<80x512xf32, #tpu.memory_space<vmem>>, vector<8x512xf32>,
    %c0_212 = arith.constant 0 : index
    %c288_213 = arith.constant 288 : index
    %154 = vector.load %arg7[%c0_212, %c288_213] : memref<8x1024xf32, #tpu.memory_space<vmem>>, vector<8x512xf32>
    %c56_214 = arith.constant 56 : index
    %c0_215 = arith.constant 0 : index
    %155 = vector.load %arg9[%c56_214, %c0_215] : memref<80x512xf32, #tpu.memory_space<vmem>>, vector<8x512xf32>
    tpu.vector_store %arg9[%c56_214, %c0_215], %154 {strides = array<i32>} : memref<80x512xf32, #tpu.memory_space<vmem>>, vector<8x512xf32>,
    %c0_216 = arith.constant 0 : index
    %c289_217 = arith.constant 289 : index
    %156 = vector.load %arg7[%c0_216, %c289_217] : memref<8x1024xf32, #tpu.memory_space<vmem>>, vector<8x512xf32>
    %c64_218 = arith.constant 64 : index
    %c0_219 = arith.constant 0 : index
    %157 = vector.load %arg9[%c64_218, %c0_219] : memref<80x512xf32, #tpu.memory_space<vmem>>, vector<8x512xf32>
    tpu.vector_store %arg9[%c64_218, %c0_219], %156 {strides = array<i32>} : memref<80x512xf32, #tpu.memory_space<vmem>>, vector<8x512xf32>,
    %c32_220 = arith.constant 32 : index
    %c0_221 = arith.constant 0 : index
    %158 = vector.load %arg3[%c32_220, %c0_221] : memref<48x80xf32, #tpu.memory_space<vmem>>, vector<8x80xf32>
    %c0_222 = arith.constant 0 : index
    %c0_223 = arith.constant 0 : index
    %159 = vector.load %arg9[%c0_222, %c0_223] : memref<80x512xf32, #tpu.memory_space<vmem>>, vector<80x512xf32>
    %cst_224 = arith.constant dense<0.000000e+00> : vector<8x512xf32>
    %160 = tpu.matmul %158, %159, %cst_224 {dimension_numbers = #tpu.dot_dimension_numbers<[1], [0], [0], [1], [0, 0, 1, 1], [], []>} : vector<8x80xf32>, vector<80x512xf32>, vector<8x512xf32> -> vector<8x512xf32>
    %cst_225 = arith.constant 0.000000e+00 : f32
    %161 = vector.broadcast %cst_225 : f32 to vector<8x512xf32>
    %162 = arith.cmpf oge, %160, %161 : vector<8x512xf32>
    %cst_226 = arith.constant 0.00999999977 : f32
    %163 = vector.broadcast %cst_226 : f32 to vector<8x512xf32>
    %164 = arith.mulf %163, %160 : vector<8x512xf32>
    %165 = arith.select %162, %160, %164 : vector<8x512xi1>, vector<8x512xf32>
    %166 = arith.mulf %165, %19 : vector<8x512xf32>
    %c0_227 = arith.constant 0 : index
    %c256_228 = arith.constant 256 : index
    %167 = vector.load %arg8[%c0_227, %c256_228] : memref<8x1024xf32, #tpu.memory_space<vmem>>, vector<8x512xf32>
    tpu.vector_store %arg8[%c0_227, %c256_228], %166 {strides = array<i32>} : memref<8x1024xf32, #tpu.memory_space<vmem>>, vector<8x512xf32>,
    %c0_229 = arith.constant 0 : index
    %c91 = arith.constant 91 : index
    %168 = vector.load %arg8[%c0_229, %c91] : memref<8x1024xf32, #tpu.memory_space<vmem>>, vector<8x512xf32>
    %c0_230 = arith.constant 0 : index
    %c0_231 = arith.constant 0 : index
    %169 = vector.load %arg10[%c0_230, %c0_231] : memref<80x512xf32, #tpu.memory_space<vmem>>, vector<8x512xf32>
    tpu.vector_store %arg10[%c0_230, %c0_231], %168 {strides = array<i32>} : memref<80x512xf32, #tpu.memory_space<vmem>>, vector<8x512xf32>,
    %c0_232 = arith.constant 0 : index
    %c96 = arith.constant 96 : index
    %170 = vector.load %arg8[%c0_232, %c96] : memref<8x1024xf32, #tpu.memory_space<vmem>>, vector<8x512xf32>
    %c8_233 = arith.constant 8 : index
    %c0_234 = arith.constant 0 : index
    %171 = vector.load %arg10[%c8_233, %c0_234] : memref<80x512xf32, #tpu.memory_space<vmem>>, vector<8x512xf32>
    tpu.vector_store %arg10[%c8_233, %c0_234], %170 {strides = array<i32>} : memref<80x512xf32, #tpu.memory_space<vmem>>, vector<8x512xf32>,
    %c0_235 = arith.constant 0 : index
    %c101 = arith.constant 101 : index
    %172 = vector.load %arg8[%c0_235, %c101] : memref<8x1024xf32, #tpu.memory_space<vmem>>, vector<8x512xf32>
    %c16_236 = arith.constant 16 : index
    %c0_237 = arith.constant 0 : index
    %173 = vector.load %arg10[%c16_236, %c0_237] : memref<80x512xf32, #tpu.memory_space<vmem>>, vector<8x512xf32>
    tpu.vector_store %arg10[%c16_236, %c0_237], %172 {strides = array<i32>} : memref<80x512xf32, #tpu.memory_space<vmem>>, vector<8x512xf32>,
    %c0_238 = arith.constant 0 : index
    %c251 = arith.constant 251 : index
    %174 = vector.load %arg8[%c0_238, %c251] : memref<8x1024xf32, #tpu.memory_space<vmem>>, vector<8x512xf32>
    %c24_239 = arith.constant 24 : index
    %c0_240 = arith.constant 0 : index
    %175 = vector.load %arg10[%c24_239, %c0_240] : memref<80x512xf32, #tpu.memory_space<vmem>>, vector<8x512xf32>
    tpu.vector_store %arg10[%c24_239, %c0_240], %174 {strides = array<i32>} : memref<80x512xf32, #tpu.memory_space<vmem>>, vector<8x512xf32>,
    %c0_241 = arith.constant 0 : index
    %c256_242 = arith.constant 256 : index
    %176 = vector.load %arg8[%c0_241, %c256_242] : memref<8x1024xf32, #tpu.memory_space<vmem>>, vector<8x512xf32>
    %c32_243 = arith.constant 32 : index
    %c0_244 = arith.constant 0 : index
    %177 = vector.load %arg10[%c32_243, %c0_244] : memref<80x512xf32, #tpu.memory_space<vmem>>, vector<8x512xf32>
    tpu.vector_store %arg10[%c32_243, %c0_244], %176 {strides = array<i32>} : memref<80x512xf32, #tpu.memory_space<vmem>>, vector<8x512xf32>,
    %c0_245 = arith.constant 0 : index
    %c261 = arith.constant 261 : index
    %178 = vector.load %arg8[%c0_245, %c261] : memref<8x1024xf32, #tpu.memory_space<vmem>>, vector<8x512xf32>
    %c40_246 = arith.constant 40 : index
    %c0_247 = arith.constant 0 : index
    %179 = vector.load %arg10[%c40_246, %c0_247] : memref<80x512xf32, #tpu.memory_space<vmem>>, vector<8x512xf32>
    tpu.vector_store %arg10[%c40_246, %c0_247], %178 {strides = array<i32>} : memref<80x512xf32, #tpu.memory_space<vmem>>, vector<8x512xf32>,
    %c0_248 = arith.constant 0 : index
    %c411 = arith.constant 411 : index
    %180 = vector.load %arg8[%c0_248, %c411] : memref<8x1024xf32, #tpu.memory_space<vmem>>, vector<8x512xf32>
    %c48_249 = arith.constant 48 : index
    %c0_250 = arith.constant 0 : index
    %181 = vector.load %arg10[%c48_249, %c0_250] : memref<80x512xf32, #tpu.memory_space<vmem>>, vector<8x512xf32>
    tpu.vector_store %arg10[%c48_249, %c0_250], %180 {strides = array<i32>} : memref<80x512xf32, #tpu.memory_space<vmem>>, vector<8x512xf32>,
    %c0_251 = arith.constant 0 : index
    %c416 = arith.constant 416 : index
    %182 = vector.load %arg8[%c0_251, %c416] : memref<8x1024xf32, #tpu.memory_space<vmem>>, vector<8x512xf32>
    %c56_252 = arith.constant 56 : index
    %c0_253 = arith.constant 0 : index
    %183 = vector.load %arg10[%c56_252, %c0_253] : memref<80x512xf32, #tpu.memory_space<vmem>>, vector<8x512xf32>
    tpu.vector_store %arg10[%c56_252, %c0_253], %182 {strides = array<i32>} : memref<80x512xf32, #tpu.memory_space<vmem>>, vector<8x512xf32>,
    %c0_254 = arith.constant 0 : index
    %c421 = arith.constant 421 : index
    %184 = vector.load %arg8[%c0_254, %c421] : memref<8x1024xf32, #tpu.memory_space<vmem>>, vector<8x512xf32>
    %c64_255 = arith.constant 64 : index
    %c0_256 = arith.constant 0 : index
    %185 = vector.load %arg10[%c64_255, %c0_256] : memref<80x512xf32, #tpu.memory_space<vmem>>, vector<8x512xf32>
    tpu.vector_store %arg10[%c64_255, %c0_256], %184 {strides = array<i32>} : memref<80x512xf32, #tpu.memory_space<vmem>>, vector<8x512xf32>,
    %c40_257 = arith.constant 40 : index
    %c0_258 = arith.constant 0 : index
    %186 = vector.load %arg3[%c40_257, %c0_258] : memref<48x80xf32, #tpu.memory_space<vmem>>, vector<8x80xf32>
    %c0_259 = arith.constant 0 : index
    %c0_260 = arith.constant 0 : index
    %187 = vector.load %arg10[%c0_259, %c0_260] : memref<80x512xf32, #tpu.memory_space<vmem>>, vector<80x512xf32>
    %cst_261 = arith.constant dense<0.000000e+00> : vector<8x512xf32>
    %188 = tpu.matmul %186, %187, %cst_261 {dimension_numbers = #tpu.dot_dimension_numbers<[1], [0], [0], [1], [0, 0, 1, 1], [], []>} : vector<8x80xf32>, vector<80x512xf32>, vector<8x512xf32> -> vector<8x512xf32>
    %c16_262 = arith.constant 16 : index
    %c0_263 = arith.constant 0 : index
    %189 = vector.load %arg11[%c16_262, %c0_263] : memref<64x512xf32, #tpu.memory_space<vmem>>, vector<8x512xf32>
    tpu.vector_store %arg11[%c16_262, %c0_263], %188 {strides = array<i32>} : memref<64x512xf32, #tpu.memory_space<vmem>>, vector<8x512xf32>,
    %c0_264 = arith.constant 0 : index
    %c0_265 = arith.constant 0 : index
    %190 = vector.load %arg5[%c0_264, %c0_265] : memref<32x64xf32, #tpu.memory_space<vmem>>, vector<32x64xf32>
    %c0_266 = arith.constant 0 : index
    %c0_267 = arith.constant 0 : index
    %191 = vector.load %arg11[%c0_266, %c0_267] : memref<64x512xf32, #tpu.memory_space<vmem>>, vector<64x512xf32>
    %cst_268 = arith.constant dense<0.000000e+00> : vector<32x512xf32>
    %192 = tpu.matmul %190, %191, %cst_268 {dimension_numbers = #tpu.dot_dimension_numbers<[1], [0], [0], [1], [0, 0, 1, 1], [], []>} : vector<32x64xf32>, vector<64x512xf32>, vector<32x512xf32> -> vector<32x512xf32>
    %cst_269 = arith.constant 0.000000e+00 : f32
    %193 = vector.broadcast %cst_269 : f32 to vector<32x512xf32>
    %194 = arith.cmpf oge, %192, %193 : vector<32x512xf32>
    %cst_270 = arith.constant 0.00999999977 : f32
    %195 = vector.broadcast %cst_270 : f32 to vector<32x512xf32>
    %196 = arith.mulf %195, %192 : vector<32x512xf32>
    %197 = arith.select %194, %192, %196 : vector<32x512xi1>, vector<32x512xf32>
    %c0_271 = arith.constant 0 : index
    %c0_272 = arith.constant 0 : index
    %c0_273 = arith.constant 0 : index
    %198 = vector.load %arg6[%c0_271, %c0_272, %c0_273] : memref<1x32x512xf32, #tpu.memory_space<vmem>>, vector<1x32x512xf32>
    %199 = vector.shape_cast %198 : vector<1x32x512xf32> to vector<32x512xf32>
    %200 = vector.shape_cast %197 : vector<32x512xf32> to vector<1x32x512xf32>
    tpu.vector_store %arg6[%c0_271, %c0_272, %c0_273], %200 {strides = array<i32>} : memref<1x32x512xf32, #tpu.memory_space<vmem>>, vector<1x32x512xf32>,
    return
  }
  func.func @transform_0(%arg0: i32) -> (i32, i32, i32) {
    %c0_i32 = arith.constant 0 : i32
    %c0_i32_0 = arith.constant 0 : i32
    %c0_i32_1 = arith.constant 0 : i32
    return %arg0, %c0_i32, %c0_i32_0 : i32, i32, i32
  }
  func.func @transform_1(%arg0: i32) -> (i32, i32) {
    %c0_i32 = arith.constant 0 : i32
    %c0_i32_0 = arith.constant 0 : i32
    %c0_i32_1 = arith.constant 0 : i32
    return %c0_i32, %c0_i32_0 : i32, i32
  }
  func.func @transform_2(%arg0: i32) -> (i32, i32) {
    %c0_i32 = arith.constant 0 : i32
    %c0_i32_0 = arith.constant 0 : i32
    %c0_i32_1 = arith.constant 0 : i32
    return %c0_i32, %c0_i32_0 : i32, i32
  }
  func.func @transform_3(%arg0: i32) -> (i32, i32) {
    %c0_i32 = arith.constant 0 : i32
    %c0_i32_0 = arith.constant 0 : i32
    %c0_i32_1 = arith.constant 0 : i32
    return %c0_i32, %c0_i32_0 : i32, i32
  }
  func.func @transform_4(%arg0: i32) -> (i32, i32) {
    %c0_i32 = arith.constant 0 : i32
    %c0_i32_0 = arith.constant 0 : i32
    %c0_i32_1 = arith.constant 0 : i32
    return %c0_i32, %c0_i32_0 : i32, i32
  }
  func.func @transform_5(%arg0: i32) -> (i32, i32, i32) {
    %c0_i32 = arith.constant 0 : i32
    %c0_i32_0 = arith.constant 0 : i32
    %c0_i32_1 = arith.constant 0 : i32
    return %arg0, %c0_i32, %c0_i32_0 : i32, i32, i32
  }
}

</mosaic_0001>

<bundles_post_ra>
// kernel: tile.8
= control target key start
LH: loop header
LB: loop body
LE: loop exit
PB: predicated region body
PF: predicated region fallthrough
CT: control target
= control target key end

     0   :  { %s28_s0 = inlined_call_operand.vmem [shape: f32[32], index: 0, kind: input, shape index: {}]   ;;  %s29_s1 = inlined_call_operand.vmem [shape: f32[16,32], index: 1, kind: output, shape index: {}]  }
   0x1   :  { %v4_v0 = vld [vmem:[%s28_s0] ss:$0 sm:$0xff] }
   0x2   :  { %5 = vst [vmem:[%s29_s1] sm:$0xff] %v4_v0 }
   0x3   :  { %8 = vst [vmem:[%s29_s1 + $0x8] sm:$0xff] %v4_v0 }

// kernel: rfb_forward_pallas.1
= control target key start
LH: loop header
LB: loop body
LE: loop exit
PB: predicated region body
PF: predicated region fallthrough
CT: control target
= control target key end

     0   :  { %s3931_s18 = smov 0   ;;  %s5352_s0 = inlined_call_operand.vmem [shape: f32[2,32,512], index: 0, kind: input, shape index: {}]   ;;  %s5353_s1 = inlined_call_operand.vmem [shape: f32[8,512], index: 1, kind: input, shape index: {}]   ;;  %s5354_s2 = inlined_call_operand.vmem [shape: f32[48,80], index: 2, kind: input, shape index: {}]   ;;  %s5355_s3 = inlined_call_operand.vmem [shape: f32[24,40], index: 3, kind: input, shape index: {}]   ;;  %s5356_s4 = inlined_call_operand.vmem [shape: f32[32,64], index: 4, kind: input, shape index: {}]   ;;  %s5357_s5 = inlined_call_operand.vmem [shape: f32[2,32,512], index: 5, kind: output, shape index: {}]  }
   0x1 LB: > { %s3188_s19 = sadd.s32 4294967295, %s3877_s18   ;;  %p3192_p0 = scmp.ge.s32.totalorder %s3877_s18, 1  ;;  %s3877_s18 = sphi %s3931_s18, %s15_s18  }
   0x2   : > { %p187_p1 = scmp.lt.s32.totalorder %s3877_s18, 3 }
   0x4   : > { %p188_p2 = pnand %p3192_p0, %p187_p1 }
   0x5   : > { %p215_p3 = scmp.lt.s32.totalorder (!%p188_p2), %s3188_s19, 1  ;;  %s3880_s13 = smov (!%p188_p2), 32  }
   0x6   : > { %191 = sbr.rel (%p188_p2) target bundleno = 1606 (0x646), region = 40  ;;  %s3881_s14 = smov (!%p188_p2), 127  }
   0x7   : > { %s3882_s15 = smov (!%p188_p2), 95   ;;  %s3883_s16 = smov (!%p188_p2), 31  }
   0x8   : > { %s3884_s17 = smov (!%p188_p2), 97   ;;  %s3885_s21 = smov (!%p188_p2), 96  }
   0x9   : > { %s3886_s22 = smov (!%p188_p2), 33   ;;  %s3887_s24 = smov (!%p188_p2), 1  }
   0xa   : > { %s3889_s8 = smov (!%p188_p2), 35   ;;  %s3890_s11 = smov (!%p188_p2), 99  }
   0xb   : > { %v225_v0 = vlaneseq  ;;  %s5368_s19 = smov (!%p215_p3, %s3188_s19), 1  ;;  %v3879_v2 = vmov 1.0   ;;  %v286_v19 = vld [vmem:[%s5355_s3] sm:$0xff]  ;;  %vm309_vm1 = vcmask 326656   ;;  %v287_v20 = vld [vmem:[%s5355_s3 + $0x8] sm:$0xff]  ;;  %v288_v21 = vld [vmem:[%s5355_s3 + $0x10] sm:$0xff] }
   0xc   : > { %s3252_s20 = sshll.u32 %s5368_s19, 7  ;;  %v4016_v22 = vld [vmem:[%s5353_s1] sm:$0xff]  ;;  %v4021_v24 = vld [vmem:[%s5353_s1 + $0x8] sm:$0xff]  ;;  %v4035_v34 = vld [vmem:[%s5353_s1 + $0x10] sm:$0xff]  ;;  %v5358_v56 = vmov 0.0   ;;  %vm726_vm14 = vcmask 777216  }
   0xd   : > { %v3939_v1 = vshrl.u32 %v225_v0, 7  ;;  %s3956_s23 = scalar_lea.vmem %s5352_s0, %s3252_s20  ;;  %v4040_v36 = vld [vmem:[%s5353_s1 + $0x18] sm:$0xff]  ;;  %vm693_vm15 = vcmask 785408   ;;  %s3891_s26 = smov 29  }
   0xe   : > { %v266_v3 = vld [vmem:[%s3956_s23 + $0x60] sm:$0xff]  ;;  %v267_v4 = vld [vmem:[%s3956_s23 + $0x68] sm:$0xff]  ;;  %v268_v5 = vld [vmem:[%s3956_s23 + $0x70] sm:$0xff]  ;;  %s3892_s29 = smov 93   ;;  %s3893_s30 = smov 125  }
   0xf   : > { %vm227_vm0 = vcmp.eq.s32.totalorder %v3939_v1, 0  ;;  %v269_v6 = vld [vmem:[%s3956_s23 + $0x78] sm:$0xff]  ;;  %v262_v7 = vld [vmem:[%s3956_s23 + $0x40] sm:$0xff]  ;;  %v263_v8 = vld [vmem:[%s3956_s23 + $0x48] sm:$0xff]  ;;  %s3894_s6 = smov 3   ;;  %s3897_s7 = smov 5  }
  0x10   : > { %3254 = vmatpush.msk.msra.mxu0 %vm227_vm0, %v3879_v2  ;;  %3255 = vmatpush.msk.msra.mxu1 %vm227_vm0, %v3879_v2  ;;  %v264_v9 = vld [vmem:[%s3956_s23 + $0x50] sm:$0xff]  ;;  %v265_v10 = vld [vmem:[%s3956_s23 + $0x58] sm:$0xff]  ;;  %v258_v11 = vld [vmem:[%s3956_s23 + $0x20] sm:$0xff]  ;;  %s3899_s9 = smov 27   ;;  %s3900_s10 = smov 37  }
  0x11   : > { %3256 = vmatpush.msk.msra.mxu2 %vm227_vm0, %v3879_v2  ;;  %3257 = vmatpush.msk.msra.mxu3 %vm227_vm0, %v3879_v2  ;;  %v259_v12 = vld [vmem:[%s3956_s23 + $0x28] sm:$0xff]  ;;  %v260_v13 = vld [vmem:[%s3956_s23 + $0x30] sm:$0xff]  ;;  %v261_v14 = vld [vmem:[%s3956_s23 + $0x38] sm:$0xff] }
  0x12   : > { %331 = vmatpush.msra.mxu0 %v266_v3  ;;  %357 = vmatpush.msra.mxu1 %v267_v4  ;;  %v254_v15 = vld [vmem:[%s3956_s23] sm:$0xff]  ;;  %v255_v16 = vld [vmem:[%s3956_s23 + $0x8] sm:$0xff]  ;;  %v256_v17 = vld [vmem:[%s3956_s23 + $0x10] sm:$0xff] }
  0x13   : > { %383 = vmatpush.msra.mxu2 %v268_v5  ;;  %409 = vmatpush.msra.mxu3 %v269_v6  ;;  %v257_v18 = vld [vmem:[%s3956_s23 + $0x18] sm:$0xff] }
  0x14   : > { %332 = vmatpush.msra.mxu0 %v262_v7  ;;  %358 = vmatpush.msra.mxu1 %v263_v8 }
  0x15   : > { %384 = vmatpush.msra.mxu2 %v264_v9  ;;  %410 = vmatpush.msra.mxu3 %v265_v10 }
  0x16   : > { %333 = vmatpush.msra.mxu0 %v258_v11  ;;  %359 = vmatpush.msra.mxu1 %v259_v12 }
  0x17   : > { %385 = vmatpush.msra.mxu2 %v260_v13  ;;  %411 = vmatpush.msra.mxu3 %v261_v14 }
  0x18   : > { %334 = vmatpush.msra.mxu0 %v254_v15  ;;  %360 = vmatpush.msra.mxu1 %v255_v16 }
  0x19   : > { %386 = vmatpush.msra.mxu2 %v256_v17  ;;  %412 = vmatpush.msra.mxu3 %v257_v18 }
  0x1a   : > { %3198 = vmatmul.msk.f32.vlgmr.msra.gmra.mxu0 %vm309_vm1, %v286_v19  ;;  %3201 = vmatmul.msk.f32.vlgmr.msra.gmra.mxu1 %vm309_vm1, %v286_v19 }
  0x1b   : > { %3204 = vmatmul.msk.f32.vlgmr.msra.gmra.mxu2 %vm309_vm1, %v286_v19  ;;  %3207 = vmatmul.msk.f32.vlgmr.msra.gmra.mxu3 %vm309_vm1, %v286_v19 }
  0x1c   : > { %3258 = vmatpush.msk.msrb.mxu0 %vm227_vm0, %v3879_v2  ;;  %3259 = vmatpush.msk.msrb.mxu1 %vm227_vm0, %v3879_v2 }
  0x1d   : > { %3260 = vmatpush.msk.msrb.mxu2 %vm227_vm0, %v3879_v2  ;;  %3261 = vmatpush.msk.msrb.mxu3 %vm227_vm0, %v3879_v2 }
  0x22   : > { %3202 = vmatmul.msk.f32.gmra.mxu1 %vm309_vm1, %v287_v20  ;;  %3199 = vmatmul.msk.f32.gmra.mxu0 %vm309_vm1, %v287_v20 }
  0x23   : > { %3205 = vmatmul.msk.f32.gmra.mxu2 %vm309_vm1, %v287_v20  ;;  %3208 = vmatmul.msk.f32.gmra.mxu3 %vm309_vm1, %v287_v20 }
  0x2a   : > { %3203 = vmatmul.msk.f32.gmra.mxu1 %vm309_vm1, %v288_v21  ;;  %3200 = vmatmul.msk.f32.gmra.mxu0 %vm309_vm1, %v288_v21 }
  0x2b   : > { %3206 = vmatmul.msk.f32.gmra.mxu2 %vm309_vm1, %v288_v21  ;;  %3209 = vmatmul.msk.f32.gmra.mxu3 %vm309_vm1, %v288_v21  ;;  %vm660_vm1 = vcmask 793600  }
  0x97   : > { %v336_v23 = vpop.f32.mrf.mxu0  ;;  %v362_v25 = vpop.f32.mrf.mxu1 }
  0x98   : > { %vm423_vm2 = vcmp.ge.f32.partialorder %v336_v23, 0.0  ;;  %v435_v26 = vmul.f32 0.01, %v336_v23  ;;  %vm424_vm3 = vcmp.ge.f32.partialorder %v362_v25, 0.0  ;;  %v436_v27 = vmul.f32 0.01, %v362_v25 }
  0x9a   : > { %v447_v28 = vsel %vm423_vm2, %v336_v23, %v435_v26  ;;  %v448_v29 = vsel %vm424_vm3, %v362_v25, %v436_v27  ;;  %vm627_vm2 = vcmask 1039360   ;;  %vm586_vm3 = vcmask 7168  }
  0x9b   : > { %v4024_v30 = vmul.f32 %v447_v28, %v4016_v22  ;;  %v4027_v31 = vmul.f32 %v448_v29, %v4021_v24 }
  0x9d   : > { %v3346_v32 = vpack.i.bf16 0.0, %v4024_v30  ;;  %v3331_v33 = vpack.i.bf16 %v4024_v30, %v4027_v31 }
  0x9e   : > { %v388_v35 = vpop.f32.mrf.mxu2  ;;  %v414_v37 = vpop.f32.mrf.mxu3 }
  0x9f   : > { %vm425_vm4 = vcmp.ge.f32.partialorder %v388_v35, 0.0  ;;  %v437_v38 = vmul.f32 0.01, %v388_v35  ;;  %vm426_vm5 = vcmp.ge.f32.partialorder %v414_v37, 0.0  ;;  %v438_v39 = vmul.f32 0.01, %v414_v37  ;;  %3347 = vrot.lane.b32.xlu2 %v3346_v32, %s3880_s13  ;;  %3332 = vrot.lane.b32.xlu1 %v3331_v33, %s3881_s14  ;;  %v365_v58 = vpop.f32.mrf.mxu1  ;;  %v339_v0 = vpop.f32.mrf.mxu0 }
  0xa0   : > { %3317 = vrot.lane.b32.xlu0 %v3331_v33, %s3882_s15  ;;  %v440_v59 = vmul.f32 0.01, %v365_v58  ;;  %vm428_vm8 = vcmp.ge.f32.partialorder %v365_v58, 0.0  ;;  %v439_v4 = vmul.f32 0.01, %v339_v0  ;;  %vm427_vm10 = vcmp.ge.f32.partialorder %v339_v0, 0.0 }
  0xa1   : > { %v449_v40 = vsel %vm425_vm4, %v388_v35, %v437_v38  ;;  %v450_v41 = vsel %vm426_vm5, %v414_v37, %v438_v39  ;;  %vm553_vm4 = vcmask 252928   ;;  %vm520_vm5 = vcmask 261120  }
  0xa2   : > { %v4046_v42 = vmul.f32 %v449_v40, %v4035_v34  ;;  %v4049_v43 = vmul.f32 %v450_v41, %v4040_v36  ;;  %v452_v60 = vsel %vm428_vm8, %v365_v58, %v440_v59  ;;  %v451_v6 = vsel %vm427_vm10, %v339_v0, %v439_v4 }
  0xa3   : > { %v4085_v61 = vmul.f32 %v452_v60, %v4021_v24  ;;  %v4098_v8 = vmul.f32 %v451_v6, %v4016_v22 }
  0xa4   : > { %v3381_v44 = vpack.i.bf16 %v4049_v43, %v4046_v42  ;;  %v3366_v45 = vpack.i.bf16 0.0, %v4049_v43 }
  0xa6   : > { %v417_v46 = vpop.f32.mrf.mxu3  ;;  %v391_v51 = vpop.f32.mrf.mxu2 }
  0xa7   : > { %3382 = vrot.lane.b32.xlu2 %v3381_v44, %s3883_s16  ;;  %3367 = vrot.lane.b32.xlu1 %v3366_v45, %s3884_s17  ;;  %v442_v47 = vmul.f32 0.01, %v417_v46  ;;  %vm430_vm6 = vcmp.ge.f32.partialorder %v417_v46, 0.0  ;;  %v441_v52 = vmul.f32 0.01, %v391_v51  ;;  %vm429_vm7 = vcmp.ge.f32.partialorder %v391_v51, 0.0  ;;  %v368_v63 = vpop.f32.mrf.mxu1 }
  0xa8   : > { %3322 = vrot.lane.b32.xlu0 %v3331_v33, %s3885_s21  ;;  %v444_v3 = vmul.f32 0.01, %v368_v63  ;;  %vm432_vm9 = vcmp.ge.f32.partialorder %v368_v63, 0.0 }
  0xa9   : > { %v454_v48 = vsel %vm430_vm6, %v417_v46, %v442_v47  ;;  %v453_v53 = vsel %vm429_vm7, %v391_v51, %v441_v52  ;;  %vm487_vm6 = vcmask 269312   ;;  %vm780_vm7 = vcmask 654336  }
  0xaa   : > { %v4061_v49 = vmul.f32 %v454_v48, %v4040_v36  ;;  %v4072_v54 = vmul.f32 %v453_v53, %v4035_v34  ;;  %v456_v5 = vsel %vm432_vm9, %v368_v63, %v444_v3 }
  0xab   : > { %v4093_v7 = vmul.f32 %v456_v5, %v4021_v24  ;;  %v342_v24 = vpop.f32.mrf.mxu0 }
  0xac   : > { %v3396_v50 = vpack.i.bf16 %v4061_v49, %v4046_v42  ;;  %v3426_v55 = vpack.i.bf16 %v4072_v54, %v4027_v31  ;;  %v3416_v57 = vpack.i.bf16 %v4072_v54, %v5358_v56  ;;  %v3456_v62 = vpack.i.bf16 %v4085_v61, %v4061_v49 }
  0xad   : > { %v3481_v9 = vpack.i.bf16 %v4098_v8, %v4093_v7  ;;  %v3486_v10 = vpack.i.bf16 %v4093_v7, %v4098_v8  ;;  %v443_v26 = vmul.f32 0.01, %v342_v24  ;;  %vm431_vm13 = vcmp.ge.f32.partialorder %v342_v24, 0.0 }
  0xae   : > { %v420_v11 = vpop.f32.mrf.mxu3  ;;  %v394_v14 = vpop.f32.mrf.mxu2 }
  0xaf   : > { %3387 = vrot.lane.b32.xlu2 %v3381_v44, %s3880_s13  ;;  %3372 = vrot.lane.b32.xlu1 %v3366_v45, %s3881_s14  ;;  %v446_v12 = vmul.f32 0.01, %v420_v11  ;;  %vm434_vm11 = vcmp.ge.f32.partialorder %v420_v11, 0.0  ;;  %v445_v17 = vmul.f32 0.01, %v394_v14  ;;  %vm433_vm12 = vcmp.ge.f32.partialorder %v394_v14, 0.0 }
  0xb0   : > { %3327 = vrot.lane.b32.xlu0 %v3331_v33, %s3884_s17  ;;  %v455_v27 = vsel %vm431_vm13, %v342_v24, %v443_v26  ;;  %vm1949_vm13 = vcmask 236544  }
  0xb1   : > { %v458_v13 = vsel %vm434_vm11, %v420_v11, %v446_v12  ;;  %v457_v19 = vsel %vm433_vm12, %v394_v14, %v445_v17  ;;  %v4139_v28 = vmul.f32 %v455_v27, %v4016_v22 }
  0xb2   : > { %v4115_v15 = vmul.f32 %v458_v13, %v4040_v36  ;;  %v4126_v21 = vmul.f32 %v457_v19, %v4035_v34 }
  0xb3   : > { %v4154_v39 = vpack.i.bf16 %v4139_v28, %v5358_v56 }
  0xb4   : > { %v3516_v18 = vpack.i.bf16 0.0, %v4115_v15  ;;  %v3546_v23 = vpack.i.bf16 %v4115_v15, %v4126_v21  ;;  %v3551_v22 = vpack.i.bf16 %v4085_v61, %v4126_v21 }
  0xb7   : > { %3397 = vrot.lane.b32.xlu2 %v3396_v50, %s3882_s15  ;;  %3392 = vrot.lane.b32.xlu1 %v3381_v44, %s3886_s22 }
  0xb8   : > { %3337 = vrot.lane.b32.xlu0 %v3346_v32, %s3887_s24 }
  0xbf   : > { %3402 = vrot.lane.b32.xlu2 %v3396_v50, %s3885_s21  ;;  %3407 = vrot.lane.b32.xlu1 %v3396_v50, %s3884_s17 }
  0xc0   : > { %3342 = vrot.lane.b32.xlu0 %v3346_v32, %s3883_s16 }
  0xc7   : > { %3427 = vrot.lane.b32.xlu2 %v3426_v55, %s3887_s24  ;;  %3417 = vrot.lane.b32.xlu1 %v3416_v57, %s3882_s15 }
  0xc8   : > { %3352 = vrot.lane.b32.xlu0 %v3346_v32, %s3886_s22 }
  0xcf   : > { %3442 = vrot.lane.b32.xlu2 %v3416_v57, %s3881_s14  ;;  %3437 = vrot.lane.b32.xlu1 %v3426_v55, %s3883_s16 }
  0xd0   : > { %3357 = vrot.lane.b32.xlu0 %v3366_v45, %s3882_s15 }
  0xd7   : > { %3452 = vrot.lane.b32.xlu2 %v3426_v55, %s3886_s22  ;;  %3457 = vrot.lane.b32.xlu1 %v3456_v62, %s3887_s24 }
  0xd8   : > { %3362 = vrot.lane.b32.xlu0 %v3366_v45, %s3885_s21 }
  0xdf   : > { %3472 = vrot.lane.b32.xlu2 %v3456_v62, %s3886_s22  ;;  %3462 = vrot.lane.b32.xlu1 %v3456_v62, %s3883_s16 }
  0xe0   : > { %3377 = vrot.lane.b32.xlu0 %v3381_v44, %s3887_s24 }
  0xe7   : > { %3467 = vrot.lane.b32.xlu1 %v3456_v62, %s3880_s13  ;;  %3482 = vrot.lane.b32.xlu2 %v3481_v9, %s3887_s24 }
  0xe8   : > { %3412 = vrot.lane.b32.xlu0 %v3396_v50, %s3881_s14 }
  0xef   : > { %3487 = vrot.lane.b32.xlu1 %v3486_v10, %s3885_s21  ;;  %3492 = vrot.lane.b32.xlu2 %v3481_v9, %s3883_s16 }
  0xf0   : > { %3422 = vrot.lane.b32.xlu0 %v3416_v57, %s3885_s21 }
  0xf7   : > { %3502 = vrot.lane.b32.xlu1 %v3481_v9, %s3880_s13  ;;  %3507 = vrot.lane.b32.xlu2 %v3486_v10, %s3881_s14 }
  0xf8   : > { %3432 = vrot.lane.b32.xlu0 %v3416_v57, %s3884_s17 }
  0xf9   : > { %v4117_v16 = vpop.permute.xlu2 %3347 }
  0xfa   : > { %v3350_v12 = vunpack.i.h.bf16 %v4117_v16  ;;  %v3349_v13 = vunpack.i.l.bf16 %v4117_v16 }
  0xff   : > { %3517 = vrot.lane.b32.xlu1 %v3516_v18, %s3882_s15  ;;  %3522 = vrot.lane.b32.xlu2 %v3516_v18, %s3885_s21 }
 0x100   : > { %3447 = vrot.lane.b32.xlu0 %v3426_v55, %s3880_s13 }
 0x101   : > { %v4123_v20 = vpop.permute.xlu2 %3382 }
 0x107   : > { %3547 = vrot.lane.b32.xlu1 %v3546_v23, %s3887_s24  ;;  %3527 = vrot.lane.b32.xlu2 %v3516_v18, %s3884_s17 }
 0x108   : > { %3477 = vrot.lane.b32.xlu0 %v3486_v10, %s3882_s15 }
 0x109   : > { %v4133_v25 = vpop.permute.xlu2 %3387 }
 0x10f   : > { %3557 = vrot.lane.b32.xlu1 %v3546_v23, %s3883_s16  ;;  %3532 = vrot.lane.b32.xlu2 %v3516_v18, %s3881_s14 }
 0x110   : > { %3497 = vrot.lane.b32.xlu0 %v3486_v10, %s3884_s17 }
 0x111   : > { %v4141_v29 = vpop.permute.xlu2 %3397  ;;  %v4143_v32 = vpop.permute.xlu1 %3332 }
 0x112   : > { %v3399_v33 = vunpack.i.l.bf16 %v4141_v29  ;;  %v3318_v34 = vpop.permute.xlu0 %3317  ;;  %v3335_v55 = vunpack.i.h.bf16 %v4143_v32  ;;  %v3334_v57 = vunpack.i.l.bf16 %v4143_v32 }
 0x113   : > { %v3320_v35 = vunpack.i.h.bf16 %v3318_v34  ;;  %v3319_v36 = vunpack.i.l.bf16 %v3318_v34 }
 0x114   : > { %v628_v62 = vsel %vm627_vm2, %v3335_v55, %v3334_v57 }
 0x115   : > { %v727_v37 = vsel %vm726_vm14, %v3320_v35, %v3319_v36  ;;  %v728_v38 = vsel %vm726_vm14, %v3319_v36, %v3399_v33 }
 0x116   : > { %791 = vmatpush.msrb.mxu0 %v727_v37  ;;  %811 = vmatpush.msrb.mxu1 %v728_v38 }
 0x117   : > { %3552 = vrot.lane.b32.xlu2 %v3551_v22, %s3884_s17  ;;  %3572 = vrot.lane.b32.xlu1 %v4154_v39, %s3883_s16 }
 0x118   : > { %3512 = vrot.lane.b32.xlu0 %v3481_v9, %s3886_s22 }
 0x119   : > { %v4160_v40 = vpop.permute.xlu2 %3402  ;;  %v4162_v41 = vpop.permute.xlu1 %3367 }
 0x11a   : > { %v3404_v44 = vunpack.i.l.bf16 %v4160_v40  ;;  %v3323_v45 = vpop.permute.xlu0 %3322  ;;  %v3370_v55 = vunpack.i.h.bf16 %v4162_v41 }
 0x11b   : > { %v3325_v46 = vunpack.i.h.bf16 %v3323_v45  ;;  %v3324_v47 = vunpack.i.l.bf16 %v3323_v45 }
 0x11d   : > { %v694_v48 = vsel %vm693_vm15, %v3325_v46, %v3324_v47  ;;  %v695_v50 = vsel %vm693_vm15, %v3324_v47, %v3404_v44 }
 0x11e   : > { %792 = vmatpush.msrb.mxu0 %v694_v48  ;;  %812 = vmatpush.msrb.mxu1 %v695_v50 }
 0x11f   : > { %3562 = vrot.lane.b32.xlu2 %v3551_v22, %s3881_s14  ;;  %3582 = vrot.lane.b32.xlu1 %v3546_v23, %s3880_s13 }
 0x120   : > { %3537 = vrot.lane.b32.xlu0 %v3551_v22, %s3882_s15 }
 0x121   : > { %v4172_v51 = vpop.permute.xlu2 %3427  ;;  %v4174_v52 = vpop.permute.xlu1 %3372 }
 0x122   : > { %v3328_v53 = vpop.permute.xlu0 %3327 }
 0x123   : > { %v3330_v58 = vunpack.i.h.bf16 %v3328_v53  ;;  %v3329_v59 = vunpack.i.l.bf16 %v3328_v53 }
 0x125   : > { %v661_v60 = vsel %vm660_vm1, %v3330_v58, %v3329_v59  ;;  %v3369_v58 = vunpack.i.l.bf16 %v4162_v41 }
 0x126   : > { %793 = vmatpush.msrb.mxu0 %v661_v60 }
 0x127   : > { %3587 = vrot.lane.b32.xlu1 %v3546_v23, %s3886_s22  ;;  %3567 = vrot.lane.b32.xlu2 %v4154_v39, %s3887_s24  ;;  %v521_v23 = vsel %vm520_vm5, %v3350_v12, %v3349_v13 }
 0x128   : > { %794 = vmatpush.msrb.mxu0 %v628_v62  ;;  %3542 = vrot.lane.b32.xlu0 %v3551_v22, %s3885_s21  ;;  %v3374_v62 = vunpack.i.l.bf16 %v4174_v52 }
 0x129   : > { %v4186_v63 = vpop.permute.xlu2 %3442  ;;  %v4188_v0 = vpop.permute.xlu1 %3392 }
 0x12a   : > { %v4190_v3 = vpop.permute.xlu0 %3337  ;;  %795 = vmatpush.msrb.mxu0 %v4024_v30 }
 0x12b   : > { %v3340_v4 = vunpack.i.h.bf16 %v4190_v3  ;;  %v3339_v5 = vunpack.i.l.bf16 %v4190_v3 }
 0x12d   : > { %v587_v6 = vsel %vm586_vm3, %v3340_v4, %v3339_v5 }
 0x12e   : > { %796 = vmatpush.msrb.mxu0 %v587_v6 }
 0x12f   : > { %1462 = vrot.lane.b32.xlu2 %v4139_v28, %s3884_s17 }
 0x130   : > { %1494 = vrot.lane.b32.xlu0 %v4139_v28, %s3885_s21 }
 0x131   : > { %v4202_v9 = vpop.permute.xlu2 %3452  ;;  %v4204_v10 = vpop.permute.xlu1 %3407 }
 0x132   : > { %v3409_v30 = vunpack.i.l.bf16 %v4204_v10  ;;  %v4207_v11 = vpop.permute.xlu0 %3342 }
 0x133   : > { %v3345_v14 = vunpack.i.h.bf16 %v4207_v11  ;;  %v3344_v17 = vunpack.i.l.bf16 %v4207_v11 }
 0x134   : > { %v662_v18 = vsel %vm660_vm1, %v3329_v59, %v3409_v30  ;;  %v663_v12 = vsel %vm660_vm1, %v3409_v30, %v3369_v58  ;;  %v4274_v30 = vld [vmem:[%s5354_s2] sm:$0xff] }
 0x135   : > { %v554_v19 = vsel %vm553_vm4, %v3345_v14, %v3344_v17  ;;  %813 = vmatpush.msrb.mxu1 %v662_v18  ;;  %v664_v14 = vsel %vm660_vm1, %v3369_v58, %v3370_v55 }
 0x136   : > { %797 = vmatpush.msrb.mxu0 %v554_v19 }
 0x137   : > { %3597 = vrot.lane.b32.xlu2 %v4154_v39, %s3886_s22 }
 0x138   : > { %798 = vmatpush.msrb.mxu0 %v521_v23  ;;  %3577 = vrot.lane.b32.xlu0 %v4154_v39, %s3880_s13 }
 0x139   : > { %v4224_v24 = vpop.permute.xlu2 %3472  ;;  %v4226_v26 = vpop.permute.xlu1 %3417 }
 0x13a   : > { %v4228_v27 = vpop.permute.xlu0 %3352  ;;  %v3419_v58 = vunpack.i.l.bf16 %v4226_v26 }
 0x13b   : > { %v3355_v34 = vunpack.i.h.bf16 %v4228_v27  ;;  %v3354_v35 = vunpack.i.l.bf16 %v4228_v27 }
 0x13d   : > { %v488_v36 = vsel %vm487_vm6, %v3355_v34, %v3354_v35 }
 0x13e   : > { %799 = vmatpush.msrb.mxu0 %v488_v36 }
 0x13f   : > { %3210 = vmatmul.msk.f32.vlgmr.msrb.gmra.mxu0 %vm780_vm7, %v4274_v30 }
 0x140   : > { %3262 = vmatpush.msk.msra.mxu0 %vm227_vm0, %v3879_v2  ;;  %1390 = vrot.lane.b32.xlu0 %v5358_v56, %s3887_s24 }
 0x141   : > { %v4240_v37 = vpop.permute.xlu1 %3437  ;;  %v4242_v38 = vpop.permute.xlu2 %3482 }
 0x142   : > { %v3358_v22 = vpop.permute.xlu0 %3357 }
 0x143   : > { %v3360_v39 = vunpack.i.h.bf16 %v3358_v22  ;;  %v3359_v45 = vunpack.i.l.bf16 %v3358_v22  ;;  %v3390_v22 = vunpack.i.h.bf16 %v4133_v25 }
 0x145   : > { %v729_v46 = vsel %vm726_vm14, %v3399_v33, %v3359_v45  ;;  %v730_v47 = vsel %vm726_vm14, %v3359_v45, %v3360_v39  ;;  %v3375_v33 = vunpack.i.h.bf16 %v4174_v52  ;;  %v3385_v52 = vunpack.i.h.bf16 %v4123_v20 }
 0x146   : > { %831 = vmatpush.msrb.mxu2 %v729_v46  ;;  %851 = vmatpush.msrb.mxu3 %v730_v47  ;;  %v3389_v39 = vunpack.i.l.bf16 %v4133_v25  ;;  %v3394_v46 = vunpack.i.l.bf16 %v4188_v0 }
 0x147   : > { %v631_v18 = vsel %vm627_vm2, %v3374_v62, %v3375_v33 }
 0x148   : > { %1294 = vrot.lane.b32.xlu0 %v5358_v56, %s3886_s22 }
 0x149   : > { %v4250_v48 = vpop.permute.xlu1 %3457  ;;  %v4252_v50 = vpop.permute.xlu2 %3492 }
 0x14a   : > { %v3363_v53 = vpop.permute.xlu0 %3362 }
 0x14b   : > { %v3365_v59 = vunpack.i.h.bf16 %v3363_v53  ;;  %v3364_v60 = vunpack.i.l.bf16 %v3363_v53 }
 0x14d   : > { %v696_v4 = vsel %vm693_vm15, %v3404_v44, %v3364_v60  ;;  %v697_v6 = vsel %vm693_vm15, %v3364_v60, %v3365_v59  ;;  %v3384_v44 = vunpack.i.l.bf16 %v4123_v20  ;;  %v3395_v20 = vunpack.i.h.bf16 %v4188_v0 }
 0x14e   : > { %832 = vmatpush.msrb.mxu2 %v696_v4  ;;  %852 = vmatpush.msrb.mxu3 %v697_v6  ;;  %v3400_v4 = vunpack.i.h.bf16 %v4141_v29 }
 0x14f   : > { %v557_v47 = vsel %vm553_vm4, %v3384_v44, %v3385_v52  ;;  %v491_v33 = vsel %vm487_vm6, %v3394_v46, %v3395_v20  ;;  %v3439_v52 = vunpack.i.l.bf16 %v4240_v37 }
 0x150   : > { %833 = vmatpush.msrb.mxu2 %v663_v12  ;;  %853 = vmatpush.msrb.mxu3 %v664_v14  ;;  %v1131_v14 = vsel %vm726_vm14, %v3400_v4, %v3419_v58  ;;  %v3459_v58 = vunpack.i.l.bf16 %v4250_v48 }
 0x151   : > { %v4264_v41 = vpop.permute.xlu1 %3462  ;;  %v4267_v19 = vpop.permute.xlu2 %3507  ;;  %v555_v3 = vsel %vm553_vm4, %v3344_v17, %v3439_v52 }
 0x152   : > { %v3378_v23 = vpop.permute.xlu0 %3377  ;;  %854 = vmatpush.msrb.mxu3 %v631_v18  ;;  %v3429_v18 = vunpack.i.l.bf16 %v4172_v51 }
 0x153   : > { %v3380_v34 = vunpack.i.h.bf16 %v3378_v23  ;;  %v3379_v36 = vunpack.i.l.bf16 %v3378_v23 }
 0x154   : > { %855 = vmatpush.msrb.mxu3 %v4049_v43  ;;  %v524_v43 = vsel %vm520_vm5, %v3389_v39, %v3390_v22  ;;  %v588_v32 = vsel %vm586_vm3, %v3339_v5, %v3429_v18  ;;  %v556_v5 = vsel %vm553_vm4, %v3439_v52, %v3384_v44  ;;  %v3444_v44 = vunpack.i.l.bf16 %v4186_v63 }
 0x155   : > { %v590_v45 = vsel %vm586_vm3, %v3379_v36, %v3380_v34  ;;  %v3454_v52 = vunpack.i.l.bf16 %v4202_v9 }
 0x156   : > { %856 = vmatpush.msrb.mxu3 %v590_v45 }
 0x157   : > { %v489_v16 = vsel %vm487_vm6, %v3354_v35, %v3454_v52  ;;  %v490_v25 = vsel %vm487_vm6, %v3454_v52, %v3394_v46  ;;  %v4404_v46 = vld [vmem:[%s5354_s2 + $0x8] sm:$0xff] }
 0x158   : > { %857 = vmatpush.msrb.mxu3 %v557_v47  ;;  %v3410_v47 = vunpack.i.h.bf16 %v4204_v10 }
 0x159   : > { %v4285_v53 = vpop.permute.xlu1 %3467  ;;  %v4290_v55 = vpop.permute.xlu2 %3522 }
 0x15a   : > { %v4293_v59 = vpop.permute.xlu0 %3412  ;;  %858 = vmatpush.msrb.mxu3 %v524_v43 }
 0x15b   : > { %v3414_v60 = vunpack.i.l.bf16 %v4293_v59  ;;  %v3415_v11 = vunpack.i.h.bf16 %v4293_v59 }
 0x15c   : > { %859 = vmatpush.msrb.mxu3 %v491_v33  ;;  %v3430_v33 = vunpack.i.h.bf16 %v4172_v51 }
 0x15d   : > { %v629_v6 = vsel %vm627_vm2, %v3334_v57, %v3414_v60  ;;  %v630_v12 = vsel %vm627_vm2, %v3414_v60, %v3374_v62  ;;  %v589_v57 = vsel %vm586_vm3, %v3429_v18, %v3379_v36  ;;  %3213 = vmatmul.msk.f32.vlgmr.msrb.gmra.mxu3 %vm780_vm7, %v4274_v30  ;;  %v1035_v60 = vsel %vm627_vm2, %v3415_v11, %v3444_v44 }
 0x15e   : > { %3265 = vmatpush.msk.msra.mxu3 %vm227_vm0, %v3879_v2  ;;  %814 = vmatpush.msrb.mxu1 %v629_v6  ;;  %v3469_v44 = vunpack.i.l.bf16 %v4285_v53 }
 0x15f   : > { %834 = vmatpush.msrb.mxu2 %v630_v12 }
 0x160   : > { %1251 = vmatpush.msra.mxu3 %v1131_v14  ;;  %815 = vmatpush.msrb.mxu1 %v4027_v31  ;;  %v3405_v31 = vunpack.i.h.bf16 %v4160_v40  ;;  %v3464_v14 = vunpack.i.l.bf16 %v4264_v41 }
 0x161   : > { %835 = vmatpush.msrb.mxu2 %v4046_v42  ;;  %v4318_v62 = vpop.permute.xlu1 %3487  ;;  %v4320_v23 = vpop.permute.xlu2 %3527 }
 0x162   : > { %v4324_v34 = vpop.permute.xlu0 %3422  ;;  %816 = vmatpush.msrb.mxu1 %v588_v32 }
 0x163   : > { %836 = vmatpush.msrb.mxu2 %v589_v57  ;;  %v3424_v42 = vunpack.i.l.bf16 %v4324_v34  ;;  %v995_v57 = vsel %vm586_vm3, %v3430_v33, %v3459_v58  ;;  %v3455_v58 = vunpack.i.h.bf16 %v4202_v9 }
 0x164   : > { %817 = vmatpush.msrb.mxu1 %v555_v3 }
 0x165   : > { %837 = vmatpush.msrb.mxu2 %v556_v5  ;;  %v1099_v36 = vsel %vm693_vm15, %v3405_v31, %v3424_v42  ;;  %v3440_v42 = vunpack.i.h.bf16 %v4240_v37  ;;  %v3474_v5 = vunpack.i.l.bf16 %v4224_v24 }
 0x166   : > { %1252 = vmatpush.msra.mxu3 %v1099_v36 }
 0x167   : > { %v899_v27 = vsel %vm487_vm6, %v3455_v58, %v3474_v5  ;;  %v3525_v5 = vunpack.i.h.bf16 %v4290_v55 }
 0x169   : > { %v4335_v22 = vpop.permute.xlu1 %3502  ;;  %v4337_v45 = vpop.permute.xlu2 %3532 }
 0x16a   : > { %v4339_v20 = vpop.permute.xlu0 %3432 }
 0x16b   : > { %v3434_v17 = vunpack.i.l.bf16 %v4339_v20 }
 0x16d   : > { %v1067_v43 = vsel %vm660_vm1, %v3410_v47, %v3434_v17  ;;  %v3420_v17 = vunpack.i.h.bf16 %v4226_v26 }
 0x16e   : > { %1253 = vmatpush.msra.mxu3 %v1067_v43  ;;  %v963_v43 = vsel %vm553_vm4, %v3440_v42, %v3464_v14 }
 0x170   : > { %1254 = vmatpush.msra.mxu3 %v1035_v60  ;;  %v3435_v60 = vunpack.i.h.bf16 %v4339_v20 }
 0x171   : > { %v4353_v6 = vpop.permute.xlu1 %3517  ;;  %v4355_v12 = vpop.permute.xlu2 %3552 }
 0x172   : > { %v4358_v18 = vpop.permute.xlu0 %3447  ;;  %1255 = vmatpush.msra.mxu3 %v4061_v49  ;;  %v3520_v14 = vunpack.i.h.bf16 %v4353_v6  ;;  %v3519_v52 = vunpack.i.l.bf16 %v4353_v6  ;;  %v1066_v40 = vsel %vm660_vm1, %v3435_v60, %v3410_v47  ;;  %v3555_v6 = vunpack.i.h.bf16 %v4355_v12 }
 0x173   : > { %v3449_v32 = vunpack.i.l.bf16 %v4358_v18  ;;  %v3450_v3 = vunpack.i.h.bf16 %v4358_v18 }
 0x174   : > { %1256 = vmatpush.msra.mxu3 %v995_v57  ;;  %v1130_v57 = vsel %vm726_vm14, %v3420_v17, %v3400_v4  ;;  %v3445_v4 = vunpack.i.h.bf16 %v4186_v63 }
 0x175   : > { %v522_v36 = vsel %vm520_vm5, %v3349_v13, %v3449_v32  ;;  %v523_v49 = vsel %vm520_vm5, %v3449_v32, %v3389_v39  ;;  %v3425_v13 = vunpack.i.h.bf16 %v4324_v34  ;;  %v931_v39 = vsel %vm520_vm5, %v3450_v3, %v3469_v44 }
 0x176   : > { %818 = vmatpush.msrb.mxu1 %v522_v36  ;;  %838 = vmatpush.msrb.mxu2 %v523_v49  ;;  %v3524_v36 = vunpack.i.l.bf16 %v4290_v55  ;;  %v3530_v49 = vunpack.i.h.bf16 %v4320_v23  ;;  %v3529_v44 = vunpack.i.l.bf16 %v4320_v23  ;;  %v1034_v10 = vsel %vm627_vm2, %v3445_v4, %v3415_v11 }
 0x177   : > { %1257 = vmatpush.msra.mxu3 %v963_v43  ;;  %v1098_v29 = vsel %vm693_vm15, %v3425_v13, %v3405_v31  ;;  %v1539_v43 = vsel %vm726_vm14, %v3519_v52, %v3520_v14  ;;  %v3460_v31 = vunpack.i.h.bf16 %v4250_v48  ;;  %v1065_v55 = vsel %vm660_vm1, %v3555_v6, %v3435_v60 }
 0x178   : > { %819 = vmatpush.msrb.mxu1 %v489_v16  ;;  %839 = vmatpush.msrb.mxu2 %v490_v25  ;;  %v3535_v16 = vunpack.i.h.bf16 %v4337_v45  ;;  %v3534_v25 = vunpack.i.l.bf16 %v4337_v45  ;;  %v1475_v14 = vsel %vm660_vm1, %v3529_v44, %v3530_v49  ;;  %v3475_v49 = vunpack.i.h.bf16 %v4224_v24 }
 0x179   : > { %1258 = vmatpush.msra.mxu3 %v931_v39  ;;  %v4397_v0 = vpop.permute.xlu1 %3547  ;;  %v4399_v35 = vpop.permute.xlu2 %3562  ;;  %3212 = vmatmul.msk.f32.vlgmr.msrb.gmra.mxu2 %vm780_vm7, %v4274_v30  ;;  %v1507_v39 = vsel %vm693_vm15, %v3524_v36, %v3525_v5  ;;  %v3485_v60 = vunpack.i.h.bf16 %v4242_v38  ;;  %v3495_v45 = vunpack.i.h.bf16 %v4252_v50  ;;  %v3504_v48 = vunpack.i.l.bf16 %v4335_v22 }
 0x17a   : > { %3264 = vmatpush.msk.msra.mxu2 %vm227_vm0, %v3879_v2  ;;  %v4409_v32 = vpop.permute.xlu0 %3477  ;;  %3263 = vmatpush.msk.msra.mxu1 %vm227_vm0, %v3879_v2  ;;  %v3550_v59 = vunpack.i.h.bf16 %v4397_v0  ;;  %v3549_v11 = vunpack.i.l.bf16 %v4397_v0  ;;  %v1443_v5 = vsel %vm627_vm2, %v3534_v25, %v3535_v16  ;;  %v898_v18 = vsel %vm487_vm6, %v3475_v49, %v3455_v58 }
 0x17b   : > { %1259 = vmatpush.msra.mxu3 %v899_v27  ;;  %3211 = vmatmul.msk.f32.vlgmr.msrb.gmra.mxu1 %vm780_vm7, %v4274_v30  ;;  %v3465_v27 = vunpack.i.h.bf16 %v4264_v41 }
 0x17c   : > { %1231 = vmatpush.msra.mxu2 %v1130_v57  ;;  %3217 = vmatmul.msk.f32.vlgmr.msra.gmra.mxu3 %vm780_vm7, %v4404_v46  ;;  %v1403_v16 = vsel %vm586_vm3, %v3549_v11, %v3550_v59 }
 0x17d   : > { %3269 = vmatpush.msk.msrb.mxu3 %vm227_vm0, %v3879_v2  ;;  %v962_v51 = vsel %vm553_vm4, %v3465_v27, %v3440_v42 }
 0x17e   : > { %1232 = vmatpush.msra.mxu2 %v1098_v29  ;;  %v994_v29 = vsel %vm586_vm3, %v3460_v31, %v3430_v33 }
 0x17f   : > { %1659 = vmatpush.msrb.mxu3 %v1539_v43 }
 0x180   : > { %1233 = vmatpush.msra.mxu2 %v1066_v40 }
 0x181   : > { %1660 = vmatpush.msrb.mxu3 %v1507_v39  ;;  %v4457_v30 = vpop.permute.xlu1 %3557  ;;  %v4459_v47 = vpop.permute.xlu2 %3567 }
 0x182   : > { %1234 = vmatpush.msra.mxu2 %v1034_v10  ;;  %v4465_v57 = vpop.permute.xlu0 %3497  ;;  %v3560_v43 = vunpack.i.h.bf16 %v4457_v30  ;;  %v3559_v40 = vunpack.i.l.bf16 %v4457_v30 }
 0x183   : > { %1661 = vmatpush.msrb.mxu3 %v1475_v14  ;;  %v5360_v33 = vunpack.i.h.bf16 %v4465_v57 }
 0x184   : > { %1235 = vmatpush.msra.mxu2 %v4072_v54  ;;  %v3470_v54 = vunpack.i.h.bf16 %v4285_v53 }
 0x185   : > { %1662 = vmatpush.msrb.mxu3 %v1443_v5  ;;  %v3479_v5 = vunpack.i.l.bf16 %v4409_v32 }
 0x186   : > { %1236 = vmatpush.msra.mxu2 %v994_v29  ;;  %v930_v39 = vsel %vm520_vm5, %v3470_v54, %v3450_v3 }
 0x187   : > { %1663 = vmatpush.msrb.mxu3 %v4115_v15  ;;  %v1371_v15 = vsel %vm553_vm4, %v3559_v40, %v3560_v43 }
 0x188   : > { %1237 = vmatpush.msra.mxu2 %v962_v51 }
 0x189   : > { %1664 = vmatpush.msrb.mxu3 %v1403_v16  ;;  %v4497_v37 = vpop.permute.xlu1 %3572  ;;  %v1463_v42 = vpop.permute.xlu2 %1462 }
 0x18a   : > { %1238 = vmatpush.msra.mxu2 %v930_v39  ;;  %v4502_v10 = vpop.permute.xlu0 %3512  ;;  %v4512_v3 = vsel %vm660_vm1, %v1463_v42, %v5360_v33 }
 0x18b   : > { %1665 = vmatpush.msrb.mxu3 %v1371_v15 }
 0x18c   : > { %1239 = vmatpush.msra.mxu2 %v898_v18  ;;  %v3489_v18 = vunpack.i.l.bf16 %v4318_v62 }
 0x18d   : > { %3216 = vmatmul.msk.f32.vlgmr.msra.gmra.mxu2 %vm780_vm7, %v4404_v46 }
 0x18e   : > { %3268 = vmatpush.msk.msrb.mxu2 %vm227_vm0, %v3879_v2 }
 0x191   : > { %v4519_v14 = vpop.permute.xlu1 %3582  ;;  %v4625_v0 = vpop.permute.xlu2 %3597 }
 0x192   : > { %v4521_v9 = vpop.permute.xlu0 %3537  ;;  %v3585_v58 = vunpack.i.h.bf16 %v4519_v14  ;;  %v3584_v59 = vunpack.i.l.bf16 %v4519_v14  ;;  %v3599_v53 = vunpack.i.l.bf16 %v4625_v0 }
 0x193   : > { %v3540_v29 = vunpack.i.h.bf16 %v4521_v9  ;;  %v5361_v43 = vunpack.i.l.bf16 %v4521_v9  ;;  %v5364_v24 = vunpack.i.l.bf16 %v4521_v9  ;;  %v3510_v9 = vunpack.i.h.bf16 %v4267_v19 }
 0x194   : > { %v1339_v51 = vsel %vm520_vm5, %v3584_v59, %v3585_v58  ;;  %v1338_v41 = vsel %vm520_vm5, %v3504_v48, %v3584_v59 }
 0x195   : > { %v1128_v16 = vsel %vm726_vm14, %v3479_v5, %v3540_v29  ;;  %v1129_v39 = vsel %vm726_vm14, %v3540_v29, %v3420_v17  ;;  %v1538_v42 = vsel %vm726_vm14, %v5361_v43, %v3519_v52  ;;  %1666 = vmatpush.msrb.mxu3 %v1339_v51  ;;  %v3499_v5 = vunpack.i.l.bf16 %v4465_v57 }
 0x196   : > { %1191 = vmatpush.msra.mxu0 %v1128_v16  ;;  %1211 = vmatpush.msra.mxu1 %v1129_v39  ;;  %v3554_v51 = vunpack.i.l.bf16 %v4355_v12  ;;  %v4558_v39 = vld [vmem:[%s5354_s2 + $0x10] sm:$0xff]  ;;  %v3575_v12 = vunpack.i.h.bf16 %v4497_v37 }
 0x197   : > { %1639 = vmatpush.msrb.mxu2 %v1538_v42  ;;  %v3565_v42 = vunpack.i.h.bf16 %v4399_v35  ;;  %v1064_v34 = vsel %vm660_vm1, %v3499_v5, %v3555_v6  ;;  %v5365_v6 = vunpack.i.h.bf16 %v4465_v57 }
 0x199   : > { %v4540_v15 = vpop.permute.xlu1 %3587  ;;  %v1033_v20 = vsel %vm627_vm2, %v3565_v42, %v3445_v4  ;;  %v3484_v4 = vunpack.i.l.bf16 %v4242_v38  ;;  %v1473_v5 = vsel %vm660_vm1, %v5365_v6, %v3554_v51 }
 0x19a   : > { %v4543_v58 = vpop.permute.xlu0 %3542  ;;  %v3590_v26 = vunpack.i.h.bf16 %v4540_v15  ;;  %v5362_v17 = vunpack.i.l.bf16 %v4540_v15 }
 0x19b   : > { %v3545_v52 = vunpack.i.h.bf16 %v4543_v58  ;;  %v3544_v29 = vunpack.i.l.bf16 %v4543_v58  ;;  %v3570_v58 = vunpack.i.h.bf16 %v4459_v47 }
 0x19c   : > { %v1307_v16 = vsel %vm487_vm6, %v5362_v17, %v3590_v26  ;;  %v3564_v26 = vunpack.i.l.bf16 %v4399_v35  ;;  %v3509_v17 = vunpack.i.l.bf16 %v4267_v19 }
 0x19d   : > { %v1096_v56 = vsel %vm693_vm15, %v3489_v18, %v3545_v52  ;;  %v1097_v33 = vsel %vm693_vm15, %v3545_v52, %v3425_v13  ;;  %v1506_v43 = vsel %vm693_vm15, %v3544_v29, %v3524_v36  ;;  %1667 = vmatpush.msrb.mxu3 %v1307_v16  ;;  %v3490_v13 = vunpack.i.h.bf16 %v4318_v62 }
 0x19e   : > { %1192 = vmatpush.msra.mxu0 %v1096_v56  ;;  %1212 = vmatpush.msra.mxu1 %v1097_v33  ;;  %v1474_v56 = vsel %vm660_vm1, %v3554_v51, %v3529_v44  ;;  %v3569_v36 = vunpack.i.l.bf16 %v4459_v47  ;;  %v1032_v33 = vsel %vm627_vm2, %v3509_v17, %v3565_v42  ;;  %v1442_v62 = vsel %vm627_vm2, %v3564_v26, %v3534_v25 }
 0x19f   : > { %1640 = vmatpush.msrb.mxu2 %v1506_v43  ;;  %3221 = vmatmul.msk.f32.vlgmr.msrb.gmra.mxu3 %vm780_vm7, %v4558_v39  ;;  %v3574_v44 = vunpack.i.l.bf16 %v4497_v37  ;;  %v3505_v43 = vunpack.i.h.bf16 %v4335_v22  ;;  %v993_v18 = vsel %vm586_vm3, %v3485_v60, %v3460_v31  ;;  %v3494_v17 = vunpack.i.l.bf16 %v4252_v50 }
 0x1a0   : > { %1193 = vmatpush.msra.mxu0 %v1064_v34  ;;  %1213 = vmatpush.msra.mxu1 %v1065_v55  ;;  %v992_v25 = vsel %vm586_vm3, %v3569_v36, %v3485_v60  ;;  %v1401_v52 = vsel %vm586_vm3, %v3570_v58, %v3484_v4  ;;  %v4708_v55 = vld [vmem:[%s5353_s1 + $0x18] sm:$0xff] }
 0x1a1   : > { %1641 = vmatpush.msrb.mxu2 %v1474_v56  ;;  %3273 = vmatpush.msk.msra.mxu3 %vm227_vm0, %v3879_v2  ;;  %v960_v38 = vsel %vm553_vm4, %v3574_v44, %v3495_v45  ;;  %v1370_v50 = vsel %vm553_vm4, %v3494_v17, %v3559_v40  ;;  %v929_v31 = vsel %vm520_vm5, %v3505_v43, %v3470_v54  ;;  %v5363_v54 = vunpack.i.l.bf16 %v4540_v15  ;;  %v4723_v44 = vld [vmem:[%s5353_s1 + $0x10] sm:$0xff] }
 0x1a2   : > { %1194 = vmatpush.msra.mxu0 %v1032_v33  ;;  %1214 = vmatpush.msra.mxu1 %v1033_v20  ;;  %v1495_v23 = vpop.permute.xlu0 %1494  ;;  %v1505_v15 = vsel %vm693_vm15, %v3490_v13, %v3544_v29  ;;  %v3600_v29 = vunpack.i.h.bf16 %v4625_v0  ;;  %v1369_v35 = vsel %vm553_vm4, %v3575_v12, %v3494_v17 }
 0x1a3   : > { %1642 = vmatpush.msrb.mxu2 %v1442_v62  ;;  %v4600_v63 = vsel %vm693_vm15, %v1495_v23, %v3490_v13  ;;  %v5366_v13 = vmov 0.0  }
 0x1a4   : > { %1195 = vmatpush.msra.mxu0 %v4098_v8  ;;  %1215 = vmatpush.msra.mxu1 %v4085_v61  ;;  %v1402_v61 = vsel %vm586_vm3, %v3484_v4, %v3549_v11  ;;  %v3515_v8 = vunpack.i.h.bf16 %v4502_v10  ;;  %v3514_v11 = vunpack.i.l.bf16 %v4502_v10  ;;  %v3480_v10 = vunpack.i.h.bf16 %v4409_v32 }
 0x1a5   : > { %1643 = vmatpush.msrb.mxu2 %v4126_v21  ;;  %v961_v21 = vsel %vm553_vm4, %v3495_v45, %v3465_v27 }
 0x1a6   : > { %1196 = vmatpush.msra.mxu0 %v992_v25  ;;  %1216 = vmatpush.msra.mxu1 %v993_v18  ;;  %v897_v27 = vsel %vm487_vm6, %v3515_v8, %v3475_v49  ;;  %v1306_v40 = vsel %vm487_vm6, %v3514_v11, %v5363_v54  ;;  %v1537_v49 = vsel %vm726_vm14, %v3480_v10, %v5364_v24 }
 0x1a7   : > { %1644 = vmatpush.msrb.mxu2 %v1402_v61  ;;  %v896_v59 = vsel %vm487_vm6, %v3599_v53, %v3515_v8 }
 0x1a8   : > { %1197 = vmatpush.msra.mxu0 %v960_v38  ;;  %1217 = vmatpush.msra.mxu1 %v961_v21 }
 0x1a9   : > { %1645 = vmatpush.msrb.mxu2 %v1370_v50 }
 0x1aa   : > { %1218 = vmatpush.msra.mxu1 %v929_v31  ;;  %v4634_v22 = vpop.permute.xlu0 %3577 }
 0x1ab   : > { %1646 = vmatpush.msrb.mxu2 %v1338_v41  ;;  %v3579_v30 = vunpack.i.l.bf16 %v4634_v22  ;;  %v3580_v57 = vunpack.i.h.bf16 %v4634_v22 }
 0x1ac   : > { %1219 = vmatpush.msra.mxu1 %v897_v27 }
 0x1ad   : > { %1647 = vmatpush.msrb.mxu2 %v1306_v40  ;;  %3215 = vmatmul.msk.f32.vlgmr.msra.gmra.mxu1 %vm780_vm7, %v4404_v46  ;;  %v928_v14 = vsel %vm520_vm5, %v3579_v30, %v3505_v43  ;;  %v1337_v51 = vsel %vm520_vm5, %v3580_v57, %v3504_v48  ;;  %v4759_v40 = vld [vmem:[%s5353_s1] sm:$0xff] }
 0x1ae   : > { %3267 = vmatpush.msk.msrb.mxu1 %vm227_vm0, %v3879_v2  ;;  %3220 = vmatmul.msk.f32.vlgmr.msrb.gmra.mxu2 %vm780_vm7, %v4558_v39 }
 0x1af   : > { %1198 = vmatpush.msra.mxu0 %v928_v14  ;;  %3272 = vmatpush.msk.msra.mxu2 %vm227_vm0, %v3879_v2 }
 0x1b0   : > { %1619 = vmatpush.msrb.mxu1 %v1537_v49 }
 0x1b1   : > { %1199 = vmatpush.msra.mxu0 %v896_v59 }
 0x1b2   : > { %1620 = vmatpush.msrb.mxu1 %v1505_v15  ;;  %3214 = vmatmul.msk.f32.vlgmr.msra.gmra.mxu0 %vm780_vm7, %v4404_v46  ;;  %v1441_v46 = vsel %vm627_vm2, %v3510_v9, %v3564_v26 }
 0x1b3   : > { %3266 = vmatpush.msk.msrb.mxu0 %vm227_vm0, %v3879_v2 }
 0x1b4   : > { %1621 = vmatpush.msrb.mxu1 %v1473_v5 }
 0x1b6   : > { %1622 = vmatpush.msrb.mxu1 %v1441_v46  ;;  %v1391_v46 = vpop.permute.xlu0 %1390 }
 0x1b7   : > { %v1400_v32 = vsel %vm586_vm3, %v1391_v46, %v3570_v58 }
 0x1b8   : > { %1623 = vmatpush.msrb.mxu1 %v4093_v7  ;;  %v1305_v7 = vsel %vm487_vm6, %v3600_v29, %v3514_v11  ;;  %v4747_v11 = vld [vmem:[%s5353_s1 + $0x8] sm:$0xff] }
 0x1ba   : > { %1624 = vmatpush.msrb.mxu1 %v1401_v52 }
 0x1bc   : > { %1625 = vmatpush.msrb.mxu1 %v1369_v35  ;;  %v4741_v21 = vpop.f32.mrf.mxu0 }
 0x1be   : > { %1626 = vmatpush.msrb.mxu1 %v1337_v51 }
 0x1c0   : > { %1627 = vmatpush.msrb.mxu1 %v1305_v7  ;;  %v1295_v7 = vpop.permute.xlu0 %1294 }
 0x1c1   : > { %3219 = vmatmul.msk.f32.vlgmr.msrb.gmra.mxu1 %vm780_vm7, %v4558_v39 }
 0x1c2   : > { %3271 = vmatpush.msk.msra.mxu1 %vm227_vm0, %v3879_v2 }
 0x1e0   : > { %v4703_v16 = vpop.f32.mrf.mxu3 }
 0x1f8   : > { %v4734_v25 = vpop.f32.mrf.mxu1 }
 0x1fc   : > { %v4716_v20 = vpop.f32.mrf.mxu2 }
 0x1ff   : > { %v1261_v42 = vpop.f32.mrf.mxu3 }
 0x200   : > { %vm1267_vm8 = vcmp.ge.f32.partialorder %v1261_v42, 0.0  ;;  %v1271_v26 = vmul.f32 0.01, %v1261_v42 }
 0x202   : > { %v1275_v34 = vsel %vm1267_vm8, %v1261_v42, %v1271_v26  ;;  %vm1884_vm8 = vcmask 285696  }
 0x203   : > { %v4711_v56 = vmul.f32 %v4708_v55, %v1275_v34 }
 0x205   : > { %v3601_v36 = vpack.i.bf16 %v4711_v56, %v5366_v13  ;;  %v3616_v33 = vpack.i.bf16 0.0, %v4711_v56 }
 0x207   : > { %3602 = vrot.lane.b32.xlu2 %v3601_v36, %s3880_s13  ;;  %3617 = vrot.lane.b32.xlu0 %v3616_v33, %s3889_s8 }
 0x210   : > { %v1241_v62 = vpop.f32.mrf.mxu2 }
 0x211   : > { %vm1266_vm9 = vcmp.ge.f32.partialorder %v1241_v62, 0.0  ;;  %v1270_v23 = vmul.f32 0.01, %v1241_v62 }
 0x213   : > { %v1274_v60 = vsel %vm1266_vm9, %v1241_v62, %v1270_v23  ;;  %vm1851_vm9 = vcmask 1022976  }
 0x214   : > { %v4726_v4 = vmul.f32 %v4723_v44, %v1274_v60 }
 0x216   : > { %v3656_v45 = vpack.i.bf16 %v4711_v56, %v4726_v4  ;;  %v3611_v43 = vpack.i.bf16 %v4726_v4, %v5366_v13 }
 0x218   : > { %3657 = vrot.lane.b32.xlu0 %v3656_v45, %s3890_s11  ;;  %3612 = vrot.lane.b32.xlu2 %v3611_v43, %s3880_s13 }
 0x222   : > { %v1669_v18 = vpop.f32.mrf.mxu3 }
 0x223   : > { %vm1675_vm10 = vcmp.ge.f32.partialorder %v1669_v18, 0.0  ;;  %v1679_v17 = vmul.f32 0.01, %v1669_v18 }
 0x225   : > { %v1683_v61 = vsel %vm1675_vm10, %v1669_v18, %v1679_v17  ;;  %vm1810_vm10 = vcmask 23552  }
 0x226   : > { %v4737_v8 = vmul.f32 %v4708_v55, %v1683_v61 }
 0x228   : > { %v3591_v38 = vpack.i.bf16 %v4737_v8, %v4139_v28 }
 0x22a   : > { %v1221_v48 = vpop.f32.mrf.mxu1  ;;  %3592 = vrot.lane.b32.xlu1 %v3591_v38, %s3882_s15 }
 0x22b   : > { %vm1265_vm11 = vcmp.ge.f32.partialorder %v1221_v48, 0.0  ;;  %v1269_v50 = vmul.f32 0.01, %v1221_v48 }
 0x22d   : > { %v1273_v31 = vsel %vm1265_vm11, %v1221_v48, %v1269_v50  ;;  %vm1777_vm11 = vcmask 760832  }
 0x22e   : > { %v4750_v41 = vmul.f32 %v4747_v11, %v1273_v31 }
 0x22f   : > { %v1201_v27 = vpop.f32.mrf.mxu0 }
 0x230   : > { %v3626_v30 = vpack.i.bf16 %v4750_v41, %v4726_v4  ;;  %vm1264_vm12 = vcmp.ge.f32.partialorder %v1201_v27, 0.0  ;;  %v1268_v53 = vmul.f32 0.01, %v1201_v27 }
 0x232   : > { %1430 = vrot.lane.b32.xlu1 %v4139_v28, %s3881_s14  ;;  %3627 = vrot.lane.b32.xlu2 %v3626_v30, %s3891_s26  ;;  %v1272_v54 = vsel %vm1264_vm12, %v1201_v27, %v1268_v53  ;;  %vm1712_vm12 = vcmask 809984  }
 0x233   : > { %v4762_v14 = vmul.f32 %v4759_v40, %v1272_v54 }
 0x235   : > { %v3666_v24 = vpack.i.bf16 %v4762_v14, %v4750_v41 }
 0x237   : > { %3667 = vrot.lane.b32.xlu0 %v3666_v24, %s3892_s29 }
 0x23a   : > { %1358 = vrot.lane.b32.xlu1 %v5366_v13, %s3883_s16  ;;  %3637 = vrot.lane.b32.xlu2 %v3626_v30, %s3889_s8 }
 0x242   : > { %3607 = vrot.lane.b32.xlu1 %v3616_v33, %s3891_s26  ;;  %3647 = vrot.lane.b32.xlu2 %v3626_v30, %s3893_s30 }
 0x24a   : > { %3622 = vrot.lane.b32.xlu1 %v3616_v33, %s3893_s30  ;;  %1939 = vrot.lane.b32.xlu2 %v4762_v14, %s3891_s26 }
 0x252   : > { %3632 = vrot.lane.b32.xlu1 %v3656_v45, %s3894_s6  ;;  %1874 = vrot.lane.b32.xlu2 %v4762_v14, %s3889_s8  ;;  %s3898_s8 = smov 123  }
 0x25a   : > { %3642 = vrot.lane.b32.xlu1 %v3656_v45, %s3892_s29 }
 0x261   : > { %v3603_v49 = vpop.permute.xlu2 %3602 }
 0x262   : > { %3652 = vrot.lane.b32.xlu1 %v3656_v45, %s3885_s21  ;;  %v3605_v37 = vunpack.i.h.bf16 %v3603_v49 }
 0x26a   : > { %3662 = vrot.lane.b32.xlu1 %v3666_v24, %s3894_s6 }
 0x272   : > { %3672 = vrot.lane.b32.xlu1 %v3666_v24, %s3880_s13  ;;  %v4783_v6 = vpop.permute.xlu2 %3612 }
 0x273   : > { %v3615_v22 = vunpack.i.h.bf16 %v4783_v6 }
 0x275   : > { %v1919_v62 = vsel %vm520_vm5, %v3615_v22, %v3605_v37 }
 0x279   : > { %v3618_v0 = vpop.permute.xlu0 %3617 }
 0x27a   : > { %3677 = vrot.lane.b32.xlu1 %v3666_v24, %s3890_s11  ;;  %v3620_v42 = vunpack.i.h.bf16 %v3618_v0  ;;  %v3619_v26 = vunpack.i.l.bf16 %v3618_v0 }
 0x27c   : > { %v1888_v43 = vsel %vm1884_vm8, %v3619_v26, %v3620_v42 }
 0x282   : > { %1841 = vrot.lane.b32.xlu1 %v4762_v14, %s3893_s30 }
 0x28a   : > { %v4843_v46 = vpop.permute.xlu0 %3657 }
 0x28c   : > { %v4793_v51 = vpop.permute.xlu2 %3627 }
 0x28d   : > { %v3629_v47 = vunpack.i.l.bf16 %v4793_v51  ;;  %v3630_v53 = vunpack.i.h.bf16 %v4793_v51  ;;  %v3659_v51 = vunpack.i.l.bf16 %v4843_v46 }
 0x29c   : > { %v4780_v59 = vpop.permute.xlu1 %3592 }
 0x29d   : > { %v3594_v15 = vunpack.i.l.bf16 %v4780_v59 }
 0x29f   : > { %v1536_v5 = vsel %vm726_vm14, %v3594_v15, %v3480_v10  ;;  %v3604_v10 = vunpack.i.l.bf16 %v3603_v49  ;;  %v1951_v15 = vsel %vm1949_vm13, %v3630_v53, %v3629_v47 }
 0x2a0   : > { %1599 = vmatpush.msrb.mxu0 %v1536_v5  ;;  %2033 = vmatpush.msra.mxu1 %v1951_v15 }
 0x2a1   : > { %v1336_v19 = vsel %vm520_vm5, %v3604_v10, %v3580_v57 }
 0x2a2   : > { %1600 = vmatpush.msrb.mxu0 %v4600_v63 }
 0x2a4   : > { %v1431_v52 = vpop.permute.xlu1 %1430  ;;  %1601 = vmatpush.msrb.mxu0 %v4512_v3 }
 0x2a5   : > { %v1440_v35 = vsel %vm627_vm2, %v1431_v52, %v3510_v9  ;;  %v4805_v9 = vpop.permute.xlu2 %3637 }
 0x2a6   : > { %1602 = vmatpush.msrb.mxu0 %v1440_v35  ;;  %v3639_v34 = vunpack.i.l.bf16 %v4805_v9  ;;  %v3660_v35 = vunpack.i.h.bf16 %v4843_v46 }
 0x2a8   : > { %1603 = vmatpush.msrb.mxu0 %v4139_v28  ;;  %v1304_v28 = vsel %vm487_vm6, %v1295_v7, %v3600_v29  ;;  %v1887_v45 = vsel %vm1884_vm8, %v3639_v34, %v3619_v26  ;;  %v1716_v7 = vsel %vm1712_vm12, %v3659_v51, %v3660_v35 }
 0x2aa   : > { %1604 = vmatpush.msrb.mxu0 %v1400_v32 }
 0x2ac   : > { %v1359_v63 = vpop.permute.xlu1 %1358 }
 0x2ad   : > { %v1368_v3 = vsel %vm553_vm4, %v1359_v63, %v3575_v12  ;;  %v3614_v12 = vunpack.i.l.bf16 %v4783_v6  ;;  %v4821_v33 = vpop.permute.xlu2 %3647 }
 0x2ae   : > { %1605 = vmatpush.msrb.mxu0 %v1368_v3  ;;  %v3649_v60 = vunpack.i.l.bf16 %v4821_v33  ;;  %v4857_v3 = vpop.permute.xlu0 %3667 }
 0x2af   : > { %v1920_v23 = vsel %vm520_vm5, %v3605_v37, %v3614_v12  ;;  %v3640_v12 = vunpack.i.h.bf16 %v4805_v9 }
 0x2b0   : > { %1606 = vmatpush.msrb.mxu0 %v1336_v19 }
 0x2b2   : > { %1607 = vmatpush.msrb.mxu0 %v1304_v28  ;;  %v3669_v28 = vunpack.i.l.bf16 %v4857_v3 }
 0x2b3   : > { %3218 = vmatmul.msk.f32.vlgmr.msrb.gmra.mxu0 %vm780_vm7, %v4558_v39 }
 0x2b4   : > { %v3608_v58 = vpop.permute.xlu1 %3607  ;;  %3270 = vmatpush.msk.msra.mxu0 %vm227_vm0, %v3879_v2 }
 0x2b5   : > { %v3610_v57 = vunpack.i.h.bf16 %v3608_v58  ;;  %v3609_v29 = vunpack.i.l.bf16 %v3608_v58  ;;  %v1940_v5 = vpop.permute.xlu2 %1939 }
 0x2b7   : > { %v1952_v39 = vsel %vm1949_vm13, %v3629_v47, %v3609_v29  ;;  %v1953_v36 = vsel %vm1949_vm13, %v3609_v29, %v3610_v57  ;;  %v3650_v29 = vunpack.i.h.bf16 %v4821_v33 }
 0x2b8   : > { %2053 = vmatpush.msra.mxu2 %v1952_v39  ;;  %2073 = vmatpush.msra.mxu3 %v1953_v36  ;;  %v1886_v36 = vsel %vm1884_vm8, %v3640_v12, %v3639_v34 }
 0x2ba   : > { %2054 = vmatpush.msra.mxu2 %v1919_v62  ;;  %2074 = vmatpush.msra.mxu3 %v1920_v23 }
 0x2bc   : > { %v3623_v18 = vpop.permute.xlu1 %3622  ;;  %2055 = vmatpush.msra.mxu2 %v1887_v45  ;;  %2075 = vmatpush.msra.mxu3 %v1888_v43  ;;  %v1853_v45 = vsel %vm1851_vm9, %v3650_v29, %v3649_v60 }
 0x2bd   : > { %v3625_v17 = vunpack.i.h.bf16 %v3623_v18  ;;  %v3624_v61 = vunpack.i.l.bf16 %v3623_v18  ;;  %v1875_v57 = vpop.permute.xlu2 %1874 }
 0x2be   : > { %v1885_v23 = vsel %vm1884_vm8, %v1875_v57, %v3640_v12 }
 0x2bf   : > { %v1854_v38 = vsel %vm1851_vm9, %v3649_v60, %v3624_v61  ;;  %v1855_v48 = vsel %vm1851_vm9, %v3624_v61, %v3625_v17 }
 0x2c0   : > { %2056 = vmatpush.msra.mxu2 %v1854_v38  ;;  %2076 = vmatpush.msra.mxu3 %v1855_v48 }
 0x2c2   : > { %2077 = vmatpush.msra.mxu3 %v4711_v56  ;;  %2057 = vmatpush.msra.mxu2 %v4726_v4  ;;  %v1950_v56 = vsel %vm1949_vm13, %v1940_v5, %v3630_v53  ;;  %v3726_v53 = vpack.i.bf16 0.0, %v4737_v8  ;;  %v3670_v5 = vunpack.i.h.bf16 %v4857_v3 }
 0x2c3   : > { %2013 = vmatpush.msra.mxu0 %v1950_v56 }
 0x2c4   : > { %v3633_v50 = vpop.permute.xlu1 %3632  ;;  %v1779_v35 = vsel %vm1777_vm11, %v3670_v5, %v3669_v28 }
 0x2c5   : > { %v3635_v31 = vunpack.i.h.bf16 %v3633_v50  ;;  %v3634_v30 = vunpack.i.l.bf16 %v3633_v50  ;;  %v1649_v50 = vpop.f32.mrf.mxu2 }
 0x2c7   : > { %v1814_v27 = vsel %vm1810_vm10, %v3634_v30, %v3635_v31  ;;  %v1678_v31 = vmul.f32 0.01, %v1649_v50 }
 0x2c8   : > { %2078 = vmatpush.msra.mxu3 %v1814_v27 }
 0x2cc   : > { %v3643_v54 = vpop.permute.xlu1 %3642 }
 0x2cd   : > { %v3645_v24 = vunpack.i.h.bf16 %v3643_v54  ;;  %v3644_v49 = vunpack.i.l.bf16 %v3643_v54  ;;  %v3706_v54 = vpack.i.bf16 0.0, %v4762_v14 }
 0x2cf   : > { %v1781_v4 = vsel %vm1777_vm11, %v3644_v49, %v3645_v24  ;;  %v1780_v58 = vsel %vm1777_vm11, %v3669_v28, %v3644_v49 }
 0x2d0   : > { %2079 = vmatpush.msra.mxu3 %v1781_v4 }
 0x2d4   : > { %v4845_v52 = vpop.permute.xlu1 %3652 }
 0x2d5   : > { %v3655_v32 = vunpack.i.h.bf16 %v4845_v52  ;;  %v3654_v10 = vunpack.i.l.bf16 %v4845_v52 }
 0x2d7   : > { %v1748_v63 = vsel %vm693_vm15, %v3654_v10, %v3655_v32 }
 0x2d8   : > { %2080 = vmatpush.msra.mxu3 %v1748_v63 }
 0x2da   : > { %2081 = vmatpush.msra.mxu3 %v1716_v7 }
 0x2dc   : > { %3277 = vmatpush.msk.msrb.mxu3 %vm227_vm0, %v3879_v2  ;;  %v4862_v19 = vpop.permute.xlu1 %3662 }
 0x2dd   : > { %v3664_v47 = vunpack.i.l.bf16 %v4862_v19  ;;  %v3665_v56 = vunpack.i.h.bf16 %v4862_v19 }
 0x2df   : > { %v1813_v37 = vsel %vm1810_vm10, %v3664_v47, %v3634_v30  ;;  %v1812_v4 = vsel %vm1810_vm10, %v3665_v56, %v3664_v47 }
 0x2e0   : > { %2058 = vmatpush.msra.mxu2 %v1813_v37 }
 0x2e2   : > { %2059 = vmatpush.msra.mxu2 %v1780_v58 }
 0x2e4   : > { %v3673_v0 = vpop.permute.xlu1 %3672 }
 0x2e5   : > { %v3675_v42 = vunpack.i.h.bf16 %v3673_v0  ;;  %v3674_v26 = vunpack.i.l.bf16 %v3673_v0 }
 0x2e7   : > { %v1918_v39 = vsel %vm520_vm5, %v3674_v26, %v3615_v22  ;;  %v1917_v62 = vsel %vm520_vm5, %v3675_v42, %v3674_v26  ;;  %v1629_v22 = vpop.f32.mrf.mxu1 }
 0x2e8   : > { %2034 = vmatpush.msra.mxu1 %v1918_v39  ;;  %2014 = vmatpush.msra.mxu0 %v1917_v62  ;;  %v1677_v34 = vmul.f32 0.01, %v1629_v22  ;;  %vm1673_vm13 = vcmp.ge.f32.partialorder %v1629_v22, 0.0  ;;  %v3595_v62 = vunpack.i.h.bf16 %v4780_v59 }
 0x2ea   : > { %2035 = vmatpush.msra.mxu1 %v1886_v36  ;;  %2015 = vmatpush.msra.mxu0 %v1885_v23  ;;  %v1681_v33 = vsel %vm1673_vm13, %v1629_v22, %v1677_v34  ;;  %vm2526_vm13 = vcmask 302080  }
 0x2eb   : > { %v4891_v61 = vmul.f32 %v4747_v11, %v1681_v33 }
 0x2ec   : > { %v4885_v43 = vpop.permute.xlu1 %3677  ;;  %2036 = vmatpush.msra.mxu1 %v1853_v45 }
 0x2ed   : > { %v3679_v28 = vunpack.i.l.bf16 %v4885_v43  ;;  %v3680_v26 = vunpack.i.h.bf16 %v4885_v43 }
 0x2ee   : > { %2037 = vmatpush.msra.mxu1 %v4750_v41 }
 0x2ef   : > { %v1715_v12 = vsel %vm1712_vm12, %v3679_v28, %v3659_v51  ;;  %v1714_v36 = vsel %vm1712_vm12, %v3680_v26, %v3679_v28 }
 0x2f0   : > { %2038 = vmatpush.msra.mxu1 %v1812_v4 }
 0x2f2   : > { %2039 = vmatpush.msra.mxu1 %v1779_v35 }
 0x2f4   : > { %v1842_v6 = vpop.permute.xlu1 %1841 }
 0x2f5   : > { %v1852_v9 = vsel %vm1851_vm9, %v1842_v6, %v3650_v29  ;;  %vm1674_vm9 = vcmp.ge.f32.partialorder %v1649_v50, 0.0 }
 0x2f6   : > { %2016 = vmatpush.msra.mxu0 %v1852_v9  ;;  %v1682_v30 = vsel %vm1674_vm9, %v1649_v50, %v1678_v31 }
 0x2f7   : > { %v4906_v27 = vmul.f32 %v4723_v44, %v1682_v30 }
 0x2f8   : > { %2017 = vmatpush.msra.mxu0 %v4762_v14 }
 0x2f9   : > { %v3741_v24 = vpack.i.bf16 %v4891_v61, %v4906_v27  ;;  %v3731_v49 = vpack.i.bf16 %v4750_v41, %v4906_v27  ;;  %v3711_v15 = vpack.i.bf16 %v4906_v27, %v5366_v13  ;;  %v3746_v41 = vpack.i.bf16 %v4737_v8, %v4906_v27 }
 0x330   : > { %v1609_v18 = vpop.f32.mrf.mxu0 }
 0x331   : > { %vm1672_vm8 = vcmp.ge.f32.partialorder %v1609_v18, 0.0  ;;  %v1676_v60 = vmul.f32 0.01, %v1609_v18 }
 0x333   : > { %v1680_v17 = vsel %vm1672_vm8, %v1609_v18, %v1676_v60 }
 0x334   : > { %v4894_v38 = vmul.f32 %v4759_v40, %v1680_v17 }
 0x336   : > { %v3691_v48 = vpack.i.bf16 %v4894_v38, %v4891_v61  ;;  %v3766_v14 = vpack.i.bf16 0.0, %v4894_v38 }
 0x338   : > { %3692 = vrot.lane.b32.xlu2 %v3691_v48, %s3883_s16  ;;  %3682 = vrot.lane.b32.xlu0 %v3691_v48, %s3887_s24 }
 0x339   : > { %3687 = vrot.lane.b32.xlu1 %v3691_v48, %s3882_s15 }
 0x340   : > { %3702 = vrot.lane.b32.xlu2 %v3691_v48, %s3880_s13  ;;  %3697 = vrot.lane.b32.xlu0 %v3691_v48, %s3885_s21 }
 0x341   : > { %1800 = vrot.lane.b32.xlu1 %v5366_v13, %s3894_s6 }
 0x348   : > { %3727 = vrot.lane.b32.xlu2 %v3726_v53, %s3881_s14  ;;  %3707 = vrot.lane.b32.xlu0 %v3706_v54, %s3885_s21  ;;  %v1962_v54 = vld [vmem:[%s5354_s2 + $0x18] sm:$0xff] }
 0x349   : > { %3742 = vrot.lane.b32.xlu1 %v3741_v24, %s3884_s17  ;;  %3225 = vmatmul.msk.f32.vlgmr.msra.gmra.mxu3 %vm780_vm7, %v1962_v54 }
 0x350   : > { %3732 = vrot.lane.b32.xlu2 %v3731_v49, %s3885_s21  ;;  %3712 = vrot.lane.b32.xlu0 %v3711_v15, %s3882_s15 }
 0x351   : > { %1767 = vrot.lane.b32.xlu1 %v5366_v13, %s3892_s29 }
 0x358   : > { %2112 = vrot.lane.b32.xlu2 %v4891_v61, %s3886_s22  ;;  %3717 = vrot.lane.b32.xlu0 %v3726_v53, %s3885_s21 }
 0x359   : > { %2244 = vrot.lane.b32.xlu1 %v4894_v38, %s3881_s14 }
 0x360   : > { %3747 = vrot.lane.b32.xlu2 %v3746_v41, %s3883_s16  ;;  %3722 = vrot.lane.b32.xlu0 %v3726_v53, %s3884_s17 }
 0x361   : > { %2172 = vrot.lane.b32.xlu1 %v5366_v13, %s3883_s16 }
 0x368   : > { %3762 = vrot.lane.b32.xlu2 %v3746_v41, %s3886_s22  ;;  %3737 = vrot.lane.b32.xlu0 %v3746_v41, %s3887_s24 }
 0x370   : > { %1702 = vrot.lane.b32.xlu2 %v5366_v13, %s3890_s11  ;;  %3752 = vrot.lane.b32.xlu0 %v3741_v24, %s3881_s14  ;;  %s5331_s14 = scalar_lea.vmem %s5357_s5, %s3252_s20 }
 0x378   : > { %3767 = vrot.lane.b32.xlu2 %v3766_v14, %s3886_s22  ;;  %3757 = vrot.lane.b32.xlu0 %v3746_v41, %s3880_s13  ;;  %s3895_s22 = smov 101  }
 0x380   : > { %2276 = vrot.lane.b32.xlu0 %v4894_v38, %s3884_s17 }
 0x388   : > { %2204 = vrot.lane.b32.xlu0 %v5366_v13, %s3887_s24  ;;  %s3896_s24 = smov 91  }
 0x390   : > { %2140 = vrot.lane.b32.xlu0 %v5366_v13, %s3880_s13 }
 0x392   : > { %v4956_v32 = vpop.permute.xlu2 %3692 }
 0x39a   : > { %v4958_v63 = vpop.permute.xlu2 %3702 }
 0x3a2   : > { %v4960_v7 = vpop.permute.xlu2 %3727 }
 0x3aa   : > { %v4962_v3 = vpop.permute.xlu2 %3732  ;;  %v4964_v19 = vpop.permute.xlu0 %3682 }
 0x3ab   : > { %v3735_v47 = vunpack.i.h.bf16 %v4962_v3  ;;  %v4968_v37 = vpop.permute.xlu1 %3687  ;;  %v3734_v33 = vunpack.i.l.bf16 %v4962_v3 }
 0x3ac   : > { %v3689_v43 = vunpack.i.l.bf16 %v4968_v37  ;;  %v3690_v49 = vunpack.i.h.bf16 %v4968_v37 }
 0x3ad   : > { %v1747_v58 = vsel %vm693_vm15, %v3735_v47, %v3654_v10 }
 0x3ae   : > { %2060 = vmatpush.msra.mxu2 %v1747_v58  ;;  %v2350_v28 = vsel %vm726_vm14, %v3690_v49, %v3689_v43  ;;  %v3730_v58 = vunpack.i.h.bf16 %v4960_v7 }
 0x3b0   : > { %2061 = vmatpush.msra.mxu2 %v1715_v12  ;;  %v3729_v12 = vunpack.i.l.bf16 %v4960_v7 }
 0x3b1   : > { %3224 = vmatmul.msk.f32.vlgmr.msra.gmra.mxu2 %vm780_vm7, %v1962_v54 }
 0x3b2   : > { %3276 = vmatpush.msk.msrb.mxu2 %vm227_vm0, %v3879_v2  ;;  %v4979_v0 = vpop.permute.xlu2 %2112  ;;  %v3698_v57 = vpop.permute.xlu0 %3697 }
 0x3b3   : > { %v1801_v29 = vpop.permute.xlu1 %1800  ;;  %v3699_v9 = vunpack.i.l.bf16 %v3698_v57  ;;  %v3700_v4 = vunpack.i.h.bf16 %v3698_v57 }
 0x3b4   : > { %v1811_v42 = vsel %vm1810_vm10, %v1801_v29, %v3665_v56  ;;  %vm2665_vm10 = vcmask 1006592  }
 0x3b5   : > { %2018 = vmatpush.msra.mxu0 %v1811_v42  ;;  %v2319_v53 = vsel %vm693_vm15, %v3699_v9, %v3734_v33 }
 0x3ba   : > { %v4982_v52 = vpop.permute.xlu2 %3747  ;;  %v3708_v10 = vpop.permute.xlu0 %3707 }
 0x3bb   : > { %v3709_v46 = vunpack.i.l.bf16 %v3708_v10  ;;  %v4985_v39 = vpop.permute.xlu1 %3742  ;;  %v3710_v23 = vunpack.i.h.bf16 %v3708_v10 }
 0x3bc   : > { %v3745_v60 = vunpack.i.h.bf16 %v4985_v39  ;;  %v3744_v48 = vunpack.i.l.bf16 %v4985_v39 }
 0x3bd   : > { %v1746_v51 = vsel %vm693_vm15, %v3709_v46, %v3735_v47  ;;  %v1745_v30 = vsel %vm693_vm15, %v3710_v23, %v3709_v46  ;;  %v2318_v47 = vsel %vm693_vm15, %v3700_v4, %v3699_v9 }
 0x3be   : > { %2040 = vmatpush.msra.mxu1 %v1746_v51  ;;  %v2287_v24 = vsel %vm660_vm1, %v3745_v60, %v3744_v48  ;;  %v3750_v51 = vunpack.i.h.bf16 %v4982_v52 }
 0x3c0   : > { %2041 = vmatpush.msra.mxu1 %v1714_v36  ;;  %v3749_v36 = vunpack.i.l.bf16 %v4982_v52  ;;  %v3695_v52 = vunpack.i.h.bf16 %v4956_v32 }
 0x3c1   : > { %3223 = vmatmul.msk.f32.vlgmr.msra.gmra.mxu1 %vm780_vm7, %v1962_v54 }
 0x3c2   : > { %3275 = vmatpush.msk.msrb.mxu1 %vm227_vm0, %v3879_v2  ;;  %v4993_v45 = vpop.permute.xlu2 %3762  ;;  %v3713_v6 = vpop.permute.xlu0 %3712 }
 0x3c3   : > { %v3715_v22 = vunpack.i.h.bf16 %v3713_v6  ;;  %v3714_v34 = vunpack.i.l.bf16 %v3713_v6  ;;  %v1768_v18 = vpop.permute.xlu1 %1767  ;;  %v2185_v6 = vsel %vm553_vm4, %v3749_v36, %v3750_v51  ;;  %v3765_v49 = vunpack.i.h.bf16 %v4993_v45 }
 0x3c4   : > { %v1778_v17 = vsel %vm1777_vm11, %v1768_v18, %v3670_v5  ;;  %v3684_v18 = vunpack.i.l.bf16 %v4964_v19  ;;  %vm2624_vm11 = vcmask 39936  }
 0x3c5   : > { %2019 = vmatpush.msra.mxu0 %v1778_v17  ;;  %v2351_v59 = vsel %vm726_vm14, %v3689_v43, %v3715_v22  ;;  %v2352_v50 = vsel %vm726_vm14, %v3715_v22, %v3595_v62  ;;  %v2353_v31 = vsel %vm726_vm14, %v3595_v62, %v3714_v34  ;;  %v3685_v34 = vunpack.i.h.bf16 %v4964_v19 }
 0x3c6   : > { %2433 = vmatpush.msrb.mxu1 %v2351_v59  ;;  %2453 = vmatpush.msrb.mxu2 %v2352_v50  ;;  %v3694_v17 = vunpack.i.l.bf16 %v4956_v32  ;;  %v3705_v59 = vunpack.i.h.bf16 %v4958_v63  ;;  %v3704_v50 = vunpack.i.l.bf16 %v4958_v63 }
 0x3c7   : > { %2020 = vmatpush.msra.mxu0 %v1745_v30  ;;  %2473 = vmatpush.msrb.mxu3 %v2353_v31  ;;  %v2215_v19 = vsel %vm586_vm3, %v3685_v34, %v3684_v18 }
 0x3c8   : > { %2434 = vmatpush.msrb.mxu1 %v2319_v53  ;;  %v2183_v32 = vsel %vm553_vm4, %v3695_v52, %v3694_v17  ;;  %v2184_v53 = vsel %vm553_vm4, %v3694_v17, %v3749_v36  ;;  %v2151_v63 = vsel %vm520_vm5, %v3705_v59, %v3704_v50 }
 0x3ca   : > { %v1703_v15 = vpop.permute.xlu2 %1702  ;;  %v3718_v41 = vpop.permute.xlu0 %3717  ;;  %2435 = vmatpush.msrb.mxu1 %v2287_v24 }
 0x3cb   : > { %v3720_v14 = vunpack.i.h.bf16 %v3718_v41  ;;  %v3719_v5 = vunpack.i.l.bf16 %v3718_v41  ;;  %v1713_v56 = vsel %vm1712_vm12, %v1703_v15, %v3680_v26  ;;  %v2257_v26 = vsel %vm627_vm2, %v3729_v12, %v3730_v58 }
 0x3cc   : > { %2021 = vmatpush.msra.mxu0 %v1713_v56  ;;  %v2245_v56 = vpop.permute.xlu1 %2244  ;;  %vm2591_vm12 = vcmask 220160  }
 0x3cd   : > { %v2320_v35 = vsel %vm693_vm15, %v3734_v33, %v3719_v5  ;;  %v2321_v3 = vsel %vm693_vm15, %v3719_v5, %v3720_v14  ;;  %3222 = vmatmul.msk.f32.vlgmr.msra.gmra.mxu0 %vm780_vm7, %v1962_v54  ;;  %v3764_v54 = vunpack.i.l.bf16 %v4993_v45  ;;  %v2362_v14 = vld [vmem:[%s5354_s2 + $0x20] sm:$0xff] }
 0x3ce   : > { %3274 = vmatpush.msk.msrb.mxu0 %vm227_vm0, %v3879_v2  ;;  %2454 = vmatpush.msrb.mxu2 %v2320_v35 }
 0x3cf   : > { %2474 = vmatpush.msrb.mxu3 %v2321_v3  ;;  %v2120_v45 = vsel %vm487_vm6, %v4979_v0, %v3764_v54  ;;  %v2121_v4 = vsel %vm487_vm6, %v3764_v54, %v3765_v49 }
 0x3d0   : > { %2413 = vmatpush.msrb.mxu0 %v2350_v28 }
 0x3d2   : > { %2414 = vmatpush.msrb.mxu0 %v2318_v47  ;;  %v3723_v37 = vpop.permute.xlu0 %3722 }
 0x3d3   : > { %v3725_v57 = vunpack.i.h.bf16 %v3723_v37  ;;  %v3724_v29 = vunpack.i.l.bf16 %v3723_v37 }
 0x3d4   : > { %v2173_v39 = vpop.permute.xlu1 %2172 }
 0x3d5   : > { %v2288_v42 = vsel %vm660_vm1, %v3744_v48, %v3724_v29  ;;  %v2289_v10 = vsel %vm660_vm1, %v3724_v29, %v3725_v57  ;;  %v3768_v48 = vpop.permute.xlu2 %3767  ;;  %v2182_v47 = vsel %vm553_vm4, %v2173_v39, %v3695_v52  ;;  %v5088_v29 = vpop.f32.mrf.mxu3  ;;  %vm2763_vm4 = vcmask 744448  }
 0x3d6   : > { %2455 = vmatpush.msrb.mxu2 %v2288_v42  ;;  %2475 = vmatpush.msrb.mxu3 %v2289_v10  ;;  %v3770_v37 = vunpack.i.h.bf16 %v3768_v48 }
 0x3d8   : > { %2476 = vmatpush.msrb.mxu3 %v2257_v26 }
 0x3da   : > { %v3738_v46 = vpop.permute.xlu0 %3737  ;;  %2477 = vmatpush.msrb.mxu3 %v4737_v8 }
 0x3db   : > { %v3740_v62 = vunpack.i.h.bf16 %v3738_v46  ;;  %v3739_v7 = vunpack.i.l.bf16 %v3738_v46 }
 0x3dd   : > { %v2217_v23 = vsel %vm586_vm3, %v3739_v7, %v3740_v62  ;;  %v2216_v31 = vsel %vm586_vm3, %v3684_v18, %v3739_v7 }
 0x3de   : > { %2478 = vmatpush.msrb.mxu3 %v2217_v23 }
 0x3e0   : > { %2479 = vmatpush.msrb.mxu3 %v2185_v6 }
 0x3e2   : > { %v3753_v43 = vpop.permute.xlu0 %3752 }
 0x3e3   : > { %v3755_v9 = vunpack.i.h.bf16 %v3753_v43  ;;  %v3754_v22 = vunpack.i.l.bf16 %v3753_v43 }
 0x3e5   : > { %v2255_v8 = vsel %vm627_vm2, %v3755_v9, %v3754_v22  ;;  %v2256_v33 = vsel %vm627_vm2, %v3754_v22, %v3729_v12 }
 0x3e6   : > { %2436 = vmatpush.msrb.mxu1 %v2255_v8  ;;  %2456 = vmatpush.msrb.mxu2 %v2256_v33 }
 0x3e8   : > { %2437 = vmatpush.msrb.mxu1 %v4891_v61  ;;  %2457 = vmatpush.msrb.mxu2 %v4906_v27  ;;  %v3769_v61 = vunpack.i.l.bf16 %v3768_v48 }
 0x3ea   : > { %v3758_v30 = vpop.permute.xlu0 %3757  ;;  %2438 = vmatpush.msrb.mxu1 %v2215_v19  ;;  %2458 = vmatpush.msrb.mxu2 %v2216_v31  ;;  %v2119_v5 = vsel %vm487_vm6, %v3769_v61, %v4979_v0  ;;  %v2254_v0 = vsel %vm627_vm2, %v2245_v56, %v3755_v9  ;;  %v2118_v57 = vsel %vm487_vm6, %v3770_v37, %v3769_v61  ;;  %vm2698_vm6 = vcmask 826368  }
 0x3eb   : > { %v3760_v24 = vunpack.i.h.bf16 %v3758_v30  ;;  %v3759_v27 = vunpack.i.l.bf16 %v3758_v30 }
 0x3ec   : > { %2439 = vmatpush.msrb.mxu1 %v2183_v32  ;;  %2459 = vmatpush.msrb.mxu2 %v2184_v53 }
 0x3ed   : > { %v2152_v15 = vsel %vm520_vm5, %v3704_v50, %v3759_v27  ;;  %v2153_v41 = vsel %vm520_vm5, %v3759_v27, %v3760_v24 }
 0x3ee   : > { %2440 = vmatpush.msrb.mxu1 %v2151_v63  ;;  %2460 = vmatpush.msrb.mxu2 %v2152_v15 }
 0x3ef   : > { %2480 = vmatpush.msrb.mxu3 %v2153_v41 }
 0x3f0   : > { %2441 = vmatpush.msrb.mxu1 %v2119_v5  ;;  %2461 = vmatpush.msrb.mxu2 %v2120_v45 }
 0x3f1   : > { %2481 = vmatpush.msrb.mxu3 %v2121_v4  ;;  %3227 = vmatmul.msk.f32.vlgmr.msrb.gmra.mxu1 %vm780_vm7, %v2362_v14 }
 0x3f2   : > { %3228 = vmatmul.msk.f32.vlgmr.msrb.gmra.mxu2 %vm780_vm7, %v2362_v14  ;;  %3229 = vmatmul.msk.f32.vlgmr.msrb.gmra.mxu3 %vm780_vm7, %v2362_v14  ;;  %v2277_v35 = vpop.permute.xlu0 %2276 }
 0x3f3   : > { %v2286_v3 = vsel %vm660_vm1, %v2277_v35, %v3745_v60  ;;  %3280 = vmatpush.msk.msra.mxu2 %vm227_vm0, %v3879_v2  ;;  %3281 = vmatpush.msk.msra.mxu3 %vm227_vm0, %v3879_v2 }
 0x3f4   : > { %2415 = vmatpush.msrb.mxu0 %v2286_v3  ;;  %3279 = vmatpush.msk.msra.mxu1 %vm227_vm0, %v3879_v2 }
 0x3f6   : > { %2416 = vmatpush.msrb.mxu0 %v2254_v0 }
 0x3f8   : > { %2417 = vmatpush.msrb.mxu0 %v4894_v38 }
 0x3fa   : > { %v2205_v60 = vpop.permute.xlu0 %2204 }
 0x3fb   : > { %v2214_v28 = vsel %vm586_vm3, %v2205_v60, %v3685_v34 }
 0x3fc   : > { %2418 = vmatpush.msrb.mxu0 %v2214_v28 }
 0x3fe   : > { %2419 = vmatpush.msrb.mxu0 %v2182_v47 }
 0x402   : > { %v2141_v58 = vpop.permute.xlu0 %2140 }
 0x403   : > { %v2150_v12 = vsel %vm520_vm5, %v2141_v58, %v3705_v59 }
 0x404   : > { %2420 = vmatpush.msrb.mxu0 %v2150_v12 }
 0x406   : > { %2421 = vmatpush.msrb.mxu0 %v2118_v57 }
 0x407   : > { %3226 = vmatmul.msk.f32.vlgmr.msrb.gmra.mxu0 %vm780_vm7, %v2362_v14 }
 0x408   : > { %3278 = vmatpush.msk.msra.mxu0 %vm227_vm0, %v3879_v2 }
 0x434   : > { %v5090_v42 = vpop.f32.mrf.mxu2 }
 0x43e   : > { %v5086_v38 = vpop.f32.mrf.mxu1 }
 0x46e   : > { %v2443_v10 = vpop.f32.mrf.mxu1 }
 0x46f   : > { %vm2487_vm14 = vcmp.ge.f32.partialorder %v2443_v10, 0.0  ;;  %v2491_v26 = vmul.f32 0.01, %v2443_v10 }
 0x471   : > { %v2495_v46 = vsel %vm2487_vm14, %v2443_v10, %v2491_v26 }
 0x472   : > { %v5093_v51 = vmul.f32 %v4747_v11, %v2495_v46  ;;  %v5102_v11 = vpop.f32.mrf.mxu0 }
 0x474   : > { %v3786_v36 = vpack.i.bf16 %v5093_v51, %v5366_v13 }
 0x475   : > { %v2483_v62 = vpop.f32.mrf.mxu3  ;;  %v2463_v7 = vpop.f32.mrf.mxu2 }
 0x476   : > { %vm2489_vm1 = vcmp.ge.f32.partialorder %v2483_v62, 0.0  ;;  %v2493_v23 = vmul.f32 0.01, %v2483_v62  ;;  %3787 = vrot.lane.b32.xlu0 %v3786_v36, %s3895_s22  ;;  %3782 = vrot.lane.b32.xlu1 %v3786_v36, %s3885_s21  ;;  %v2492_v43 = vmul.f32 0.01, %v2463_v7  ;;  %vm2488_vm2 = vcmp.ge.f32.partialorder %v2463_v7, 0.0 }
 0x478   : > { %v2497_v6 = vsel %vm2489_vm1, %v2483_v62, %v2493_v23  ;;  %v2496_v34 = vsel %vm2488_vm2, %v2463_v7, %v2492_v43 }
 0x479   : > { %v5100_v9 = vmul.f32 %v4708_v55, %v2497_v6  ;;  %v5107_v18 = vmul.f32 %v4723_v44, %v2496_v34 }
 0x47b   : > { %v3806_v22 = vpack.i.bf16 0.0, %v5100_v9  ;;  %v3826_v33 = vpack.i.bf16 %v5107_v18, %v5093_v51  ;;  %v3821_v55 = vpack.i.bf16 %v5100_v9, %v5107_v18  ;;  %v3836_v59 = vpack.i.bf16 0.0, %v5107_v18 }
 0x47e   : > { %3807 = vrot.lane.b32.xlu0 %v3806_v22, %s3885_s21  ;;  %3802 = vrot.lane.b32.xlu1 %v3806_v22, %s3896_s24 }
 0x484   : > { %v2423_v8 = vpop.f32.mrf.mxu0 }
 0x485   : > { %vm2486_vm3 = vcmp.ge.f32.partialorder %v2423_v8, 0.0  ;;  %v2490_v52 = vmul.f32 0.01, %v2423_v8 }
 0x486   : > { %3827 = vrot.lane.b32.xlu0 %v3826_v33, %s3897_s7  ;;  %3822 = vrot.lane.b32.xlu1 %v3821_v55, %s3898_s8 }
 0x487   : > { %v2494_v17 = vsel %vm2486_vm3, %v2423_v8, %v2490_v52 }
 0x488   : > { %v5114_v48 = vmul.f32 %v4759_v40, %v2494_v17 }
 0x48a   : > { %v3771_v44 = vpack.i.bf16 %v5114_v48, %v5366_v13  ;;  %v3791_v50 = vpack.i.bf16 %v5093_v51, %v5114_v48 }
 0x48c   : > { %3772 = vrot.lane.b32.xlu2 %v3771_v44, %s3898_s8 }
 0x48e   : > { %3837 = vrot.lane.b32.xlu0 %v3836_v59, %s3899_s9  ;;  %3832 = vrot.lane.b32.xlu1 %v3806_v22, %s3897_s7 }
 0x494   : > { %3777 = vrot.lane.b32.xlu2 %v3786_v36, %s3896_s24 }
 0x496   : > { %2557 = vrot.lane.b32.xlu0 %v5107_v18, %s3880_s13  ;;  %2755 = vrot.lane.b32.xlu1 %v5107_v18, %s3896_s24 }
 0x49c   : > { %3792 = vrot.lane.b32.xlu2 %v3791_v50, %s3899_s9 }
 0x49e   : > { %2524 = vrot.lane.b32.xlu0 %v5107_v18, %s3900_s10  ;;  %2723 = vrot.lane.b32.xlu1 %v5107_v18, %s3885_s21 }
 0x4a4   : > { %3797 = vrot.lane.b32.xlu2 %v3791_v50, %s3880_s13 }
 0x4a6   : > { %2616 = vrot.lane.b32.xlu0 %v5114_v48, %s3897_s7  ;;  %2690 = vrot.lane.b32.xlu1 %v5107_v18, %s3895_s22 }
 0x4ac   : > { %3812 = vrot.lane.b32.xlu2 %v3806_v22, %s3895_s22 }
 0x4ae   : > { %3847 = vrot.lane.b32.xlu0 %v5366_v13, %s3900_s10  ;;  %2583 = vrot.lane.b32.xlu1 %v5366_v13, %s3899_s9 }
 0x4b4   : > { %3817 = vrot.lane.b32.xlu2 %v3791_v50, %s3900_s10 }
 0x4bc   : > { %2657 = vrot.lane.b32.xlu2 %v5093_v51, %s3898_s8 }
 0x4c4   : > { %3842 = vrot.lane.b32.xlu2 %v5366_v13, %s3880_s13 }
 0x4e6   : > { %v5137_v40 = vpop.permute.xlu2 %3772 }
 0x4e7   : > { %v3774_v62 = vunpack.i.l.bf16 %v5137_v40 }
 0x4e8   : > { %v5139_v19 = vpop.permute.xlu0 %3787  ;;  %v5141_v31 = vpop.permute.xlu1 %3782 }
 0x4e9   : > { %v3784_v13 = vunpack.i.l.bf16 %v5141_v31  ;;  %v3789_v39 = vunpack.i.l.bf16 %v5139_v19  ;;  %v3785_v52 = vunpack.i.h.bf16 %v5141_v31 }
 0x4ee   : > { %v3778_v30 = vpop.permute.xlu2 %3777 }
 0x4ef   : > { %v3779_v32 = vunpack.i.l.bf16 %v3778_v30  ;;  %v3780_v60 = vunpack.i.h.bf16 %v3778_v30 }
 0x4f0   : > { %v5143_v53 = vpop.permute.xlu0 %3807  ;;  %v3803_v54 = vpop.permute.xlu1 %3802 }
 0x4f1   : > { %v3810_v61 = vunpack.i.h.bf16 %v5143_v53  ;;  %v3809_v24 = vunpack.i.l.bf16 %v5143_v53  ;;  %v3805_v27 = vunpack.i.h.bf16 %v3803_v54  ;;  %v3804_v49 = vunpack.i.l.bf16 %v3803_v54 }
 0x4f3   : > { %v2766_v63 = vsel %vm2763_vm4, %v3804_v49, %v3805_v27  ;;  %v2767_v15 = vsel %vm2763_vm4, %v3805_v27, %v3779_v32  ;;  %v2733_v41 = vsel %vm693_vm15, %v3809_v24, %v3810_v61  ;;  %v2734_v14 = vsel %vm693_vm15, %v3810_v61, %v3784_v13 }
 0x4f4   : > { %2867 = vmatpush.msra.mxu2 %v2766_v63  ;;  %2887 = vmatpush.msra.mxu3 %v2767_v15 }
 0x4f6   : > { %2868 = vmatpush.msra.mxu2 %v2733_v41  ;;  %v5154_v5 = vpop.permute.xlu2 %3792  ;;  %2888 = vmatpush.msra.mxu3 %v2734_v14  ;;  %v3790_v41 = vunpack.i.h.bf16 %v5139_v19 }
 0x4f7   : > { %v3795_v34 = vunpack.i.h.bf16 %v5154_v5  ;;  %v3794_v8 = vunpack.i.l.bf16 %v5154_v5  ;;  %v3862_v5 = vld [vmem:[%s3956_s23 + $0x18] sm:$0xff] }
 0x4f8   : > { %v5156_v45 = vpop.permute.xlu0 %3827  ;;  %v5158_v56 = vpop.permute.xlu1 %3822 }
 0x4f9   : > { %v3825_v37 = vunpack.i.h.bf16 %v5158_v56  ;;  %v3824_v58 = vunpack.i.l.bf16 %v5158_v56  ;;  %v3830_v7 = vunpack.i.h.bf16 %v5156_v45  ;;  %v3829_v23 = vunpack.i.l.bf16 %v5156_v45 }
 0x4fa   : > { %v2594_v61 = vsel %vm2591_vm12, %v3794_v8, %v3795_v34 }
 0x4fb   : > { %v2668_v43 = vsel %vm2665_vm10, %v3824_v58, %v3825_v37  ;;  %v2669_v22 = vsel %vm2665_vm10, %v3825_v37, %v3774_v62  ;;  %v2627_v30 = vsel %vm2624_vm11, %v3829_v23, %v3830_v7  ;;  %v3859_v62 = vld [vmem:[%s3956_s23 + $0x30] sm:$0xff] }
 0x4fe   : > { %v5160_v4 = vpop.permute.xlu2 %3797 }
 0x4ff   : > { %v3800_v17 = vunpack.i.h.bf16 %v5160_v4  ;;  %v3799_v44 = vunpack.i.l.bf16 %v5160_v4  ;;  %v3863_v4 = vld [vmem:[%s3956_s23 + $0x60] sm:$0xff] }
 0x500   : > { %v5162_v35 = vpop.permute.xlu0 %3837  ;;  %v5164_v3 = vpop.permute.xlu1 %3832 }
 0x501   : > { %v3834_v6 = vunpack.i.l.bf16 %v5164_v3  ;;  %v3839_v33 = vunpack.i.l.bf16 %v5162_v35  ;;  %v2561_v53 = vsel %vm520_vm5, %v3799_v44, %v3800_v17  ;;  %v3840_v56 = vunpack.i.h.bf16 %v5162_v35 }
 0x503   : > { %v2628_v32 = vsel %vm2624_vm11, %v3830_v7, %v3834_v6  ;;  %v2595_v27 = vsel %vm2591_vm12, %v3795_v34, %v3839_v33 }
 0x506   : > { %v5166_v0 = vpop.permute.xlu2 %3812 }
 0x507   : > { %v3815_v28 = vunpack.i.h.bf16 %v5166_v0  ;;  %v3814_v47 = vunpack.i.l.bf16 %v5166_v0  ;;  %v3835_v0 = vunpack.i.h.bf16 %v5164_v3 }
 0x508   : > { %v2558_v12 = vpop.permute.xlu0 %2557  ;;  %v2756_v57 = vpop.permute.xlu1 %2755 }
 0x509   : > { %v2764_v10 = vsel %vm2763_vm4, %v3780_v60, %v2756_v57  ;;  %v2765_v26 = vsel %vm2763_vm4, %v2756_v57, %v3804_v49  ;;  %v2701_v46 = vsel %vm2698_vm6, %v3814_v47, %v3815_v28  ;;  %v2702_v36 = vsel %vm2698_vm6, %v3815_v28, %v3789_v39  ;;  %v5218_v49 = vld [vmem:[%s5354_s2 + $0x28] sm:$0xff]  ;;  %v3857_v57 = vld [vmem:[%s3956_s23 + $0x50] sm:$0xff] }
 0x50a   : > { %2827 = vmatpush.msra.mxu0 %v2764_v10  ;;  %2847 = vmatpush.msra.mxu1 %v2765_v26  ;;  %v3775_v60 = vunpack.i.h.bf16 %v5137_v40  ;;  %v3855_v40 = vld [vmem:[%s3956_s23 + $0x70] sm:$0xff] }
 0x50b   : > { %2869 = vmatpush.msra.mxu2 %v2701_v46  ;;  %2889 = vmatpush.msra.mxu3 %v2702_v36  ;;  %v3858_v36 = vld [vmem:[%s3956_s23 + $0x58] sm:$0xff] }
 0x50d   : > { %2870 = vmatpush.msra.mxu2 %v2668_v43  ;;  %2890 = vmatpush.msra.mxu3 %v2669_v22  ;;  %v3860_v43 = vld [vmem:[%s3956_s23 + $0x38] sm:$0xff] }
 0x50e   : > { %v5190_v55 = vpop.permute.xlu2 %3817 }
 0x50f   : > { %2871 = vmatpush.msra.mxu2 %v5107_v18  ;;  %2891 = vmatpush.msra.mxu3 %v5100_v9  ;;  %v3820_v18 = vunpack.i.h.bf16 %v5190_v55  ;;  %v3819_v54 = vunpack.i.l.bf16 %v5190_v55  ;;  %v3864_v55 = vld [vmem:[%s3956_s23 + $0x68] sm:$0xff] }
 0x510   : > { %v2525_v59 = vpop.permute.xlu0 %2524  ;;  %v2724_v50 = vpop.permute.xlu1 %2723 }
 0x511   : > { %2872 = vmatpush.msra.mxu2 %v2627_v30  ;;  %2892 = vmatpush.msra.mxu3 %v2628_v32  ;;  %v2731_v31 = vsel %vm693_vm15, %v3785_v52, %v2724_v50  ;;  %v2732_v9 = vsel %vm693_vm15, %v2724_v50, %v3809_v24  ;;  %v2562_v24 = vsel %vm520_vm5, %v3800_v17, %v2558_v12  ;;  %v3865_v52 = vld [vmem:[%s3956_s23 + $0x40] sm:$0xff]  ;;  %v3866_v17 = vld [vmem:[%s3956_s23 + $0x48] sm:$0xff] }
 0x512   : > { %2828 = vmatpush.msra.mxu0 %v2731_v31  ;;  %2848 = vmatpush.msra.mxu1 %v2732_v9  ;;  %v2529_v63 = vsel %vm2526_vm13, %v3819_v54, %v3820_v18  ;;  %v2530_v15 = vsel %vm2526_vm13, %v3820_v18, %v2525_v59  ;;  %v3868_v59 = vld [vmem:[%s3956_s23 + $0x28] sm:$0xff]  ;;  %v3869_v50 = vld [vmem:[%s3956_s23] sm:$0xff] }
 0x513   : > { %2873 = vmatpush.msra.mxu2 %v2594_v61  ;;  %2893 = vmatpush.msra.mxu3 %v2595_v27  ;;  %v3870_v30 = vld [vmem:[%s3956_s23 + $0x8] sm:$0xff] }
 0x515   : > { %2874 = vmatpush.msra.mxu2 %v2561_v53  ;;  %2894 = vmatpush.msra.mxu3 %v2562_v24 }
 0x516   : > { %v2658_v13 = vpop.permute.xlu2 %2657 }
 0x517   : > { %2875 = vmatpush.msra.mxu2 %v2529_v63  ;;  %2895 = vmatpush.msra.mxu3 %v2530_v15  ;;  %v2666_v37 = vsel %vm2665_vm10, %v3775_v60, %v2658_v13  ;;  %v2667_v12 = vsel %vm2665_vm10, %v2658_v13, %v3824_v58 }
 0x518   : > { %3232 = vmatmul.msk.f32.vlgmr.msra.gmra.mxu2 %vm780_vm7, %v5218_v49  ;;  %3233 = vmatmul.msk.f32.vlgmr.msra.gmra.mxu3 %vm780_vm7, %v5218_v49  ;;  %v2617_v14 = vpop.permute.xlu0 %2616  ;;  %v2691_v39 = vpop.permute.xlu1 %2690 }
 0x519   : > { %v2699_v28 = vsel %vm2698_vm6, %v3790_v41, %v2691_v39  ;;  %v2700_v19 = vsel %vm2698_vm6, %v2691_v39, %v3814_v47  ;;  %3284 = vmatpush.msk.msrb.mxu2 %vm227_vm0, %v3879_v2  ;;  %3285 = vmatpush.msk.msrb.mxu3 %vm227_vm0, %v3879_v2  ;;  %v3856_v47 = vld [vmem:[%s3956_s23 + $0x78] sm:$0xff]  ;;  %v2625_v46 = vsel %vm2624_vm11, %v3835_v0, %v2617_v14 }
 0x51a   : > { %2829 = vmatpush.msra.mxu0 %v2699_v28  ;;  %2849 = vmatpush.msra.mxu1 %v2700_v19  ;;  %v2626_v3 = vsel %vm2624_vm11, %v2617_v14, %v3829_v23  ;;  %v3861_v23 = vld [vmem:[%s3956_s23 + $0x10] sm:$0xff] }
 0x51b   : > { %3020 = vmatpush.msrb.mxu2 %v3855_v40  ;;  %3049 = vmatpush.msrb.mxu3 %v3856_v47 }
 0x51c   : > { %2830 = vmatpush.msra.mxu0 %v2666_v37  ;;  %2850 = vmatpush.msra.mxu1 %v2667_v12 }
 0x51d   : > { %3021 = vmatpush.msrb.mxu2 %v3857_v57  ;;  %3050 = vmatpush.msrb.mxu3 %v3858_v36 }
 0x51e   : > { %v3843_v10 = vpop.permute.xlu2 %3842  ;;  %2831 = vmatpush.msra.mxu0 %v5114_v48  ;;  %2851 = vmatpush.msra.mxu1 %v5093_v51 }
 0x51f   : > { %v3845_v58 = vunpack.i.h.bf16 %v3843_v10  ;;  %v3844_v26 = vunpack.i.l.bf16 %v3843_v10  ;;  %3022 = vmatpush.msrb.mxu2 %v3859_v62  ;;  %3051 = vmatpush.msrb.mxu3 %v3860_v43 }
 0x520   : > { %v3848_v35 = vpop.permute.xlu0 %3847  ;;  %v2584_v7 = vpop.permute.xlu1 %2583  ;;  %2832 = vmatpush.msra.mxu0 %v2625_v46  ;;  %2852 = vmatpush.msra.mxu1 %v2626_v3 }
 0x521   : > { %v3850_v51 = vunpack.i.h.bf16 %v3848_v35  ;;  %v3849_v48 = vunpack.i.l.bf16 %v3848_v35  ;;  %v2592_v6 = vsel %vm2591_vm12, %v3840_v56, %v2584_v7  ;;  %v2593_v45 = vsel %vm2591_vm12, %v2584_v7, %v3794_v8  ;;  %3023 = vmatpush.msrb.mxu2 %v3861_v23  ;;  %3052 = vmatpush.msrb.mxu3 %v3862_v5 }
 0x522   : > { %2833 = vmatpush.msra.mxu0 %v2592_v6  ;;  %2853 = vmatpush.msra.mxu1 %v2593_v45  ;;  %v2559_v22 = vsel %vm520_vm5, %v3844_v26, %v3845_v58  ;;  %v2560_v34 = vsel %vm520_vm5, %v3845_v58, %v3799_v44  ;;  %v3867_v44 = vld [vmem:[%s3956_s23 + $0x20] sm:$0xff] }
 0x523   : > { %v2527_v33 = vsel %vm2526_vm13, %v3849_v48, %v3850_v51  ;;  %v2528_v8 = vsel %vm2526_vm13, %v3850_v51, %v3819_v54 }
 0x524   : > { %2834 = vmatpush.msra.mxu0 %v2559_v22  ;;  %2854 = vmatpush.msra.mxu1 %v2560_v34 }
 0x526   : > { %2835 = vmatpush.msra.mxu0 %v2527_v33  ;;  %2855 = vmatpush.msra.mxu1 %v2528_v8 }
 0x527   : > { %3230 = vmatmul.msk.f32.vlgmr.msra.gmra.mxu0 %vm780_vm7, %v5218_v49  ;;  %3231 = vmatmul.msk.f32.vlgmr.msra.gmra.mxu1 %vm780_vm7, %v5218_v49 }
 0x528   : > { %3282 = vmatpush.msk.msrb.mxu0 %vm227_vm0, %v3879_v2  ;;  %3283 = vmatpush.msk.msrb.mxu1 %vm227_vm0, %v3879_v2  ;;  %v2904_v2 = vld [vmem:[%s5356_s4] sm:$0xff]  ;;  %vm2940_vm0 = vcmask 523264  }
 0x52a   : > { %2962 = vmatpush.msrb.mxu0 %v3863_v4  ;;  %2991 = vmatpush.msrb.mxu1 %v3864_v55 }
 0x52c   : > { %2963 = vmatpush.msrb.mxu0 %v3865_v52  ;;  %2992 = vmatpush.msrb.mxu1 %v3866_v17 }
 0x52e   : > { %2964 = vmatpush.msrb.mxu0 %v3867_v44  ;;  %2993 = vmatpush.msrb.mxu1 %v3868_v59 }
 0x530   : > { %2965 = vmatpush.msrb.mxu0 %v3869_v50  ;;  %2994 = vmatpush.msrb.mxu1 %v3870_v30 }
 0x59b   : > { %v2877_v32 = vpop.f32.mrf.mxu2  ;;  %v2897_v1 = vpop.f32.mrf.mxu3 }
 0x59c   : > { %3024 = vmatpush.msrb.mxu2 %v2877_v32  ;;  %3053 = vmatpush.msrb.mxu3 %v2897_v1 }
 0x59e   : > { %3025 = vmatpush.msrb.mxu2 %v5090_v42  ;;  %3054 = vmatpush.msrb.mxu3 %v5088_v29  ;;  %v2905_v29 = vld [vmem:[%s5356_s4 + $0x8] sm:$0xff] }
 0x5a0   : > { %3026 = vmatpush.msrb.mxu2 %v4716_v20  ;;  %3055 = vmatpush.msrb.mxu3 %v4703_v16  ;;  %v2906_v16 = vld [vmem:[%s5356_s4 + $0x10] sm:$0xff]  ;;  %v2907_v20 = vld [vmem:[%s5356_s4 + $0x18] sm:$0xff] }
 0x5a1   : > { %3242 = vmatmul.msk.f32.vlgmr.msrb.gmra.mxu2 %vm2940_vm0, %v2904_v2  ;;  %3246 = vmatmul.msk.f32.vlgmr.msrb.gmra.mxu3 %vm2940_vm0, %v2904_v2 }
 0x5a4   : > { %v2837_v31 = vpop.f32.mrf.mxu0  ;;  %v2857_v9 = vpop.f32.mrf.mxu1 }
 0x5a5   : > { %2966 = vmatpush.msrb.mxu0 %v2837_v31  ;;  %2995 = vmatpush.msrb.mxu1 %v2857_v9 }
 0x5a7   : > { %2967 = vmatpush.msrb.mxu0 %v5102_v11  ;;  %2996 = vmatpush.msrb.mxu1 %v5086_v38 }
 0x5a9   : > { %2968 = vmatpush.msrb.mxu0 %v4741_v21  ;;  %2997 = vmatpush.msrb.mxu1 %v4734_v25 }
 0x5aa   : > { %3234 = vmatmul.msk.f32.vlgmr.msrb.gmra.mxu0 %vm2940_vm0, %v2904_v2  ;;  %3238 = vmatmul.msk.f32.vlgmr.msrb.gmra.mxu1 %vm2940_vm0, %v2904_v2 }
 0x5ab   : > { %3243 = vmatmul.msk.f32.gmra.mxu2 %vm2940_vm0, %v2905_v29  ;;  %3247 = vmatmul.msk.f32.gmra.mxu3 %vm2940_vm0, %v2905_v29 }
 0x5b2   : > { %3235 = vmatmul.msk.f32.gmra.mxu0 %vm2940_vm0, %v2905_v29  ;;  %3239 = vmatmul.msk.f32.gmra.mxu1 %vm2940_vm0, %v2905_v29 }
 0x5b3   : > { %3244 = vmatmul.msk.f32.gmra.mxu2 %vm2940_vm0, %v2906_v16  ;;  %3248 = vmatmul.msk.f32.gmra.mxu3 %vm2940_vm0, %v2906_v16 }
 0x5ba   : > { %3236 = vmatmul.msk.f32.gmra.mxu0 %vm2940_vm0, %v2906_v16  ;;  %3240 = vmatmul.msk.f32.gmra.mxu1 %vm2940_vm0, %v2906_v16 }
 0x5bb   : > { %3245 = vmatmul.msk.f32.gmra.mxu2 %vm2940_vm0, %v2907_v20  ;;  %3249 = vmatmul.msk.f32.gmra.mxu3 %vm2940_vm0, %v2907_v20 }
 0x5c2   : > { %3237 = vmatmul.msk.f32.gmra.mxu0 %vm2940_vm0, %v2907_v20  ;;  %3241 = vmatmul.msk.f32.gmra.mxu1 %vm2940_vm0, %v2907_v20 }
 0x624   : > { %v3028_v25 = vpop.f32.mrf.mxu2  ;;  %v3057_v21 = vpop.f32.mrf.mxu3 }
 0x625   : > { %vm3071_vm15 = vcmp.ge.f32.partialorder %v3028_v25, 0.0  ;;  %v3087_v38 = vmul.f32 0.01, %v3028_v25  ;;  %vm3072_vm5 = vcmp.ge.f32.partialorder %v3057_v21, 0.0  ;;  %v3088_v42 = vmul.f32 0.01, %v3057_v21 }
 0x627   : > { %v3103_v11 = vsel %vm3071_vm15, %v3028_v25, %v3087_v38  ;;  %v3104_v18 = vsel %vm3072_vm5, %v3057_v21, %v3088_v42  ;;  %v2970_v54 = vpop.f32.mrf.mxu0  ;;  %v2999_v61 = vpop.f32.mrf.mxu1 }
 0x628   : > { %3119 = vst [vmem:[%s5331_s14 + $0x10] sm:$0xff] %v3103_v11  ;;  %vm3069_vm7 = vcmp.ge.f32.partialorder %v2970_v54, 0.0  ;;  %v3085_v27 = vmul.f32 0.01, %v2970_v54  ;;  %vm3070_vm8 = vcmp.ge.f32.partialorder %v2999_v61, 0.0 }
 0x629   : > { %3120 = vst [vmem:[%s5331_s14 + $0x18] sm:$0xff] %v3104_v18  ;;  %v3086_v53 = vmul.f32 0.01, %v2999_v61 }
 0x62a   : > { %v3101_v24 = vsel %vm3069_vm7, %v2970_v54, %v3085_v27 }
 0x62b   : > { %3117 = vst [vmem:[%s5331_s14] sm:$0xff] %v3101_v24  ;;  %v3102_v49 = vsel %vm3070_vm8, %v2999_v61, %v3086_v53 }
 0x62c   : > { %3118 = vst [vmem:[%s5331_s14 + $0x8] sm:$0xff] %v3102_v49 }
 0x62e   : > { %v3031_v13 = vpop.f32.mrf.mxu2  ;;  %v3060_v63 = vpop.f32.mrf.mxu3 }
 0x62f   : > { %vm3075_vm9 = vcmp.ge.f32.partialorder %v3031_v13, 0.0  ;;  %v3091_v15 = vmul.f32 0.01, %v3031_v13  ;;  %vm3076_vm14 = vcmp.ge.f32.partialorder %v3060_v63, 0.0  ;;  %v3092_v41 = vmul.f32 0.01, %v3060_v63  ;;  %v2973_v14 = vpop.f32.mrf.mxu0  ;;  %v3002_v39 = vpop.f32.mrf.mxu1 }
 0x630   : > { %vm3073_vm1 = vcmp.ge.f32.partialorder %v2973_v14, 0.0  ;;  %v3089_v60 = vmul.f32 0.01, %v2973_v14  ;;  %vm3074_vm2 = vcmp.ge.f32.partialorder %v3002_v39, 0.0  ;;  %v3090_v28 = vmul.f32 0.01, %v3002_v39 }
 0x631   : > { %v3107_v19 = vsel %vm3075_vm9, %v3031_v13, %v3091_v15  ;;  %v3108_v37 = vsel %vm3076_vm14, %v3060_v63, %v3092_v41 }
 0x632   : > { %3123 = vst [vmem:[%s5331_s14 + $0x30] sm:$0xff] %v3107_v19  ;;  %v3105_v12 = vsel %vm3073_vm1, %v2973_v14, %v3089_v60  ;;  %v3106_v40 = vsel %vm3074_vm2, %v3002_v39, %v3090_v28 }
 0x633   : > { %3124 = vst [vmem:[%s5331_s14 + $0x38] sm:$0xff] %v3108_v37 }
 0x634   : > { %3121 = vst [vmem:[%s5331_s14 + $0x20] sm:$0xff] %v3105_v12 }
 0x635   : > { %3122 = vst [vmem:[%s5331_s14 + $0x28] sm:$0xff] %v3106_v40 }
 0x636   : > { %v3034_v0 = vpop.f32.mrf.mxu2  ;;  %v3063_v47 = vpop.f32.mrf.mxu3 }
 0x637   : > { %vm3079_vm3 = vcmp.ge.f32.partialorder %v3034_v0, 0.0  ;;  %v3095_v57 = vmul.f32 0.01, %v3034_v0  ;;  %vm3080_vm4 = vcmp.ge.f32.partialorder %v3063_v47, 0.0  ;;  %v3096_v56 = vmul.f32 0.01, %v3063_v47  ;;  %v2976_v10 = vpop.f32.mrf.mxu0  ;;  %v3005_v58 = vpop.f32.mrf.mxu1 }
 0x638   : > { %vm3077_vm6 = vcmp.ge.f32.partialorder %v2976_v10, 0.0  ;;  %v3093_v26 = vmul.f32 0.01, %v2976_v10  ;;  %vm3078_vm10 = vcmp.ge.f32.partialorder %v3005_v58, 0.0  ;;  %v3094_v46 = vmul.f32 0.01, %v3005_v58 }
 0x639   : > { %v3111_v3 = vsel %vm3079_vm3, %v3034_v0, %v3095_v57  ;;  %v3112_v36 = vsel %vm3080_vm4, %v3063_v47, %v3096_v56 }
 0x63a   : > { %3127 = vst [vmem:[%s5331_s14 + $0x50] sm:$0xff] %v3111_v3  ;;  %v3109_v62 = vsel %vm3077_vm6, %v2976_v10, %v3093_v26  ;;  %v3110_v35 = vsel %vm3078_vm10, %v3005_v58, %v3094_v46 }
 0x63b   : > { %3128 = vst [vmem:[%s5331_s14 + $0x58] sm:$0xff] %v3112_v36 }
 0x63c   : > { %3125 = vst [vmem:[%s5331_s14 + $0x40] sm:$0xff] %v3109_v62 }
 0x63d   : > { %3126 = vst [vmem:[%s5331_s14 + $0x48] sm:$0xff] %v3110_v35 }
 0x63e   : > { %v3037_v7 = vpop.f32.mrf.mxu2  ;;  %v3066_v51 = vpop.f32.mrf.mxu3 }
 0x63f   : > { %vm3083_vm11 = vcmp.ge.f32.partialorder %v3037_v7, 0.0  ;;  %v3099_v48 = vmul.f32 0.01, %v3037_v7  ;;  %vm3084_vm12 = vcmp.ge.f32.partialorder %v3066_v51, 0.0  ;;  %v3100_v6 = vmul.f32 0.01, %v3066_v51  ;;  %v2979_v45 = vpop.f32.mrf.mxu0  ;;  %v3008_v43 = vpop.f32.mrf.mxu1 }
 0x640   : > { %vm3081_vm13 = vcmp.ge.f32.partialorder %v2979_v45, 0.0  ;;  %v3097_v23 = vmul.f32 0.01, %v2979_v45  ;;  %vm3082_vm0 = vcmp.ge.f32.partialorder %v3008_v43, 0.0  ;;  %v3098_v22 = vmul.f32 0.01, %v3008_v43 }
 0x641   : > { %v3115_v34 = vsel %vm3083_vm11, %v3037_v7, %v3099_v48  ;;  %v3116_v33 = vsel %vm3084_vm12, %v3066_v51, %v3100_v6 }
 0x642   : > { %3131 = vst [vmem:[%s5331_s14 + $0x70] sm:$0xff] %v3115_v34  ;;  %v3113_v5 = vsel %vm3081_vm13, %v2979_v45, %v3097_v23  ;;  %v3114_v8 = vsel %vm3082_vm0, %v3008_v43, %v3098_v22 }
 0x643   : > { %3132 = vst [vmem:[%s5331_s14 + $0x78] sm:$0xff] %v3116_v33 }
 0x644   : > { %3129 = vst [vmem:[%s5331_s14 + $0x60] sm:$0xff] %v3113_v5 }
 0x645   : > { %3130 = vst [vmem:[%s5331_s14 + $0x68] sm:$0xff] %v3114_v8 }
 0x646 PF: > { %s15_s18 = sadd.s32 1, %s3877_s18  }
 0x647   : > { %p12_p4 = scmp.ge.s32.totalorder %s15_s18, 4  }
 0x649   :  { %14 = sbr.rel (!%p12_p4) target bundleno = 1 (0x1), region = 70 }

</bundles_post_ra>
